<compile_context>
chip_gen: v7x
topology: tpu7x:2x2x1
jax: 0.10.0
libtpu: 0.0.40
codegen_flags: <defaults>
</compile_context>

<pallas_src>
import functools

import jax
import jax.numpy as jnp
from jax.experimental import pallas as pl
from jax.experimental.pallas import tpu as pltpu


def _round_up(x, m):
    return (x + m - 1) // m * m


# ---------------------------------------------------------------------------
# Fused EncodeBlock kernel: conv (MXU) + batch stats + BN affine + ReLU.
# Single grid step — every operand is fully VMEM-resident.
# ---------------------------------------------------------------------------
def encode_block_kernel(p_ref, w_ref, b_ref, g_ref, beta_ref, o_ref, *,
                        m_true, eps):
    # p_ref    : (M_pad, K)     bf16 im2col patches (zero rows beyond m_true)
    # w_ref    : (K, Cpad)      bf16 conv weights
    # b_ref    : (1, Cpad)      f32 conv bias
    # g_ref    : (1, Cpad)      f32 BN gamma
    # beta_ref : (1, Cpad)      f32 BN beta
    # o_ref    : (M_pad, Cpad)  bf16 (intermediate layers) or f32 (last layer)
    inv_m = 1.0 / m_true

    # Conv: bf16 operands, f32 accumulation on the MXU.
    y = jnp.dot(p_ref[...], w_ref[...], preferred_element_type=jnp.float32)
    y = y + b_ref[...]

    m_pad = y.shape[0]
    if m_pad == m_true:
        # Training-mode BatchNorm statistics over the full batch*spatial dim.
        mean = jnp.sum(y, axis=0, keepdims=True) * inv_m
        centered = y - mean
        var = jnp.sum(centered * centered, axis=0, keepdims=True) * inv_m
    else:
        # Generic path: mask zero-padded rows out of the statistics.
        row = jax.lax.broadcasted_iota(jnp.int32, (m_pad, 1), 0)
        valid = (row < m_true).astype(jnp.float32)
        mean = jnp.sum(y * valid, axis=0, keepdims=True) * inv_m
        centered = y - mean
        cv = centered * valid
        var = jnp.sum(cv * cv, axis=0, keepdims=True) * inv_m

    # Folded per-channel scale; rsqrt goes to the EUP slot (effectively free).
    scale = jax.lax.rsqrt(var + eps) * g_ref[...]
    out = jnp.maximum(centered * scale + beta_ref[...], 0.0)
    o_ref[...] = out.astype(o_ref.dtype)


# ---------------------------------------------------------------------------
# Wrapper for one EncodeBlock (conv + bn + relu)
# ---------------------------------------------------------------------------
def encode_block(x_nhwc, w_hwio, bias, gamma, beta, *, pad, stride,
                 eps=1e-5, out_dtype=jnp.bfloat16):
    N, H, W, Cin = x_nhwc.shape
    KH, KW, _, Cout = w_hwio.shape
    Ho = (H + 2 * pad - KH) // stride + 1
    Wo = (W + 2 * pad - KW) // stride + 1
    M = N * Ho * Wo
    K = KH * KW * Cin
    Cpad = _round_up(Cout, 128)        # lane-dense output channels
    M_pad = _round_up(M, 8)            # sublane alignment

    # --- glue: im2col in bf16 (half the duplicated-buffer bytes) -------------
    x_bf16 = x_nhwc.astype(jnp.bfloat16)
    if KH == 1 and KW == 1 and pad == 0 and stride == 1:
        patches = x_bf16.reshape(M, Cin)               # 1x1 conv: patches == x
    else:
        xp = jnp.pad(x_bf16, ((0, 0), (pad, pad), (pad, pad), (0, 0)))
        cols = []
        for i in range(KH):
            for j in range(KW):
                sl = jax.lax.slice(
                    xp,
                    (0, i, j, 0),
                    (N, i + (Ho - 1) * stride + 1, j + (Wo - 1) * stride + 1, Cin),
                    (1, stride, stride, 1))            # (N, Ho, Wo, Cin)
                cols.append(sl.reshape(M, Cin))
        patches = jnp.concatenate(cols, axis=1)        # (M, K), (kh,kw,cin) order

    if M_pad != M:
        patches = jnp.pad(patches, ((0, M_pad - M), (0, 0)))

    w_mat = w_hwio.reshape(K, Cout).astype(jnp.bfloat16)
    b2 = bias.reshape(1, Cout).astype(jnp.float32)
    g2 = gamma.reshape(1, Cout).astype(jnp.float32)
    bt2 = beta.reshape(1, Cout).astype(jnp.float32)
    if Cpad != Cout:
        cpad = Cpad - Cout
        w_mat = jnp.pad(w_mat, ((0, 0), (0, cpad)))
        b2 = jnp.pad(b2, ((0, 0), (0, cpad)))
        g2 = jnp.pad(g2, ((0, 0), (0, cpad)))
        bt2 = jnp.pad(bt2, ((0, 0), (0, cpad)))

    out = pl.pallas_call(
        functools.partial(encode_block_kernel, m_true=M, eps=eps),
        out_shape=jax.ShapeDtypeStruct((M_pad, Cpad), out_dtype),
        grid_spec=pltpu.PrefetchScalarGridSpec(
            num_scalar_prefetch=0,
            grid=(1,),
            in_specs=[pl.BlockSpec((M_pad, K), lambda i: (0, 0)),
                      pl.BlockSpec((K, Cpad), lambda i: (0, 0)),
                      pl.BlockSpec((1, Cpad), lambda i: (0, 0)),
                      pl.BlockSpec((1, Cpad), lambda i: (0, 0)),
                      pl.BlockSpec((1, Cpad), lambda i: (0, 0))],
            out_specs=pl.BlockSpec((M_pad, Cpad), lambda i: (0, 0))),
        compiler_params=pltpu.CompilerParams(
            dimension_semantics=("arbitrary",)),
        cost_estimate=pl.CostEstimate(
            flops=2 * M_pad * K * Cpad + 10 * M_pad * Cpad,
            transcendentals=Cpad,
            bytes_accessed=int(M_pad * K * 2 + K * Cpad * 2 + 3 * Cpad * 4
                               + M_pad * Cpad * jnp.dtype(out_dtype).itemsize)),
    )(patches, w_mat, b2, g2, bt2)

    return out[:M, :Cout].reshape(N, Ho, Wo, Cout)


# ---------------------------------------------------------------------------
# Full Encoder forward
# ---------------------------------------------------------------------------
def encoder_forward(x_nchw, params, *, pooling_kernel, middle_dim):
    x = jnp.transpose(x_nchw, (0, 2, 3, 1))           # NCHW -> NHWC
    strides = (1, 1, pooling_kernel[0], pooling_kernel[1])
    pads = (0, 1, 1, 1)
    n_layers = len(params)
    for li, ((w, b, g, beta), s, p) in enumerate(zip(params, strides, pads)):
        last = li == n_layers - 1
        # Intermediate activations stay bf16 (next layer feeds the MXU in bf16
        # anyway); the final block emits f32.
        x = encode_block(x, w, b, g, beta, pad=p, stride=s,
                         out_dtype=jnp.float32 if last else jnp.bfloat16)
    # x.view(-1, middle_dim) in PyTorch flattens NCHW order.
    return jnp.transpose(x, (0, 3, 1, 2)).reshape(-1, middle_dim)


# ---------------------------------------------------------------------------
# Pure-JAX reference (module semantics).  quantize=True applies the same
# per-layer bf16 operand rounding as the kernel's MXU / intermediate policy.
# ---------------------------------------------------------------------------
def ref_block(x, w, b, g, beta, *, pad, stride, quantize):
    if quantize:
        x = x.astype(jnp.bfloat16).astype(jnp.float32)
        w = w.astype(jnp.bfloat16).astype(jnp.float32)
    y = jax.lax.conv_general_dilated(
        x, w, (stride, stride), ((pad, pad), (pad, pad)),
        dimension_numbers=("NHWC", "HWIO", "NHWC"),
        precision=jax.lax.Precision.HIGHEST)
    y = y + b
    mean = jnp.mean(y, axis=(0, 1, 2), keepdims=True)
    var = jnp.mean(jnp.square(y - mean), axis=(0, 1, 2), keepdims=True)
    y = (y - mean) * jax.lax.rsqrt(var + 1e-5) * g + beta
    return jnp.maximum(y, 0.0)


def encoder_ref(x_nchw, params, *, pooling_kernel, middle_dim, quantize):
    x = jnp.transpose(x_nchw, (0, 2, 3, 1))
    strides = (1, 1, pooling_kernel[0], pooling_kernel[1])
    pads = (0, 1, 1, 1)
    for (w, b, g, beta), s, p in zip(params, strides, pads):
        x = ref_block(x, w, b, g, beta, pad=p, stride=s, quantize=quantize)
    return jnp.transpose(x, (0, 3, 1, 2)).reshape(-1, middle_dim)


# ---------------------------------------------------------------------------
# Deterministic synthetic parameters (no checkpoint)
# ---------------------------------------------------------------------------
def make_params(key, color_dim):
    cfg = [(color_dim, 32, 1), (32, 64, 3), (64, 128, 3), (128, 256, 3)]
    params = []
    for cin, cout, k in cfg:
        key, k1, k2, k3, k4 = jax.random.split(key, 5)
        w = 0.05 * jax.random.normal(k1, (k, k, cin, cout), jnp.float32)   # HWIO
        b = 0.05 * jax.random.normal(k2, (cout,), jnp.float32)
        gamma = 1.0 + 0.1 * jax.random.normal(k3, (cout,), jnp.float32)
        beta = 0.1 * jax.random.normal(k4, (cout,), jnp.float32)
        params.append((w, b, gamma, beta))
    return params


if __name__ == "__main__":
    # Encoder(color_dim=4, pooling_kernel=(2,2), middle_dim=256*4*4),
    # input (2, 4, 16, 16) NCHW -> output (2, 4096).
    color_dim = 4
    pooling_kernel = (2, 2)
    middle_dim = 256 * 4 * 4

    key = jax.random.PRNGKey(0)
    key, kx = jax.random.split(key)
    x = jax.random.normal(kx, (2, color_dim, 16, 16), jnp.float32)
    params = make_params(key, color_dim)

    fwd = jax.jit(functools.partial(encoder_forward,
                                    pooling_kernel=pooling_kernel,
                                    middle_dim=middle_dim))
    out = jax.block_until_ready(fwd(x, params))

    ref_q = jax.block_until_ready(
        encoder_ref(x, params, pooling_kernel=pooling_kernel,
                    middle_dim=middle_dim, quantize=True))
    ref_f = jax.block_until_ready(
        encoder_ref(x, params, pooling_kernel=pooling_kernel,
                    middle_dim=middle_dim, quantize=False))

    assert out.shape == (2, middle_dim), out.shape
    # Check vs a reference using the same bf16 operand/intermediate rounding.
    # Residual divergence comes only from MXU accumulation order and bf16
    # re-rounding at layer boundaries amplified through 4 BN layers; observed
    # max |diff| ~5e-3, so 2e-2 gives comfortable headroom on O(1) activations.
    assert jnp.allclose(out, ref_q, atol=2e-2, rtol=2e-2), \
        float(jnp.max(jnp.abs(out - ref_q)))
    # Looser sanity check vs the full-f32 module reference.
    assert jnp.allclose(out, ref_f, atol=1e-1, rtol=1e-1), \
        float(jnp.max(jnp.abs(out - ref_f)))
    print("KERNEL_OK")
</pallas_src>

<mosaic_0001>
module attributes {stable_mosaic.version = 11 : i64} {
  func.func @encode_block_kernel(%arg0: i32, %arg1: memref<512x4xbf16, #tpu.memory_space<vmem>>, %arg2: memref<4x128xbf16, #tpu.memory_space<vmem>>, %arg3: memref<1x128xf32, #tpu.memory_space<vmem>>, %arg4: memref<1x128xf32, #tpu.memory_space<vmem>>, %arg5: memref<1x128xf32, #tpu.memory_space<vmem>>, %arg6: memref<512x128xbf16, #tpu.memory_space<vmem>>) attributes {dimension_semantics = [#tpu.dimension_semantics<arbitrary>], iteration_bounds = array<i64: 1>, scalar_prefetch = 0 : i64, scratch_operands = 0 : i64, tpu.core_type = #tpu.core_type<tc>, window_params = [{pipeline_mode = #tpu.pipeline_mode<synchronous>, transform_indices = @transform_0, window_bounds = array<i64: 512, 4>}, {pipeline_mode = #tpu.pipeline_mode<synchronous>, transform_indices = @transform_1, window_bounds = array<i64: 4, 128>}, {pipeline_mode = #tpu.pipeline_mode<synchronous>, transform_indices = @transform_2, window_bounds = array<i64: 1, 128>}, {pipeline_mode = #tpu.pipeline_mode<synchronous>, transform_indices = @transform_3, window_bounds = array<i64: 1, 128>}, {pipeline_mode = #tpu.pipeline_mode<synchronous>, transform_indices = @transform_4, window_bounds = array<i64: 1, 128>}, {pipeline_mode = #tpu.pipeline_mode<synchronous>, transform_indices = @transform_5, window_bounds = array<i64: 512, 128>}]} {
    %c0 = arith.constant 0 : index
    %c0_0 = arith.constant 0 : index
    %0 = vector.load %arg1[%c0, %c0_0] : memref<512x4xbf16, #tpu.memory_space<vmem>>, vector<512x4xbf16>
    %c0_1 = arith.constant 0 : index
    %c0_2 = arith.constant 0 : index
    %1 = vector.load %arg2[%c0_1, %c0_2] : memref<4x128xbf16, #tpu.memory_space<vmem>>, vector<4x128xbf16>
    %cst = arith.constant dense<0.000000e+00> : vector<512x128xf32>
    %2 = tpu.matmul %0, %1, %cst {dimension_numbers = #tpu.dot_dimension_numbers<[1], [0], [0], [1], [0, 0, 1, 1], [], []>} : vector<512x4xbf16>, vector<4x128xbf16>, vector<512x128xf32> -> vector<512x128xf32>
    %c0_3 = arith.constant 0 : index
    %c0_4 = arith.constant 0 : index
    %3 = vector.load %arg3[%c0_3, %c0_4] : memref<1x128xf32, #tpu.memory_space<vmem>>, vector<1x128xf32>
    %4 = vector.broadcast %3 : vector<1x128xf32> to vector<512x128xf32>
    %5 = arith.addf %2, %4 : vector<512x128xf32>
    %cst_5 = arith.constant dense<0.000000e+00> : vector<128xf32>
    %6 = vector.multi_reduction <add>, %5, %cst_5 [0] : vector<512x128xf32> to vector<128xf32>
    %7 = vector.shape_cast %6 : vector<128xf32> to vector<1x128xf32>
    %cst_6 = arith.constant 0.001953125 : f32
    %8 = vector.broadcast %cst_6 : f32 to vector<1x128xf32>
    %9 = arith.mulf %7, %8 : vector<1x128xf32>
    %10 = vector.broadcast %9 : vector<1x128xf32> to vector<512x128xf32>
    %11 = arith.subf %5, %10 : vector<512x128xf32>
    %12 = arith.mulf %11, %11 : vector<512x128xf32>
    %cst_7 = arith.constant dense<0.000000e+00> : vector<128xf32>
    %13 = vector.multi_reduction <add>, %12, %cst_7 [0] : vector<512x128xf32> to vector<128xf32>
    %14 = vector.shape_cast %13 : vector<128xf32> to vector<1x128xf32>
    %cst_8 = arith.constant 0.001953125 : f32
    %15 = vector.broadcast %cst_8 : f32 to vector<1x128xf32>
    %16 = arith.mulf %14, %15 : vector<1x128xf32>
    %cst_9 = arith.constant 9.99999974E-6 : f32
    %17 = vector.broadcast %cst_9 : f32 to vector<1x128xf32>
    %18 = arith.addf %16, %17 : vector<1x128xf32>
    %19 = math.rsqrt %18 : vector<1x128xf32>
    %c0_10 = arith.constant 0 : index
    %c0_11 = arith.constant 0 : index
    %20 = vector.load %arg4[%c0_10, %c0_11] : memref<1x128xf32, #tpu.memory_space<vmem>>, vector<1x128xf32>
    %21 = arith.mulf %19, %20 : vector<1x128xf32>
    %22 = vector.broadcast %21 : vector<1x128xf32> to vector<512x128xf32>
    %23 = arith.mulf %11, %22 : vector<512x128xf32>
    %c0_12 = arith.constant 0 : index
    %c0_13 = arith.constant 0 : index
    %24 = vector.load %arg5[%c0_12, %c0_13] : memref<1x128xf32, #tpu.memory_space<vmem>>, vector<1x128xf32>
    %25 = vector.broadcast %24 : vector<1x128xf32> to vector<512x128xf32>
    %26 = arith.addf %23, %25 : vector<512x128xf32>
    %cst_14 = arith.constant 0.000000e+00 : f32
    %27 = vector.broadcast %cst_14 : f32 to vector<512x128xf32>
    %28 = arith.maximumf %26, %27 : vector<512x128xf32>
    %29 = arith.truncf %28 : vector<512x128xf32> to vector<512x128xbf16>
    %c0_15 = arith.constant 0 : index
    %c0_16 = arith.constant 0 : index
    %30 = vector.load %arg6[%c0_15, %c0_16] : memref<512x128xbf16, #tpu.memory_space<vmem>>, vector<512x128xbf16>
    tpu.vector_store %arg6[%c0_15, %c0_16], %29 {strides = array<i32>} : memref<512x128xbf16, #tpu.memory_space<vmem>>, vector<512x128xbf16>,
    return
  }
  func.func @transform_0(%arg0: i32) -> (i32, i32) {
    %c0_i32 = arith.constant 0 : i32
    %c0_i32_0 = arith.constant 0 : i32
    %c0_i32_1 = arith.constant 0 : i32
    return %c0_i32, %c0_i32_0 : i32, i32
  }
  func.func @transform_1(%arg0: i32) -> (i32, i32) {
    %c0_i32 = arith.constant 0 : i32
    %c0_i32_0 = arith.constant 0 : i32
    %c0_i32_1 = arith.constant 0 : i32
    return %c0_i32, %c0_i32_0 : i32, i32
  }
  func.func @transform_2(%arg0: i32) -> (i32, i32) {
    %c0_i32 = arith.constant 0 : i32
    %c0_i32_0 = arith.constant 0 : i32
    %c0_i32_1 = arith.constant 0 : i32
    return %c0_i32, %c0_i32_0 : i32, i32
  }
  func.func @transform_3(%arg0: i32) -> (i32, i32) {
    %c0_i32 = arith.constant 0 : i32
    %c0_i32_0 = arith.constant 0 : i32
    %c0_i32_1 = arith.constant 0 : i32
    return %c0_i32, %c0_i32_0 : i32, i32
  }
  func.func @transform_4(%arg0: i32) -> (i32, i32) {
    %c0_i32 = arith.constant 0 : i32
    %c0_i32_0 = arith.constant 0 : i32
    %c0_i32_1 = arith.constant 0 : i32
    return %c0_i32, %c0_i32_0 : i32, i32
  }
  func.func @transform_5(%arg0: i32) -> (i32, i32) {
    %c0_i32 = arith.constant 0 : i32
    %c0_i32_0 = arith.constant 0 : i32
    %c0_i32_1 = arith.constant 0 : i32
    return %c0_i32, %c0_i32_0 : i32, i32
  }
}

module attributes {stable_mosaic.version = 11 : i64} {
  func.func @encode_block_kernel(%arg0: i32, %arg1: memref<512x288xbf16, #tpu.memory_space<vmem>>, %arg2: memref<288x128xbf16, #tpu.memory_space<vmem>>, %arg3: memref<1x128xf32, #tpu.memory_space<vmem>>, %arg4: memref<1x128xf32, #tpu.memory_space<vmem>>, %arg5: memref<1x128xf32, #tpu.memory_space<vmem>>, %arg6: memref<512x128xbf16, #tpu.memory_space<vmem>>) attributes {dimension_semantics = [#tpu.dimension_semantics<arbitrary>], iteration_bounds = array<i64: 1>, scalar_prefetch = 0 : i64, scratch_operands = 0 : i64, tpu.core_type = #tpu.core_type<tc>, window_params = [{pipeline_mode = #tpu.pipeline_mode<synchronous>, transform_indices = @transform_0, window_bounds = array<i64: 512, 288>}, {pipeline_mode = #tpu.pipeline_mode<synchronous>, transform_indices = @transform_1, window_bounds = array<i64: 288, 128>}, {pipeline_mode = #tpu.pipeline_mode<synchronous>, transform_indices = @transform_2, window_bounds = array<i64: 1, 128>}, {pipeline_mode = #tpu.pipeline_mode<synchronous>, transform_indices = @transform_3, window_bounds = array<i64: 1, 128>}, {pipeline_mode = #tpu.pipeline_mode<synchronous>, transform_indices = @transform_4, window_bounds = array<i64: 1, 128>}, {pipeline_mode = #tpu.pipeline_mode<synchronous>, transform_indices = @transform_5, window_bounds = array<i64: 512, 128>}]} {
    %c0 = arith.constant 0 : index
    %c0_0 = arith.constant 0 : index
    %0 = vector.load %arg1[%c0, %c0_0] : memref<512x288xbf16, #tpu.memory_space<vmem>>, vector<512x288xbf16>
    %c0_1 = arith.constant 0 : index
    %c0_2 = arith.constant 0 : index
    %1 = vector.load %arg2[%c0_1, %c0_2] : memref<288x128xbf16, #tpu.memory_space<vmem>>, vector<288x128xbf16>
    %cst = arith.constant dense<0.000000e+00> : vector<512x128xf32>
    %2 = tpu.matmul %0, %1, %cst {dimension_numbers = #tpu.dot_dimension_numbers<[1], [0], [0], [1], [0, 0, 1, 1], [], []>} : vector<512x288xbf16>, vector<288x128xbf16>, vector<512x128xf32> -> vector<512x128xf32>
    %c0_3 = arith.constant 0 : index
    %c0_4 = arith.constant 0 : index
    %3 = vector.load %arg3[%c0_3, %c0_4] : memref<1x128xf32, #tpu.memory_space<vmem>>, vector<1x128xf32>
    %4 = vector.broadcast %3 : vector<1x128xf32> to vector<512x128xf32>
    %5 = arith.addf %2, %4 : vector<512x128xf32>
    %cst_5 = arith.constant dense<0.000000e+00> : vector<128xf32>
    %6 = vector.multi_reduction <add>, %5, %cst_5 [0] : vector<512x128xf32> to vector<128xf32>
    %7 = vector.shape_cast %6 : vector<128xf32> to vector<1x128xf32>
    %cst_6 = arith.constant 0.001953125 : f32
    %8 = vector.broadcast %cst_6 : f32 to vector<1x128xf32>
    %9 = arith.mulf %7, %8 : vector<1x128xf32>
    %10 = vector.broadcast %9 : vector<1x128xf32> to vector<512x128xf32>
    %11 = arith.subf %5, %10 : vector<512x128xf32>
    %12 = arith.mulf %11, %11 : vector<512x128xf32>
    %cst_7 = arith.constant dense<0.000000e+00> : vector<128xf32>
    %13 = vector.multi_reduction <add>, %12, %cst_7 [0] : vector<512x128xf32> to vector<128xf32>
    %14 = vector.shape_cast %13 : vector<128xf32> to vector<1x128xf32>
    %cst_8 = arith.constant 0.001953125 : f32
    %15 = vector.broadcast %cst_8 : f32 to vector<1x128xf32>
    %16 = arith.mulf %14, %15 : vector<1x128xf32>
    %cst_9 = arith.constant 9.99999974E-6 : f32
    %17 = vector.broadcast %cst_9 : f32 to vector<1x128xf32>
    %18 = arith.addf %16, %17 : vector<1x128xf32>
    %19 = math.rsqrt %18 : vector<1x128xf32>
    %c0_10 = arith.constant 0 : index
    %c0_11 = arith.constant 0 : index
    %20 = vector.load %arg4[%c0_10, %c0_11] : memref<1x128xf32, #tpu.memory_space<vmem>>, vector<1x128xf32>
    %21 = arith.mulf %19, %20 : vector<1x128xf32>
    %22 = vector.broadcast %21 : vector<1x128xf32> to vector<512x128xf32>
    %23 = arith.mulf %11, %22 : vector<512x128xf32>
    %c0_12 = arith.constant 0 : index
    %c0_13 = arith.constant 0 : index
    %24 = vector.load %arg5[%c0_12, %c0_13] : memref<1x128xf32, #tpu.memory_space<vmem>>, vector<1x128xf32>
    %25 = vector.broadcast %24 : vector<1x128xf32> to vector<512x128xf32>
    %26 = arith.addf %23, %25 : vector<512x128xf32>
    %cst_14 = arith.constant 0.000000e+00 : f32
    %27 = vector.broadcast %cst_14 : f32 to vector<512x128xf32>
    %28 = arith.maximumf %26, %27 : vector<512x128xf32>
    %29 = arith.truncf %28 : vector<512x128xf32> to vector<512x128xbf16>
    %c0_15 = arith.constant 0 : index
    %c0_16 = arith.constant 0 : index
    %30 = vector.load %arg6[%c0_15, %c0_16] : memref<512x128xbf16, #tpu.memory_space<vmem>>, vector<512x128xbf16>
    tpu.vector_store %arg6[%c0_15, %c0_16], %29 {strides = array<i32>} : memref<512x128xbf16, #tpu.memory_space<vmem>>, vector<512x128xbf16>,
    return
  }
  func.func @transform_0(%arg0: i32) -> (i32, i32) {
    %c0_i32 = arith.constant 0 : i32
    %c0_i32_0 = arith.constant 0 : i32
    %c0_i32_1 = arith.constant 0 : i32
    return %c0_i32, %c0_i32_0 : i32, i32
  }
  func.func @transform_1(%arg0: i32) -> (i32, i32) {
    %c0_i32 = arith.constant 0 : i32
    %c0_i32_0 = arith.constant 0 : i32
    %c0_i32_1 = arith.constant 0 : i32
    return %c0_i32, %c0_i32_0 : i32, i32
  }
  func.func @transform_2(%arg0: i32) -> (i32, i32) {
    %c0_i32 = arith.constant 0 : i32
    %c0_i32_0 = arith.constant 0 : i32
    %c0_i32_1 = arith.constant 0 : i32
    return %c0_i32, %c0_i32_0 : i32, i32
  }
  func.func @transform_3(%arg0: i32) -> (i32, i32) {
    %c0_i32 = arith.constant 0 : i32
    %c0_i32_0 = arith.constant 0 : i32
    %c0_i32_1 = arith.constant 0 : i32
    return %c0_i32, %c0_i32_0 : i32, i32
  }
  func.func @transform_4(%arg0: i32) -> (i32, i32) {
    %c0_i32 = arith.constant 0 : i32
    %c0_i32_0 = arith.constant 0 : i32
    %c0_i32_1 = arith.constant 0 : i32
    return %c0_i32, %c0_i32_0 : i32, i32
  }
  func.func @transform_5(%arg0: i32) -> (i32, i32) {
    %c0_i32 = arith.constant 0 : i32
    %c0_i32_0 = arith.constant 0 : i32
    %c0_i32_1 = arith.constant 0 : i32
    return %c0_i32, %c0_i32_0 : i32, i32
  }
}

module attributes {stable_mosaic.version = 11 : i64} {
  func.func @encode_block_kernel(%arg0: i32, %arg1: memref<128x576xbf16, #tpu.memory_space<vmem>>, %arg2: memref<576x128xbf16, #tpu.memory_space<vmem>>, %arg3: memref<1x128xf32, #tpu.memory_space<vmem>>, %arg4: memref<1x128xf32, #tpu.memory_space<vmem>>, %arg5: memref<1x128xf32, #tpu.memory_space<vmem>>, %arg6: memref<128x128xbf16, #tpu.memory_space<vmem>>) attributes {dimension_semantics = [#tpu.dimension_semantics<arbitrary>], iteration_bounds = array<i64: 1>, scalar_prefetch = 0 : i64, scratch_operands = 0 : i64, tpu.core_type = #tpu.core_type<tc>, window_params = [{pipeline_mode = #tpu.pipeline_mode<synchronous>, transform_indices = @transform_0, window_bounds = array<i64: 128, 576>}, {pipeline_mode = #tpu.pipeline_mode<synchronous>, transform_indices = @transform_1, window_bounds = array<i64: 576, 128>}, {pipeline_mode = #tpu.pipeline_mode<synchronous>, transform_indices = @transform_2, window_bounds = array<i64: 1, 128>}, {pipeline_mode = #tpu.pipeline_mode<synchronous>, transform_indices = @transform_3, window_bounds = array<i64: 1, 128>}, {pipeline_mode = #tpu.pipeline_mode<synchronous>, transform_indices = @transform_4, window_bounds = array<i64: 1, 128>}, {pipeline_mode = #tpu.pipeline_mode<synchronous>, transform_indices = @transform_5, window_bounds = array<i64: 128, 128>}]} {
    %c0 = arith.constant 0 : index
    %c0_0 = arith.constant 0 : index
    %0 = vector.load %arg1[%c0, %c0_0] : memref<128x576xbf16, #tpu.memory_space<vmem>>, vector<128x576xbf16>
    %c0_1 = arith.constant 0 : index
    %c0_2 = arith.constant 0 : index
    %1 = vector.load %arg2[%c0_1, %c0_2] : memref<576x128xbf16, #tpu.memory_space<vmem>>, vector<576x128xbf16>
    %cst = arith.constant dense<0.000000e+00> : vector<128x128xf32>
    %2 = tpu.matmul %0, %1, %cst {dimension_numbers = #tpu.dot_dimension_numbers<[1], [0], [0], [1], [0, 0, 1, 1], [], []>} : vector<128x576xbf16>, vector<576x128xbf16>, vector<128x128xf32> -> vector<128x128xf32>
    %c0_3 = arith.constant 0 : index
    %c0_4 = arith.constant 0 : index
    %3 = vector.load %arg3[%c0_3, %c0_4] : memref<1x128xf32, #tpu.memory_space<vmem>>, vector<1x128xf32>
    %4 = vector.broadcast %3 : vector<1x128xf32> to vector<128x128xf32>
    %5 = arith.addf %2, %4 : vector<128x128xf32>
    %cst_5 = arith.constant dense<0.000000e+00> : vector<128xf32>
    %6 = vector.multi_reduction <add>, %5, %cst_5 [0] : vector<128x128xf32> to vector<128xf32>
    %7 = vector.shape_cast %6 : vector<128xf32> to vector<1x128xf32>
    %cst_6 = arith.constant 7.812500e-03 : f32
    %8 = vector.broadcast %cst_6 : f32 to vector<1x128xf32>
    %9 = arith.mulf %7, %8 : vector<1x128xf32>
    %10 = vector.broadcast %9 : vector<1x128xf32> to vector<128x128xf32>
    %11 = arith.subf %5, %10 : vector<128x128xf32>
    %12 = arith.mulf %11, %11 : vector<128x128xf32>
    %cst_7 = arith.constant dense<0.000000e+00> : vector<128xf32>
    %13 = vector.multi_reduction <add>, %12, %cst_7 [0] : vector<128x128xf32> to vector<128xf32>
    %14 = vector.shape_cast %13 : vector<128xf32> to vector<1x128xf32>
    %cst_8 = arith.constant 7.812500e-03 : f32
    %15 = vector.broadcast %cst_8 : f32 to vector<1x128xf32>
    %16 = arith.mulf %14, %15 : vector<1x128xf32>
    %cst_9 = arith.constant 9.99999974E-6 : f32
    %17 = vector.broadcast %cst_9 : f32 to vector<1x128xf32>
    %18 = arith.addf %16, %17 : vector<1x128xf32>
    %19 = math.rsqrt %18 : vector<1x128xf32>
    %c0_10 = arith.constant 0 : index
    %c0_11 = arith.constant 0 : index
    %20 = vector.load %arg4[%c0_10, %c0_11] : memref<1x128xf32, #tpu.memory_space<vmem>>, vector<1x128xf32>
    %21 = arith.mulf %19, %20 : vector<1x128xf32>
    %22 = vector.broadcast %21 : vector<1x128xf32> to vector<128x128xf32>
    %23 = arith.mulf %11, %22 : vector<128x128xf32>
    %c0_12 = arith.constant 0 : index
    %c0_13 = arith.constant 0 : index
    %24 = vector.load %arg5[%c0_12, %c0_13] : memref<1x128xf32, #tpu.memory_space<vmem>>, vector<1x128xf32>
    %25 = vector.broadcast %24 : vector<1x128xf32> to vector<128x128xf32>
    %26 = arith.addf %23, %25 : vector<128x128xf32>
    %cst_14 = arith.constant 0.000000e+00 : f32
    %27 = vector.broadcast %cst_14 : f32 to vector<128x128xf32>
    %28 = arith.maximumf %26, %27 : vector<128x128xf32>
    %29 = arith.truncf %28 : vector<128x128xf32> to vector<128x128xbf16>
    %c0_15 = arith.constant 0 : index
    %c0_16 = arith.constant 0 : index
    %30 = vector.load %arg6[%c0_15, %c0_16] : memref<128x128xbf16, #tpu.memory_space<vmem>>, vector<128x128xbf16>
    tpu.vector_store %arg6[%c0_15, %c0_16], %29 {strides = array<i32>} : memref<128x128xbf16, #tpu.memory_space<vmem>>, vector<128x128xbf16>,
    return
  }
  func.func @transform_0(%arg0: i32) -> (i32, i32) {
    %c0_i32 = arith.constant 0 : i32
    %c0_i32_0 = arith.constant 0 : i32
    %c0_i32_1 = arith.constant 0 : i32
    return %c0_i32, %c0_i32_0 : i32, i32
  }
  func.func @transform_1(%arg0: i32) -> (i32, i32) {
    %c0_i32 = arith.constant 0 : i32
    %c0_i32_0 = arith.constant 0 : i32
    %c0_i32_1 = arith.constant 0 : i32
    return %c0_i32, %c0_i32_0 : i32, i32
  }
  func.func @transform_2(%arg0: i32) -> (i32, i32) {
    %c0_i32 = arith.constant 0 : i32
    %c0_i32_0 = arith.constant 0 : i32
    %c0_i32_1 = arith.constant 0 : i32
    return %c0_i32, %c0_i32_0 : i32, i32
  }
  func.func @transform_3(%arg0: i32) -> (i32, i32) {
    %c0_i32 = arith.constant 0 : i32
    %c0_i32_0 = arith.constant 0 : i32
    %c0_i32_1 = arith.constant 0 : i32
    return %c0_i32, %c0_i32_0 : i32, i32
  }
  func.func @transform_4(%arg0: i32) -> (i32, i32) {
    %c0_i32 = arith.constant 0 : i32
    %c0_i32_0 = arith.constant 0 : i32
    %c0_i32_1 = arith.constant 0 : i32
    return %c0_i32, %c0_i32_0 : i32, i32
  }
  func.func @transform_5(%arg0: i32) -> (i32, i32) {
    %c0_i32 = arith.constant 0 : i32
    %c0_i32_0 = arith.constant 0 : i32
    %c0_i32_1 = arith.constant 0 : i32
    return %c0_i32, %c0_i32_0 : i32, i32
  }
}

module attributes {stable_mosaic.version = 11 : i64} {
  func.func @encode_block_kernel(%arg0: i32, %arg1: memref<32x1152xbf16, #tpu.memory_space<vmem>>, %arg2: memref<1152x256xbf16, #tpu.memory_space<vmem>>, %arg3: memref<1x256xf32, #tpu.memory_space<vmem>>, %arg4: memref<1x256xf32, #tpu.memory_space<vmem>>, %arg5: memref<1x256xf32, #tpu.memory_space<vmem>>, %arg6: memref<32x256xf32, #tpu.memory_space<vmem>>) attributes {dimension_semantics = [#tpu.dimension_semantics<arbitrary>], iteration_bounds = array<i64: 1>, scalar_prefetch = 0 : i64, scratch_operands = 0 : i64, tpu.core_type = #tpu.core_type<tc>, window_params = [{pipeline_mode = #tpu.pipeline_mode<synchronous>, transform_indices = @transform_0, window_bounds = array<i64: 32, 1152>}, {pipeline_mode = #tpu.pipeline_mode<synchronous>, transform_indices = @transform_1, window_bounds = array<i64: 1152, 256>}, {pipeline_mode = #tpu.pipeline_mode<synchronous>, transform_indices = @transform_2, window_bounds = array<i64: 1, 256>}, {pipeline_mode = #tpu.pipeline_mode<synchronous>, transform_indices = @transform_3, window_bounds = array<i64: 1, 256>}, {pipeline_mode = #tpu.pipeline_mode<synchronous>, transform_indices = @transform_4, window_bounds = array<i64: 1, 256>}, {pipeline_mode = #tpu.pipeline_mode<synchronous>, transform_indices = @transform_5, window_bounds = array<i64: 32, 256>}]} {
    %c0 = arith.constant 0 : index
    %c0_0 = arith.constant 0 : index
    %0 = vector.load %arg1[%c0, %c0_0] : memref<32x1152xbf16, #tpu.memory_space<vmem>>, vector<32x1152xbf16>
    %c0_1 = arith.constant 0 : index
    %c0_2 = arith.constant 0 : index
    %1 = vector.load %arg2[%c0_1, %c0_2] : memref<1152x256xbf16, #tpu.memory_space<vmem>>, vector<1152x256xbf16>
    %cst = arith.constant dense<0.000000e+00> : vector<32x256xf32>
    %2 = tpu.matmul %0, %1, %cst {dimension_numbers = #tpu.dot_dimension_numbers<[1], [0], [0], [1], [0, 0, 1, 1], [], []>} : vector<32x1152xbf16>, vector<1152x256xbf16>, vector<32x256xf32> -> vector<32x256xf32>
    %c0_3 = arith.constant 0 : index
    %c0_4 = arith.constant 0 : index
    %3 = vector.load %arg3[%c0_3, %c0_4] : memref<1x256xf32, #tpu.memory_space<vmem>>, vector<1x256xf32>
    %4 = vector.broadcast %3 : vector<1x256xf32> to vector<32x256xf32>
    %5 = arith.addf %2, %4 : vector<32x256xf32>
    %cst_5 = arith.constant dense<0.000000e+00> : vector<256xf32>
    %6 = vector.multi_reduction <add>, %5, %cst_5 [0] : vector<32x256xf32> to vector<256xf32>
    %7 = vector.shape_cast %6 : vector<256xf32> to vector<1x256xf32>
    %cst_6 = arith.constant 3.125000e-02 : f32
    %8 = vector.broadcast %cst_6 : f32 to vector<1x256xf32>
    %9 = arith.mulf %7, %8 : vector<1x256xf32>
    %10 = vector.broadcast %9 : vector<1x256xf32> to vector<32x256xf32>
    %11 = arith.subf %5, %10 : vector<32x256xf32>
    %12 = arith.mulf %11, %11 : vector<32x256xf32>
    %cst_7 = arith.constant dense<0.000000e+00> : vector<256xf32>
    %13 = vector.multi_reduction <add>, %12, %cst_7 [0] : vector<32x256xf32> to vector<256xf32>
    %14 = vector.shape_cast %13 : vector<256xf32> to vector<1x256xf32>
    %cst_8 = arith.constant 3.125000e-02 : f32
    %15 = vector.broadcast %cst_8 : f32 to vector<1x256xf32>
    %16 = arith.mulf %14, %15 : vector<1x256xf32>
    %cst_9 = arith.constant 9.99999974E-6 : f32
    %17 = vector.broadcast %cst_9 : f32 to vector<1x256xf32>
    %18 = arith.addf %16, %17 : vector<1x256xf32>
    %19 = math.rsqrt %18 : vector<1x256xf32>
    %c0_10 = arith.constant 0 : index
    %c0_11 = arith.constant 0 : index
    %20 = vector.load %arg4[%c0_10, %c0_11] : memref<1x256xf32, #tpu.memory_space<vmem>>, vector<1x256xf32>
    %21 = arith.mulf %19, %20 : vector<1x256xf32>
    %22 = vector.broadcast %21 : vector<1x256xf32> to vector<32x256xf32>
    %23 = arith.mulf %11, %22 : vector<32x256xf32>
    %c0_12 = arith.constant 0 : index
    %c0_13 = arith.constant 0 : index
    %24 = vector.load %arg5[%c0_12, %c0_13] : memref<1x256xf32, #tpu.memory_space<vmem>>, vector<1x256xf32>
    %25 = vector.broadcast %24 : vector<1x256xf32> to vector<32x256xf32>
    %26 = arith.addf %23, %25 : vector<32x256xf32>
    %cst_14 = arith.constant 0.000000e+00 : f32
    %27 = vector.broadcast %cst_14 : f32 to vector<32x256xf32>
    %28 = arith.maximumf %26, %27 : vector<32x256xf32>
    %c0_15 = arith.constant 0 : index
    %c0_16 = arith.constant 0 : index
    %29 = vector.load %arg6[%c0_15, %c0_16] : memref<32x256xf32, #tpu.memory_space<vmem>>, vector<32x256xf32>
    tpu.vector_store %arg6[%c0_15, %c0_16], %28 {strides = array<i32>} : memref<32x256xf32, #tpu.memory_space<vmem>>, vector<32x256xf32>,
    return
  }
  func.func @transform_0(%arg0: i32) -> (i32, i32) {
    %c0_i32 = arith.constant 0 : i32
    %c0_i32_0 = arith.constant 0 : i32
    %c0_i32_1 = arith.constant 0 : i32
    return %c0_i32, %c0_i32_0 : i32, i32
  }
  func.func @transform_1(%arg0: i32) -> (i32, i32) {
    %c0_i32 = arith.constant 0 : i32
    %c0_i32_0 = arith.constant 0 : i32
    %c0_i32_1 = arith.constant 0 : i32
    return %c0_i32, %c0_i32_0 : i32, i32
  }
  func.func @transform_2(%arg0: i32) -> (i32, i32) {
    %c0_i32 = arith.constant 0 : i32
    %c0_i32_0 = arith.constant 0 : i32
    %c0_i32_1 = arith.constant 0 : i32
    return %c0_i32, %c0_i32_0 : i32, i32
  }
  func.func @transform_3(%arg0: i32) -> (i32, i32) {
    %c0_i32 = arith.constant 0 : i32
    %c0_i32_0 = arith.constant 0 : i32
    %c0_i32_1 = arith.constant 0 : i32
    return %c0_i32, %c0_i32_0 : i32, i32
  }
  func.func @transform_4(%arg0: i32) -> (i32, i32) {
    %c0_i32 = arith.constant 0 : i32
    %c0_i32_0 = arith.constant 0 : i32
    %c0_i32_1 = arith.constant 0 : i32
    return %c0_i32, %c0_i32_0 : i32, i32
  }
  func.func @transform_5(%arg0: i32) -> (i32, i32) {
    %c0_i32 = arith.constant 0 : i32
    %c0_i32_0 = arith.constant 0 : i32
    %c0_i32_1 = arith.constant 0 : i32
    return %c0_i32, %c0_i32_0 : i32, i32
  }
}

</mosaic_0001>

<bundles_post_ra>
// kernel: encoder_forward.4
= control target key start
LH: loop header
LB: loop body
LE: loop exit
PB: predicated region body
PF: predicated region fallthrough
CT: control target
= control target key end

     0   :  { %vm350_vm0 = vcmask 1041408   ;;  %vm253_vm1 = vcmask 31744   ;;  %s3454_s1 = inlined_call_operand.vmem [shape: bf16[4,128], index: 1, kind: input, shape index: {}]   ;;  %s3455_s0 = inlined_call_operand.vmem [shape: bf16[512,4], index: 0, kind: input, shape index: {}]   ;;  %s3456_s2 = inlined_call_operand.vmem [shape: f32[1,128], index: 2, kind: input, shape index: {}]   ;;  %s3457_s3 = inlined_call_operand.vmem [shape: f32[1,128], index: 3, kind: input, shape index: {}]   ;;  %s3458_s4 = inlined_call_operand.vmem [shape: f32[1,128], index: 4, kind: input, shape index: {}]   ;;  %s3459_s5 = inlined_call_operand.vmem [shape: bf16[512,128], index: 5, kind: output, shape index: {}]  }
   0x1   :  { %v85_v0 = vld [vmem:[%s3454_s1] sm:$0x3]  ;;  %v1931_v3 = vld [vmem:[%s3455_s0 + $0x8] sm:$0xff]   ;;  %v1932_v4 = vld [vmem:[%s3455_s0 + $0x10] sm:$0xff]  }
   0x2   :  { %1928 = vmatprep.subr.msk.bf16.mxu0 %vm350_vm0, %v85_v0  ;;  %v352_v1 = vsel %vm350_vm0, %v85_v0, 0  ;;  %v1930_v2 = vld [vmem:[%s3455_s0] sm:$0xff]   ;;  %1929 = vmatprep.subr.msk.bf16.mxu1 %vm350_vm0, %v85_v0  ;;  %v1933_v5 = vld [vmem:[%s3455_s0 + $0x18] sm:$0xff]   ;;  %v1935_v7 = vld [vmem:[%s3455_s0 + $0x28] sm:$0xff]  }
   0x3   :  { %1861 = vmatpush3.bf16.msra.mxu0 %v352_v1  ;;  %1927 = vmatpush3.bf16.msra.mxu1 %v352_v1  ;;  %v1934_v6 = vld [vmem:[%s3455_s0 + $0x20] sm:$0xff]   ;;  %v1936_v8 = vld [vmem:[%s3455_s0 + $0x30] sm:$0xff]   ;;  %v1947_v10 = vld [vmem:[%s3455_s0 + $0x88] sm:$0xff]  }
   0x4   :  { %1862 = vmatprep.mubr.msk.bf16.mxu0 %vm253_vm1, %v1930_v2  ;;  %v1946_v9 = vld [vmem:[%s3455_s0 + $0x80] sm:$0xff]   ;;  %v1948_v11 = vld [vmem:[%s3455_s0 + $0x90] sm:$0xff]   ;;  %v1937_v12 = vld [vmem:[%s3455_s0 + $0x38] sm:$0xff]  }
   0x5   :  { %1894 = vmatprep.mubr.msk.bf16.mxu1 %vm253_vm1, %v1946_v9  ;;  %v1949_v13 = vld [vmem:[%s3455_s0 + $0x98] sm:$0xff]   ;;  %v1950_v14 = vld [vmem:[%s3455_s0 + $0xa0] sm:$0xff]   ;;  %v1951_v16 = vld [vmem:[%s3455_s0 + $0xa8] sm:$0xff]  }
   0x6   :  { %1863 = vmatmul.mubr.msk.bf16.vlgmr.msra.gmra.mrb[0].mxu0 %vm253_vm1, %v1931_v3  ;;  %1895 = vmatmul.mubr.msk.bf16.vlgmr.msra.gmra.mrb[0].mxu1 %vm253_vm1, %v1947_v10  ;;  %v1938_v15 = vld [vmem:[%s3455_s0 + $0x40] sm:$0xff]   ;;  %v1939_v17 = vld [vmem:[%s3455_s0 + $0x48] sm:$0xff]   ;;  %v1952_v18 = vld [vmem:[%s3455_s0 + $0xb0] sm:$0xff]  }
   0x7   :  { %1866 = vmatprep.mubr.msk.bf16.mxu0 %vm253_vm1, %v1932_v4  ;;  %1898 = vmatprep.mubr.msk.bf16.mxu1 %vm253_vm1, %v1948_v11  ;;  %v1940_v19 = vld [vmem:[%s3455_s0 + $0x50] sm:$0xff]   ;;  %v1953_v20 = vld [vmem:[%s3455_s0 + $0xb8] sm:$0xff]   ;;  %v1954_v22 = vld [vmem:[%s3455_s0 + $0xc0] sm:$0xff]  }
   0x8   :  { %v1941_v21 = vld [vmem:[%s3455_s0 + $0x58] sm:$0xff]   ;;  %v1942_v23 = vld [vmem:[%s3455_s0 + $0x60] sm:$0xff]   ;;  %v1955_v24 = vld [vmem:[%s3455_s0 + $0xc8] sm:$0xff]  }
   0x9   :  { %v1943_v25 = vld [vmem:[%s3455_s0 + $0x68] sm:$0xff]   ;;  %v1956_v26 = vld [vmem:[%s3455_s0 + $0xd0] sm:$0xff]   ;;  %v1957_v28 = vld [vmem:[%s3455_s0 + $0xd8] sm:$0xff]  }
   0xa   :  { %v1944_v27 = vld [vmem:[%s3455_s0 + $0x70] sm:$0xff]   ;;  %v1945_v29 = vld [vmem:[%s3455_s0 + $0x78] sm:$0xff]   ;;  %v1958_v30 = vld [vmem:[%s3455_s0 + $0xe0] sm:$0xff]  }
   0xb   :  { %v1959_v31 = vld [vmem:[%s3455_s0 + $0xe8] sm:$0xff]   ;;  %v1960_v32 = vld [vmem:[%s3455_s0 + $0xf0] sm:$0xff]   ;;  %v1961_v33 = vld [vmem:[%s3455_s0 + $0xf8] sm:$0xff]  }
   0xc   :  { %v2128_v35 = vld [vmem:[%s3456_s2] ss:$0 sm:$0xff] }
   0xe   :  { %1867 = vmatmul.mubr.msk.bf16.gmra.mrb[4].mxu0 %vm253_vm1, %v1933_v5  ;;  %1899 = vmatmul.mubr.msk.bf16.gmra.mrb[4].mxu1 %vm253_vm1, %v1949_v13 }
   0xf   :  { %1870 = vmatprep.mubr.msk.bf16.mxu0 %vm253_vm1, %v1934_v6  ;;  %1902 = vmatprep.mubr.msk.bf16.mxu1 %vm253_vm1, %v1950_v14 }
  0x16   :  { %1871 = vmatmul.mubr.msk.bf16.gmra.mrb[8].mxu0 %vm253_vm1, %v1935_v7  ;;  %1903 = vmatmul.mubr.msk.bf16.gmra.mrb[8].mxu1 %vm253_vm1, %v1951_v16 }
  0x17   :  { %1874 = vmatprep.mubr.msk.bf16.mxu0 %vm253_vm1, %v1936_v8  ;;  %1906 = vmatprep.mubr.msk.bf16.mxu1 %vm253_vm1, %v1952_v18 }
  0x1e   :  { %1875 = vmatmul.mubr.msk.bf16.gmra.mrb[12].mxu0 %vm253_vm1, %v1937_v12  ;;  %1907 = vmatmul.mubr.msk.bf16.gmra.mrb[12].mxu1 %vm253_vm1, %v1953_v20 }
  0x1f   :  { %1878 = vmatprep.mubr.msk.bf16.mxu0 %vm253_vm1, %v1938_v15  ;;  %1910 = vmatprep.mubr.msk.bf16.mxu1 %vm253_vm1, %v1954_v22 }
  0x26   :  { %1879 = vmatmul.mubr.msk.bf16.gmra.mrb[16].mxu0 %vm253_vm1, %v1939_v17  ;;  %1911 = vmatmul.mubr.msk.bf16.gmra.mrb[16].mxu1 %vm253_vm1, %v1955_v24 }
  0x27   :  { %1882 = vmatprep.mubr.msk.bf16.mxu0 %vm253_vm1, %v1940_v19  ;;  %1914 = vmatprep.mubr.msk.bf16.mxu1 %vm253_vm1, %v1956_v26 }
  0x2e   :  { %1883 = vmatmul.mubr.msk.bf16.gmra.mrb[20].mxu0 %vm253_vm1, %v1941_v21  ;;  %1915 = vmatmul.mubr.msk.bf16.gmra.mrb[20].mxu1 %vm253_vm1, %v1957_v28 }
  0x2f   :  { %1886 = vmatprep.mubr.msk.bf16.mxu0 %vm253_vm1, %v1942_v23  ;;  %1918 = vmatprep.mubr.msk.bf16.mxu1 %vm253_vm1, %v1958_v30 }
  0x36   :  { %1887 = vmatmul.mubr.msk.bf16.gmra.mrb[24].mxu0 %vm253_vm1, %v1943_v25  ;;  %1919 = vmatmul.mubr.msk.bf16.gmra.mrb[24].mxu1 %vm253_vm1, %v1959_v31 }
  0x37   :  { %1890 = vmatprep.mubr.msk.bf16.mxu0 %vm253_vm1, %v1944_v27  ;;  %1922 = vmatprep.mubr.msk.bf16.mxu1 %vm253_vm1, %v1960_v32 }
  0x3e   :  { %1891 = vmatmul.mubr.msk.bf16.gmra.mrb[28].mxu0 %vm253_vm1, %v1945_v29  ;;  %1923 = vmatmul.mubr.msk.bf16.gmra.mrb[28].mxu1 %vm253_vm1, %v1961_v33 }
  0xd9   :  { %v1864_v34 = vpop.f32.mrb[0].mxu0  ;;  %v2157_v55 = vpop.f32.mrb[0].mxu1 }
  0xda   :  { %v388_v36 = vpop.f32.mrb[1].mxu0  ;;  %v2137_v41 = vadd.f32 %v1864_v34, %v2128_v35  ;;  %v2163_v59 = vpop.f32.mrb[1].mxu1 }
  0xdb   :  { %v1865_v37 = vpop.f32.mrb[2].mxu0  ;;  %v2131_v39 = vadd.f32 %v2128_v35, %v388_v36  ;;  %v2165_v61 = vpop.f32.mrb[2].mxu1 }
  0xdc   :  { %v391_v38 = vpop.f32.mrb[3].mxu0  ;;  %v2142_v43 = vadd.f32 %v1865_v37, %v2128_v35  ;;  %v2171_v1 = vpop.f32.mrb[3].mxu1 }
  0xdd   :  { %v2134_v40 = vadd.f32 %v2128_v35, %v391_v38 }
  0xdf   :  { %v643_v42 = vadd.f32 %v2134_v40, %v2131_v39 }
  0xe1   :  { %v644_v44 = vadd.f32 %v643_v42, %v2137_v41  ;;  %v1868_v45 = vpop.f32.mrb[4].mxu0  ;;  %v2181_v7 = vpop.f32.mrb[4].mxu1 }
  0xe2   :  { %v404_v46 = vpop.f32.mrb[5].mxu0  ;;  %v2154_v53 = vadd.f32 %v1868_v45, %v2128_v35  ;;  %v2187_v11 = vpop.f32.mrb[5].mxu1 }
  0xe3   :  { %v2146_v47 = vadd.f32 %v2128_v35, %v404_v46  ;;  %v645_v48 = vadd.f32 %v644_v44, %v2142_v43  ;;  %v1869_v49 = vpop.f32.mrb[6].mxu0  ;;  %v2189_v13 = vpop.f32.mrb[6].mxu1 }
  0xe4   :  { %v407_v50 = vpop.f32.mrb[7].mxu0  ;;  %v2160_v56 = vadd.f32 %v1869_v49, %v2128_v35  ;;  %v2195_v17 = vpop.f32.mrb[7].mxu1 }
  0xe5   :  { %v646_v51 = vadd.f32 %v645_v48, %v2146_v47  ;;  %v2151_v52 = vadd.f32 %v2128_v35, %v407_v50 }
  0xe7   :  { %v647_v54 = vadd.f32 %v646_v51, %v2151_v52 }
  0xe9   :  { %v648_v57 = vadd.f32 %v647_v54, %v2154_v53  ;;  %v1872_v58 = vpop.f32.mrb[8].mxu0  ;;  %v2205_v23 = vpop.f32.mrb[8].mxu1 }
  0xea   :  { %v420_v60 = vpop.f32.mrb[9].mxu0  ;;  %v2178_v5 = vadd.f32 %v1872_v58, %v2128_v35  ;;  %v2211_v27 = vpop.f32.mrb[9].mxu1 }
  0xeb   :  { %v2168_v62 = vadd.f32 %v2128_v35, %v420_v60  ;;  %v649_v63 = vadd.f32 %v648_v57, %v2160_v56  ;;  %v1873_v0 = vpop.f32.mrb[10].mxu0  ;;  %v2213_v29 = vpop.f32.mrb[10].mxu1 }
  0xec   :  { %v423_v2 = vpop.f32.mrb[11].mxu0  ;;  %v2184_v8 = vadd.f32 %v1873_v0, %v2128_v35  ;;  %v2219_v33 = vpop.f32.mrb[11].mxu1 }
  0xed   :  { %v650_v3 = vadd.f32 %v649_v63, %v2168_v62  ;;  %v2175_v4 = vadd.f32 %v2128_v35, %v423_v2 }
  0xef   :  { %v651_v6 = vadd.f32 %v650_v3, %v2175_v4 }
  0xf1   :  { %v652_v9 = vadd.f32 %v651_v6, %v2178_v5  ;;  %v1876_v10 = vpop.f32.mrb[12].mxu0  ;;  %v2229_v44 = vpop.f32.mrb[12].mxu1 }
  0xf2   :  { %v436_v12 = vpop.f32.mrb[13].mxu0  ;;  %v2202_v21 = vadd.f32 %v1876_v10, %v2128_v35  ;;  %v2235_v49 = vpop.f32.mrb[13].mxu1 }
  0xf3   :  { %v2192_v14 = vadd.f32 %v2128_v35, %v436_v12  ;;  %v653_v15 = vadd.f32 %v652_v9, %v2184_v8  ;;  %v1877_v16 = vpop.f32.mrb[14].mxu0  ;;  %v2237_v51 = vpop.f32.mrb[14].mxu1 }
  0xf4   :  { %v439_v18 = vpop.f32.mrb[15].mxu0  ;;  %v2208_v24 = vadd.f32 %v1877_v16, %v2128_v35  ;;  %v2243_v60 = vpop.f32.mrb[15].mxu1 }
  0xf5   :  { %v654_v19 = vadd.f32 %v653_v15, %v2192_v14  ;;  %v2199_v20 = vadd.f32 %v2128_v35, %v439_v18 }
  0xf7   :  { %v655_v22 = vadd.f32 %v654_v19, %v2199_v20 }
  0xf9   :  { %v656_v25 = vadd.f32 %v655_v22, %v2202_v21  ;;  %v1880_v26 = vpop.f32.mrb[16].mxu0  ;;  %v2253_v9 = vpop.f32.mrb[16].mxu1 }
  0xfa   :  { %v452_v28 = vpop.f32.mrb[17].mxu0  ;;  %v2226_v38 = vadd.f32 %v1880_v26, %v2128_v35  ;;  %v2259_v16 = vpop.f32.mrb[17].mxu1 }
  0xfb   :  { %v2216_v30 = vadd.f32 %v2128_v35, %v452_v28  ;;  %v657_v31 = vadd.f32 %v656_v25, %v2208_v24  ;;  %v1881_v32 = vpop.f32.mrb[18].mxu0  ;;  %v2261_v19 = vpop.f32.mrb[18].mxu1 }
  0xfc   :  { %v455_v34 = vpop.f32.mrb[19].mxu0  ;;  %v2232_v45 = vadd.f32 %v1881_v32, %v2128_v35  ;;  %v2267_v28 = vpop.f32.mrb[19].mxu1 }
  0xfd   :  { %v658_v36 = vadd.f32 %v657_v31, %v2216_v30  ;;  %v2223_v37 = vadd.f32 %v2128_v35, %v455_v34 }
  0xff   :  { %v659_v42 = vadd.f32 %v658_v36, %v2223_v37 }
 0x101   :  { %v660_v46 = vadd.f32 %v659_v42, %v2226_v38  ;;  %v1884_v48 = vpop.f32.mrb[20].mxu0 }
 0x102   :  { %v468_v50 = vpop.f32.mrb[21].mxu0  ;;  %v2250_v3 = vadd.f32 %v1884_v48, %v2128_v35 }
 0x103   :  { %v2240_v54 = vadd.f32 %v2128_v35, %v468_v50  ;;  %v661_v57 = vadd.f32 %v660_v46, %v2232_v45  ;;  %v1885_v58 = vpop.f32.mrb[22].mxu0  ;;  %v2277_v46 = vpop.f32.mrb[20].mxu1 }
 0x104   :  { %v471_v63 = vpop.f32.mrb[23].mxu0  ;;  %v2256_v10 = vadd.f32 %v1885_v58, %v2128_v35  ;;  %v596_v58 = vpop.f32.mrb[21].mxu1 }
 0x105   :  { %v662_v0 = vadd.f32 %v661_v57, %v2240_v54  ;;  %v2247_v2 = vadd.f32 %v2128_v35, %v471_v63 }
 0x107   :  { %v663_v6 = vadd.f32 %v662_v0, %v2247_v2  ;;  %v2283_v0 = vpop.f32.mrb[22].mxu1 }
 0x109   :  { %v664_v12 = vadd.f32 %v663_v6, %v2250_v3  ;;  %v1888_v15 = vpop.f32.mrb[24].mxu0 }
 0x10a   :  { %v484_v18 = vpop.f32.mrb[25].mxu0  ;;  %v2274_v36 = vadd.f32 %v1888_v15, %v2128_v35 }
 0x10b   :  { %v2264_v22 = vadd.f32 %v2128_v35, %v484_v18  ;;  %v665_v25 = vadd.f32 %v664_v12, %v2256_v10  ;;  %v1889_v26 = vpop.f32.mrb[26].mxu0  ;;  %v599_v18 = vpop.f32.mrb[23].mxu1 }
 0x10c   :  { %v487_v31 = vpop.f32.mrb[27].mxu0  ;;  %3503 = vst [vmem:[#allocation3_spill] sm:$0xff] %v2274_v36  ;;  %v2280_v48 = vadd.f32 %v1889_v26, %v2128_v35 }
 0x10d   :  { %v666_v32 = vadd.f32 %v665_v25, %v2264_v22  ;;  %v2271_v34 = vadd.f32 %v2128_v35, %v487_v31 }
 0x10e   :  { %3504 = vst [vmem:[#allocation4_spill] sm:$0xff] %v2280_v48 }
 0x10f   :  { %3502 = vst [vmem:[#allocation2_spill] sm:$0xff] %v2271_v34  ;;  %v667_v42 = vadd.f32 %v666_v32, %v2271_v34 }
 0x111   :  { %v668_v50 = vadd.f32 %v667_v42, %v2274_v36  ;;  %v1892_v57 = vpop.f32.mrb[28].mxu0  ;;  %v1920_v36 = vpop.f32.mrb[24].mxu1 }
 0x112   :  { %v500_v63 = vpop.f32.mrb[29].mxu0  ;;  %v2294_v32 = vadd.f32 %v1892_v57, %v2128_v35 }
 0x113   :  { %v2286_v6 = vadd.f32 %v2128_v35, %v500_v63  ;;  %v669_v12 = vadd.f32 %v668_v50, %v2280_v48  ;;  %v1893_v15 = vpop.f32.mrb[30].mxu0  ;;  %v2303_v50 = vadd.f32 %v2128_v35, %v2163_v59  ;;  %v612_v48 = vpop.f32.mrb[25].mxu1  ;;  %v2318_v59 = vadd.f32 %v2165_v61, %v2128_v35 }
 0x114   :  { %v503_v25 = vpop.f32.mrb[31].mxu0  ;;  %3507 = vst [vmem:[#allocation7_spill] sm:$0xff] %v2294_v32  ;;  %v2298_v34 = vadd.f32 %v1893_v15, %v2128_v35  ;;  %v2313_v15 = vadd.f32 %v2157_v55, %v2128_v35  ;;  %v2333_v61 = vadd.f32 %v2181_v7, %v2128_v35  ;;  %v2349_v7 = vadd.f32 %v2128_v35, %v2219_v33 }
 0x115   :  { %3505 = vst [vmem:[#allocation5_spill] sm:$0xff] %v2286_v6  ;;  %v670_v31 = vadd.f32 %v669_v12, %v2286_v6  ;;  %v2291_v26 = vadd.f32 %v2128_v35, %v503_v25  ;;  %3509 = vst [vmem:[#allocation9_spill] sm:$0xff] %v2303_v50  ;;  %v1921_v12 = vpop.f32.mrb[26].mxu1 }
 0x116   :  { %3508 = vst [vmem:[#allocation8_spill] sm:$0xff] %v2298_v34  ;;  %v615_v6 = vpop.f32.mrb[27].mxu1  ;;  %3510 = vst [vmem:[#allocation10_spill] sm:$0xff] %v2313_v15 }
 0x117   :  { %3506 = vst [vmem:[#allocation6_spill] sm:$0xff] %v2291_v26  ;;  %v671_v42 = vadd.f32 %v670_v31, %v2291_v26  ;;  %v2309_v31 = vadd.f32 %v2128_v35, %v2171_v1  ;;  %3513 = vst [vmem:[#allocation13_spill] sm:$0xff] %v2333_v61 }
 0x118   :  { %3516 = vst [vmem:[#allocation16_spill] sm:$0xff] %v2349_v7 }
 0x119   :  { %v672_v63 = vadd.f32 %v671_v42, %v2294_v32  ;;  %v1924_v32 = vpop.f32.mrb[28].mxu1 }
 0x11b   :  { %v673_v25 = vadd.f32 %v672_v63, %v2298_v34 }
 0x11d   :  { %v674_v57 = vadd.f32 %v673_v25, %v2303_v50  ;;  %v2323_v25 = vadd.f32 %v2128_v35, %v2187_v11  ;;  %v628_v50 = vpop.f32.mrb[29].mxu1  ;;  %v2338_v11 = vadd.f32 %v2189_v13, %v2128_v35 }
 0x11e   :  { %v1925_v1 = vpop.f32.mrb[30].mxu1 }
 0x11f   :  { %v675_v42 = vadd.f32 %v674_v57, %v2309_v31  ;;  %3511 = vst [vmem:[#allocation11_spill] sm:$0xff] %v2323_v25  ;;  %v631_v26 = vpop.f32.mrb[31].mxu1  ;;  %v2329_v57 = vadd.f32 %v2128_v35, %v2195_v17  ;;  %3514 = vst [vmem:[#allocation14_spill] sm:$0xff] %v2338_v11 }
 0x121   :  { %v676_v63 = vadd.f32 %v675_v42, %v2313_v15  ;;  %3512 = vst [vmem:[#allocation12_spill] sm:$0xff] %v2329_v57 }
 0x123   :  { %v677_v34 = vadd.f32 %v676_v63, %v2318_v59  ;;  %v2343_v63 = vadd.f32 %v2128_v35, %v2211_v27 }
 0x125   :  { %v678_v55 = vadd.f32 %v677_v34, %v2323_v25  ;;  %3515 = vst [vmem:[#allocation15_spill] sm:$0xff] %v2343_v63 }
 0x127   :  { %v679_v42 = vadd.f32 %v678_v55, %v2329_v57  ;;  %v2353_v55 = vadd.f32 %v2205_v23, %v2128_v35  ;;  %v568_v23 = vadd.f32 %v2128_v35, %v2243_v60 }
 0x129   :  { %v680_v15 = vadd.f32 %v679_v42, %v2333_v61  ;;  %3517 = vst [vmem:[#allocation17_spill] sm:$0xff] %v2353_v55  ;;  %v2358_v42 = vadd.f32 %v2213_v29, %v2128_v35  ;;  %v576_v29 = vadd.f32 %v2237_v51, %v2128_v35  ;;  %v632_v61 = vadd.f32 %v2128_v35, %v631_v26 }
 0x12b   :  { %v681_v34 = vadd.f32 %v680_v15, %v2338_v11  ;;  %3518 = vst [vmem:[#allocation18_spill] sm:$0xff] %v2358_v42  ;;  %v2363_v15 = vadd.f32 %v2128_v35, %v2235_v49 }
 0x12d   :  { %v682_v17 = vadd.f32 %v681_v34, %v2343_v63  ;;  %3519 = vst [vmem:[#allocation19_spill] sm:$0xff] %v2363_v15 }
 0x12f   :  { %v683_v13 = vadd.f32 %v682_v17, %v2349_v7  ;;  %v573_v17 = vadd.f32 %v2229_v44, %v2128_v35  ;;  %v592_v44 = vadd.f32 %v2261_v19, %v2128_v35  ;;  %v616_v19 = vadd.f32 %v2128_v35, %v615_v6 }
 0x131   :  { %v684_v27 = vadd.f32 %v683_v13, %v2353_v55  ;;  %v581_v13 = vadd.f32 %v2128_v35, %v2259_v16  ;;  %v605_v16 = vadd.f32 %v2277_v46, %v2128_v35 }
 0x133   :  { %v685_v34 = vadd.f32 %v684_v27, %v2358_v42  ;;  %v584_v27 = vadd.f32 %v2128_v35, %v2267_v28  ;;  %v600_v42 = vadd.f32 %v2128_v35, %v599_v18  ;;  %v608_v28 = vadd.f32 %v2283_v0, %v2128_v35 }
 0x134   :  { %v637_v0 = vadd.f32 %v1924_v32, %v2128_v35 }
 0x135   :  { %v686_v33 = vadd.f32 %v685_v34, %v2363_v15  ;;  %v589_v34 = vadd.f32 %v2253_v9, %v2128_v35  ;;  %v597_v15 = vadd.f32 %v2128_v35, %v596_v58  ;;  %v613_v9 = vadd.f32 %v2128_v35, %v612_v48 }
 0x136   :  { %v621_v58 = vadd.f32 %v1920_v36, %v2128_v35  ;;  %v640_v48 = vadd.f32 %v1925_v1, %v2128_v35 }
 0x137   :  { %v687_v7 = vadd.f32 %v686_v33, %v568_v23 }
 0x139   :  { %v688_v63 = vadd.f32 %v687_v7, %v573_v17 }
 0x13b   :  { %v689_v49 = vadd.f32 %v688_v63, %v576_v29 }
 0x13d   :  { %v690_v55 = vadd.f32 %v689_v49, %v581_v13 }
 0x13f   :  { %v691_v60 = vadd.f32 %v690_v55, %v584_v27 }
 0x141   :  { %v692_v33 = vadd.f32 %v691_v60, %v589_v34 }
 0x143   :  { %v693_v51 = vadd.f32 %v692_v33, %v592_v44  ;;  %v624_v33 = vadd.f32 %v1921_v12, %v2128_v35 }
 0x145   :  { %v694_v7 = vadd.f32 %v693_v51, %v597_v15  ;;  %v629_v51 = vadd.f32 %v2128_v35, %v628_v50 }
 0x147   :  { %v695_v63 = vadd.f32 %v694_v7, %v600_v42 }
 0x149   :  { %v696_v49 = vadd.f32 %v695_v63, %v605_v16 }
 0x14b   :  { %v697_v55 = vadd.f32 %v696_v49, %v608_v28 }
 0x14d   :  { %v698_v11 = vadd.f32 %v697_v55, %v613_v9 }
 0x14f   :  { %v699_v60 = vadd.f32 %v698_v11, %v616_v19 }
 0x151   :  { %v700_v18 = vadd.f32 %v699_v60, %v621_v58 }
 0x153   :  { %v701_v46 = vadd.f32 %v700_v18, %v624_v33 }
 0x155   :  { %v702_v7 = vadd.f32 %v701_v46, %v629_v51 }
 0x157   :  { %v703_v63 = vadd.f32 %v702_v7, %v632_v61 }
 0x159   :  { %v704_v49 = vadd.f32 %v703_v63, %v637_v0 }
 0x15b   :  { %v705_v55 = vadd.f32 %v704_v49, %v640_v48 }
 0x15d   :  { %v706_v6 = vrot.slane %v705_v55, 4 }
 0x15f   :  { %v707_v57 = vadd.f32 %v706_v6, %v705_v55 }
 0x161   :  { %v708_v36 = vrot.slane %v707_v57, 2 }
 0x163   :  { %v709_v11 = vadd.f32 %v708_v36, %v707_v57 }
 0x165   :  { %v710_v25 = vrot.slane %v709_v11, 1 }
 0x167   :  { %v711_v12 = vadd.f32 %v710_v25, %v709_v11 }
 0x169   :  { %v2395_v60 = vmul.f32 0.001953125, %v711_v12 }
 0x16b   :  { %v2398_v50 = vsub.f32 %v568_v23, %v2395_v60  ;;  %v2401_v26 = vsub.f32 %v573_v17, %v2395_v60  ;;  %v2404_v32 = vsub.f32 %v576_v29, %v2395_v60  ;;  %v2407_v35 = vsub.f32 %v581_v13, %v2395_v60 }
 0x16c   :  { %v2410_v1 = vsub.f32 %v584_v27, %v2395_v60  ;;  %v2413_v57 = vsub.f32 %v589_v34, %v2395_v60  ;;  %v2416_v25 = vsub.f32 %v592_v44, %v2395_v60  ;;  %v2419_v23 = vsub.f32 %v597_v15, %v2395_v60 }
 0x16d   :  { %v2422_v17 = vsub.f32 %v600_v42, %v2395_v60  ;;  %v2425_v29 = vsub.f32 %v605_v16, %v2395_v60  ;;  %v2428_v13 = vsub.f32 %v608_v28, %v2395_v60  ;;  %v2431_v27 = vsub.f32 %v613_v9, %v2395_v60 }
 0x16e   :  { %v2434_v34 = vsub.f32 %v616_v19, %v2395_v60  ;;  %v2437_v44 = vsub.f32 %v621_v58, %v2395_v60  ;;  %v2440_v15 = vsub.f32 %v624_v33, %v2395_v60  ;;  %v2443_v42 = vsub.f32 %v629_v51, %v2395_v60 }
 0x16f   :  { %v2446_v16 = vsub.f32 %v632_v61, %v2395_v60  ;;  %v2449_v28 = vsub.f32 %v637_v0, %v2395_v60  ;;  %v2452_v9 = vsub.f32 %v640_v48, %v2395_v60  ;;  %v2456_v19 = vsub.f32 %v2131_v39, %v2395_v60 }
 0x170   :  { %3520 = vst [vmem:[#allocation20_spill] sm:$0xff] %v2434_v34  ;;  %3521 = vst [vmem:[#allocation21_spill] sm:$0xff] %v2437_v44  ;;  %v2460_v58 = vsub.f32 %v2134_v40, %v2395_v60  ;;  %v2464_v33 = vsub.f32 %v2137_v41, %v2395_v60  ;;  %v2472_v51 = vsub.f32 %v2142_v43, %v2395_v60 }
 0x171   :  { %3522 = vst [vmem:[#allocation22_spill] sm:$0xff] %v2440_v15  ;;  %3523 = vst [vmem:[#allocation23_spill] sm:$0xff] %v2443_v42  ;;  %v777_v61 = vmul.f32 %v2456_v19, %v2456_v19  ;;  %v2476_v39 = vsub.f32 %v2146_v47, %v2395_v60  ;;  %v2482_v41 = vsub.f32 %v2151_v52, %v2395_v60 }
 0x172   :  { %3524 = vst [vmem:[#allocation24_spill] sm:$0xff] %v2446_v16  ;;  %3525 = vst [vmem:[#allocation25_spill] sm:$0xff] %v2452_v9  ;;  %v778_v18 = vmul.f32 %v2460_v58, %v2460_v58  ;;  %v779_v40 = vmul.f32 %v2464_v33, %v2464_v33  ;;  %v780_v7 = vmul.f32 %v2472_v51, %v2472_v51 }
 0x173   :  { %v2488_v43 = vsub.f32 %v2154_v53, %v2395_v60  ;;  %v781_v47 = vmul.f32 %v2476_v39, %v2476_v39  ;;  %v2494_v48 = vsub.f32 %v2160_v56, %v2395_v60  ;;  %v782_v52 = vmul.f32 %v2482_v41, %v2482_v41 }
 0x174   :  { %v841_v46 = vadd.f32 %v778_v18, %v777_v61  ;;  %v2500_v55 = vsub.f32 %v2168_v62, %v2395_v60  ;;  %v2506_v36 = vsub.f32 %v2175_v4, %v2395_v60  ;;  %v2512_v12 = vsub.f32 %v2178_v5, %v2395_v60 }
 0x175   :  { %v783_v53 = vmul.f32 %v2488_v43, %v2488_v43  ;;  %v784_v56 = vmul.f32 %v2494_v48, %v2494_v48  ;;  %v2518_v18 = vsub.f32 %v2184_v8, %v2395_v60 }
 0x176   :  { %v842_v0 = vadd.f32 %v841_v46, %v779_v40  ;;  %v785_v62 = vmul.f32 %v2500_v55, %v2500_v55  ;;  %v786_v4 = vmul.f32 %v2506_v36, %v2506_v36  ;;  %v2524_v46 = vsub.f32 %v2192_v14, %v2395_v60 }
 0x177   :  { %v787_v5 = vmul.f32 %v2512_v12, %v2512_v12  ;;  %v788_v8 = vmul.f32 %v2518_v18, %v2518_v18 }
 0x178   :  { %v843_v63 = vadd.f32 %v842_v0, %v780_v7  ;;  %v2530_v0 = vsub.f32 %v2199_v20, %v2395_v60  ;;  %v789_v14 = vmul.f32 %v2524_v46, %v2524_v46 }
 0x17a   :  { %v844_v49 = vadd.f32 %v843_v63, %v781_v47  ;;  %v2536_v63 = vsub.f32 %v2202_v21, %v2395_v60  ;;  %v790_v20 = vmul.f32 %v2530_v0, %v2530_v0 }
 0x17c   :  { %v845_v6 = vadd.f32 %v844_v49, %v782_v52  ;;  %v2542_v49 = vsub.f32 %v2208_v24, %v2395_v60  ;;  %v791_v21 = vmul.f32 %v2536_v63, %v2536_v63 }
 0x17e   :  { %v846_v11 = vadd.f32 %v845_v6, %v783_v53  ;;  %v2548_v6 = vsub.f32 %v2216_v30, %v2395_v60  ;;  %v792_v24 = vmul.f32 %v2542_v49, %v2542_v49 }
 0x180   :  { %v847_v61 = vadd.f32 %v846_v11, %v784_v56  ;;  %v2554_v11 = vsub.f32 %v2223_v37, %v2395_v60  ;;  %v793_v30 = vmul.f32 %v2548_v6, %v2548_v6 }
 0x182   :  { %v848_v40 = vadd.f32 %v847_v61, %v785_v62  ;;  %v2560_v61 = vsub.f32 %v2226_v38, %v2395_v60  ;;  %v794_v37 = vmul.f32 %v2554_v11, %v2554_v11 }
 0x184   :  { %v849_v7 = vadd.f32 %v848_v40, %v786_v4  ;;  %v2566_v40 = vsub.f32 %v2232_v45, %v2395_v60  ;;  %v795_v38 = vmul.f32 %v2560_v61, %v2560_v61 }
 0x186   :  { %v850_v47 = vadd.f32 %v849_v7, %v787_v5  ;;  %v2572_v7 = vsub.f32 %v2240_v54, %v2395_v60  ;;  %v796_v45 = vmul.f32 %v2566_v40, %v2566_v40 }
 0x188   :  { %v851_v52 = vadd.f32 %v850_v47, %v788_v8  ;;  %v2578_v47 = vsub.f32 %v2247_v2, %v2395_v60  ;;  %v797_v54 = vmul.f32 %v2572_v7, %v2572_v7 }
 0x18a   :  { %v852_v53 = vadd.f32 %v851_v52, %v789_v14  ;;  %v2584_v52 = vsub.f32 %v2250_v3, %v2395_v60  ;;  %v798_v2 = vmul.f32 %v2578_v47, %v2578_v47 }
 0x18c   :  { %v853_v56 = vadd.f32 %v852_v53, %v790_v20  ;;  %v2590_v53 = vsub.f32 %v2256_v10, %v2395_v60  ;;  %v799_v3 = vmul.f32 %v2584_v52, %v2584_v52 }
 0x18e   :  { %v854_v62 = vadd.f32 %v853_v56, %v791_v21  ;;  %v2596_v56 = vsub.f32 %v2264_v22, %v2395_v60  ;;  %v800_v10 = vmul.f32 %v2590_v53, %v2590_v53 }
 0x190   :  { %v855_v4 = vadd.f32 %v854_v62, %v792_v24  ;;  %v3526_v62 = vld [vmem:[#allocation2_spill] sm:$0xff]  ;;  %v801_v22 = vmul.f32 %v2596_v56, %v2596_v56 }
 0x192   :  { %v856_v5 = vadd.f32 %v855_v4, %v793_v30  ;;  %v2602_v30 = vsub.f32 %v3526_v62, %v2395_v60 }
 0x194   :  { %v857_v8 = vadd.f32 %v856_v5, %v794_v37  ;;  %v3527_v37 = vld [vmem:[#allocation3_spill] sm:$0xff] }
 0x195   :  { %v2608_v5 = vsub.f32 %v3527_v37, %v2395_v60  ;;  %v3534_v37 = vld [vmem:[#allocation7_spill] sm:$0xff] }
 0x196   :  { %v858_v14 = vadd.f32 %v857_v8, %v795_v38  ;;  %v3529_v8 = vld [vmem:[#allocation4_spill] sm:$0xff] }
 0x197   :  { %3528 = vst [vmem:[#allocation2_spill] sm:$0xff] %v2608_v5 }
 0x198   :  { %v859_v20 = vadd.f32 %v858_v14, %v796_v45  ;;  %v2614_v45 = vsub.f32 %v3529_v8, %v2395_v60  ;;  %v802_v14 = vmul.f32 %v2602_v30, %v2602_v30  ;;  %v2632_v8 = vsub.f32 %v3534_v37, %v2395_v60 }
 0x199   :  { %v2650_v37 = vsub.f32 %v2309_v31, %v2395_v60 }
 0x19a   :  { %v860_v21 = vadd.f32 %v859_v20, %v797_v54  ;;  %3530 = vst [vmem:[#allocation3_spill] sm:$0xff] %v2614_v45  ;;  %v3531_v20 = vld [vmem:[#allocation5_spill] sm:$0xff] }
 0x19b   :  { %3539 = vst [vmem:[#allocation7_spill] sm:$0xff] %v2650_v37  ;;  %v810_v31 = vmul.f32 %v2650_v37, %v2650_v37 }
 0x19c   :  { %v861_v24 = vadd.f32 %v860_v21, %v798_v2  ;;  %v2620_v2 = vsub.f32 %v3531_v20, %v2395_v60  ;;  %v803_v21 = vmul.f32 %v2608_v5, %v2608_v5  ;;  %v3535_v20 = vld [vmem:[#allocation8_spill] sm:$0xff] }
 0x19d   :  { %v2638_v5 = vsub.f32 %v3535_v20, %v2395_v60  ;;  %v3540_v20 = vld [vmem:[#allocation10_spill] sm:$0xff] }
 0x19e   :  { %v862_v4 = vadd.f32 %v861_v24, %v799_v3  ;;  %v3532_v24 = vld [vmem:[#allocation6_spill] sm:$0xff] }
 0x19f   :  { %v2626_v62 = vsub.f32 %v3532_v24, %v2395_v60  ;;  %3536 = vst [vmem:[#allocation5_spill] sm:$0xff] %v2638_v5  ;;  %v3537_v24 = vld [vmem:[#allocation9_spill] sm:$0xff] }
 0x1a0   :  { %v863_v38 = vadd.f32 %v862_v4, %v800_v10  ;;  %v804_v10 = vmul.f32 %v2614_v45, %v2614_v45  ;;  %v2644_v45 = vsub.f32 %v3537_v24, %v2395_v60  ;;  %v2662_v24 = vsub.f32 %v2318_v59, %v2395_v60 }
 0x1a1   :  { %3533 = vst [vmem:[#allocation4_spill] sm:$0xff] %v2626_v62 }
 0x1a2   :  { %v864_v54 = vadd.f32 %v863_v38, %v801_v22  ;;  %v805_v22 = vmul.f32 %v2620_v2, %v2620_v2  ;;  %3538 = vst [vmem:[#allocation6_spill] sm:$0xff] %v2644_v45  ;;  %3542 = vst [vmem:[#allocation9_spill] sm:$0xff] %v2662_v24  ;;  %v812_v59 = vmul.f32 %v2662_v24, %v2662_v24 }
 0x1a4   :  { %v865_v3 = vadd.f32 %v864_v54, %v802_v14  ;;  %v806_v14 = vmul.f32 %v2626_v62, %v2626_v62  ;;  %v2656_v62 = vsub.f32 %v3540_v20, %v2395_v60  ;;  %v3545_v20 = vld [vmem:[#allocation12_spill] sm:$0xff] }
 0x1a6   :  { %v866_v4 = vadd.f32 %v865_v3, %v803_v21  ;;  %v807_v21 = vmul.f32 %v2632_v8, %v2632_v8  ;;  %3541 = vst [vmem:[#allocation8_spill] sm:$0xff] %v2656_v62 }
 0x1a8   :  { %v867_v38 = vadd.f32 %v866_v4, %v804_v10  ;;  %v808_v10 = vmul.f32 %v2638_v5, %v2638_v5 }
 0x1aa   :  { %v868_v54 = vadd.f32 %v867_v38, %v805_v22  ;;  %v809_v22 = vmul.f32 %v2644_v45, %v2644_v45  ;;  %v2674_v45 = vsub.f32 %v3545_v20, %v2395_v60  ;;  %v3551_v20 = vld [vmem:[#allocation15_spill] sm:$0xff] }
 0x1ab   :  { %v2692_v24 = vsub.f32 %v3551_v20, %v2395_v60  ;;  %v3555_v20 = vld [vmem:[#allocation18_spill] sm:$0xff] }
 0x1ac   :  { %v869_v3 = vadd.f32 %v868_v54, %v806_v14  ;;  %v3543_v54 = vld [vmem:[#allocation11_spill] sm:$0xff] }
 0x1ad   :  { %v2668_v5 = vsub.f32 %v3543_v54, %v2395_v60  ;;  %3546 = vst [vmem:[#allocation11_spill] sm:$0xff] %v2674_v45  ;;  %v3549_v54 = vld [vmem:[#allocation14_spill] sm:$0xff] }
 0x1ae   :  { %v870_v4 = vadd.f32 %v869_v3, %v807_v21  ;;  %v811_v21 = vmul.f32 %v2656_v62, %v2656_v62  ;;  %v2686_v62 = vsub.f32 %v3549_v54, %v2395_v60  ;;  %v3554_v54 = vld [vmem:[#allocation17_spill] sm:$0xff] }
 0x1af   :  { %3544 = vst [vmem:[#allocation10_spill] sm:$0xff] %v2668_v5 }
 0x1b0   :  { %v871_v38 = vadd.f32 %v870_v4, %v808_v10  ;;  %v3547_v4 = vld [vmem:[#allocation13_spill] sm:$0xff] }
 0x1b1   :  { %v2680_v37 = vsub.f32 %v3547_v4, %v2395_v60  ;;  %3550 = vst [vmem:[#allocation13_spill] sm:$0xff] %v2686_v62  ;;  %v3552_v4 = vld [vmem:[#allocation16_spill] sm:$0xff] }
 0x1b2   :  { %v872_v14 = vadd.f32 %v871_v38, %v809_v22  ;;  %v813_v22 = vmul.f32 %v2668_v5, %v2668_v5  ;;  %v2698_v5 = vsub.f32 %v3552_v4, %v2395_v60  ;;  %v3556_v4 = vld [vmem:[#allocation19_spill] sm:$0xff] }
 0x1b3   :  { %3548 = vst [vmem:[#allocation12_spill] sm:$0xff] %v2680_v37 }
 0x1b4   :  { %v873_v3 = vadd.f32 %v872_v14, %v810_v31  ;;  %v814_v31 = vmul.f32 %v2674_v45, %v2674_v45  ;;  %3553 = vst [vmem:[#allocation14_spill] sm:$0xff] %v2698_v5  ;;  %v2704_v45 = vsub.f32 %v3554_v54, %v2395_v60 }
 0x1b6   :  { %v874_v10 = vadd.f32 %v873_v3, %v811_v21  ;;  %v815_v21 = vmul.f32 %v2680_v37, %v2680_v37  ;;  %v2710_v37 = vsub.f32 %v3555_v20, %v2395_v60 }
 0x1b8   :  { %v875_v38 = vadd.f32 %v874_v10, %v812_v59  ;;  %v816_v59 = vmul.f32 %v2686_v62, %v2686_v62  ;;  %v2716_v62 = vsub.f32 %v3556_v4, %v2395_v60  ;;  %v820_v54 = vmul.f32 %v2710_v37, %v2710_v37 }
 0x1b9   :  { %v823_v60 = vmul.f32 %v2401_v26, %v2401_v26  ;;  %v824_v4 = vmul.f32 %v2404_v32, %v2404_v32 }
 0x1ba   :  { %v876_v14 = vadd.f32 %v875_v38, %v813_v22  ;;  %v817_v22 = vmul.f32 %v2692_v24, %v2692_v24 }
 0x1bc   :  { %v877_v3 = vadd.f32 %v876_v14, %v814_v31  ;;  %v818_v31 = vmul.f32 %v2698_v5, %v2698_v5  ;;  %v822_v5 = vmul.f32 %v2398_v50, %v2398_v50 }
 0x1be   :  { %v878_v10 = vadd.f32 %v877_v3, %v815_v21  ;;  %v819_v21 = vmul.f32 %v2704_v45, %v2704_v45 }
 0x1c0   :  { %v879_v38 = vadd.f32 %v878_v10, %v816_v59  ;;  %v821_v10 = vmul.f32 %v2716_v62, %v2716_v62 }
 0x1c2   :  { %v880_v14 = vadd.f32 %v879_v38, %v817_v22 }
 0x1c4   :  { %v881_v3 = vadd.f32 %v880_v14, %v818_v31  ;;  %v825_v14 = vmul.f32 %v2407_v35, %v2407_v35 }
 0x1c6   :  { %v882_v59 = vadd.f32 %v881_v3, %v819_v21  ;;  %v826_v3 = vmul.f32 %v2410_v1, %v2410_v1 }
 0x1c8   :  { %v883_v20 = vadd.f32 %v882_v59, %v820_v54  ;;  %v827_v59 = vmul.f32 %v2413_v57, %v2413_v57 }
 0x1ca   :  { %v884_v22 = vadd.f32 %v883_v20, %v821_v10  ;;  %v828_v20 = vmul.f32 %v2416_v25, %v2416_v25 }
 0x1cc   :  { %v885_v38 = vadd.f32 %v884_v22, %v822_v5  ;;  %v829_v22 = vmul.f32 %v2419_v23, %v2419_v23 }
 0x1ce   :  { %v886_v31 = vadd.f32 %v885_v38, %v823_v60  ;;  %v830_v38 = vmul.f32 %v2422_v17, %v2422_v17 }
 0x1d0   :  { %v887_v21 = vadd.f32 %v886_v31, %v824_v4  ;;  %v831_v31 = vmul.f32 %v2425_v29, %v2425_v29 }
 0x1d2   :  { %v888_v54 = vadd.f32 %v887_v21, %v825_v14  ;;  %v832_v21 = vmul.f32 %v2428_v13, %v2428_v13 }
 0x1d4   :  { %v889_v10 = vadd.f32 %v888_v54, %v826_v3  ;;  %v833_v54 = vmul.f32 %v2431_v27, %v2431_v27 }
 0x1d6   :  { %v890_v5 = vadd.f32 %v889_v10, %v827_v59  ;;  %v834_v10 = vmul.f32 %v2434_v34, %v2434_v34 }
 0x1d8   :  { %v891_v60 = vadd.f32 %v890_v5, %v828_v20  ;;  %v835_v5 = vmul.f32 %v2437_v44, %v2437_v44 }
 0x1da   :  { %v892_v4 = vadd.f32 %v891_v60, %v829_v22  ;;  %v836_v60 = vmul.f32 %v2440_v15, %v2440_v15 }
 0x1dc   :  { %v893_v14 = vadd.f32 %v892_v4, %v830_v38  ;;  %v837_v4 = vmul.f32 %v2443_v42, %v2443_v42 }
 0x1de   :  { %v894_v3 = vadd.f32 %v893_v14, %v831_v31  ;;  %v838_v14 = vmul.f32 %v2446_v16, %v2446_v16  ;;  %v915_v16 = vlaneseq }
 0x1e0   :  { %v895_v59 = vadd.f32 %v894_v3, %v832_v21  ;;  %v839_v3 = vmul.f32 %v2449_v28, %v2449_v28 }
 0x1e2   :  { %v896_v20 = vadd.f32 %v895_v59, %v833_v54  ;;  %v840_v59 = vmul.f32 %v2452_v9, %v2452_v9 }
 0x1e4   :  { %v897_v22 = vadd.f32 %v896_v20, %v834_v10 }
 0x1e6   :  { %v898_v38 = vadd.f32 %v897_v22, %v835_v5 }
 0x1e8   :  { %v899_v31 = vadd.f32 %v898_v38, %v836_v60 }
 0x1ea   :  { %v900_v21 = vadd.f32 %v899_v31, %v837_v4  ;;  %v916_v4 = vshrl.u32 %v915_v16, 7  ;;  %v913_v31 = vld [vmem:[%s3457_s3] sm:$0x1] }
 0x1ec   :  { %v901_v54 = vadd.f32 %v900_v21, %v838_v14  ;;  %v917_v14 = vsub.s32 0, %v916_v4 }
 0x1ee   :  { %v902_v10 = vadd.f32 %v901_v54, %v839_v3  ;;  %v3558_v54 = vld [vmem:[#allocation3_spill] sm:$0xff] }
 0x1f0   :  { %v903_v20 = vadd.f32 %v902_v10, %v840_v59  ;;  %v3559_v59 = vld [vmem:[#allocation4_spill] sm:$0xff]  ;;  %v3560_v10 = vld [vmem:[#allocation5_spill] sm:$0xff] }
 0x1f2   :  { %v904_v44 = vrot.slane %v903_v20, 4 }
 0x1f4   :  { %v905_v15 = vadd.f32 %v904_v44, %v903_v20 }
 0x1f6   :  { %v906_v5 = vrot.slane %v905_v15, 2 }
 0x1f8   :  { %v907_v22 = vadd.f32 %v906_v5, %v905_v15  ;;  %v3561_v5 = vld [vmem:[#allocation6_spill] sm:$0xff] }
 0x1fa   :  { %v908_v34 = vrot.slane %v907_v22, 1 }
 0x1fc   :  { %v909_v42 = vadd.f32 %v908_v34, %v907_v22 }
 0x1fe   :  { %v910_v60 = vmul.f32 0.001953125, %v909_v42 }
 0x200   :  { %v911_v38 = vadd.f32 1e-05, %v910_v60  ;;  %v3562_v60 = vld [vmem:[#allocation7_spill] sm:$0xff] }
 0x202   :  { %1962 = vrsqrt.f32 %v911_v38  ;;  %v3563_v38 = vld [vmem:[#allocation8_spill] sm:$0xff] }
 0x20c   :  { %v1963_v21 = vpop.eup %1962 }
 0x20d   :  { %v914_v9 = vmul.f32 %v1963_v21, %v913_v31  ;;  %v3564_v31 = vld [vmem:[#allocation9_spill] sm:$0xff] }
 0x20f   :  { %v2765_v3 = vrot.slane %v914_v9, %v917_v14  ;;  %v3565_v14 = vld [vmem:[#allocation10_spill] sm:$0xff] }
 0x211   :  { %v2769_v44 = vmul.f32 %v2765_v3, %v2456_v19  ;;  %v2773_v34 = vmul.f32 %v2765_v3, %v2460_v58  ;;  %v2777_v15 = vmul.f32 %v2765_v3, %v2464_v33  ;;  %v2781_v42 = vmul.f32 %v2765_v3, %v2472_v51 }
 0x212   :  { %v2785_v16 = vmul.f32 %v2765_v3, %v2476_v39  ;;  %v2789_v9 = vmul.f32 %v2765_v3, %v2482_v41  ;;  %v2793_v19 = vmul.f32 %v2765_v3, %v2488_v43  ;;  %v2797_v58 = vmul.f32 %v2765_v3, %v2494_v48 }
 0x213   :  { %v2801_v33 = vmul.f32 %v2765_v3, %v2500_v55  ;;  %v2805_v51 = vmul.f32 %v2765_v3, %v2506_v36  ;;  %v2809_v39 = vmul.f32 %v2765_v3, %v2512_v12  ;;  %v2813_v41 = vmul.f32 %v2765_v3, %v2518_v18 }
 0x214   :  { %v2817_v43 = vmul.f32 %v2765_v3, %v2524_v46  ;;  %v2821_v48 = vmul.f32 %v2765_v3, %v2530_v0  ;;  %v2825_v55 = vmul.f32 %v2765_v3, %v2536_v63  ;;  %v2829_v36 = vmul.f32 %v2765_v3, %v2542_v49 }
 0x215   :  { %v2833_v12 = vmul.f32 %v2765_v3, %v2548_v6  ;;  %v2837_v18 = vmul.f32 %v2765_v3, %v2554_v11  ;;  %v2841_v46 = vmul.f32 %v2765_v3, %v2560_v61  ;;  %v2845_v0 = vmul.f32 %v2765_v3, %v2566_v40 }
 0x216   :  { %v2849_v63 = vmul.f32 %v2765_v3, %v2572_v7  ;;  %v2853_v49 = vmul.f32 %v2765_v3, %v2578_v47  ;;  %v2857_v6 = vmul.f32 %v2765_v3, %v2584_v52  ;;  %v2861_v11 = vmul.f32 %v2765_v3, %v2590_v53  ;;  %v3557_v7 = vld [vmem:[#allocation2_spill] sm:$0xff] }
 0x217   :  { %v2865_v61 = vmul.f32 %v2765_v3, %v2596_v56  ;;  %v2869_v40 = vmul.f32 %v2765_v3, %v2602_v30  ;;  %v2873_v47 = vmul.f32 %v2765_v3, %v3557_v7  ;;  %v2877_v52 = vmul.f32 %v2765_v3, %v3558_v54  ;;  %v3566_v7 = vld [vmem:[#allocation11_spill] sm:$0xff] }
 0x218   :  { %v2881_v53 = vmul.f32 %v2765_v3, %v2620_v2  ;;  %v2885_v56 = vmul.f32 %v2765_v3, %v3559_v59  ;;  %v2889_v30 = vmul.f32 %v2765_v3, %v2632_v8  ;;  %v2893_v20 = vmul.f32 %v2765_v3, %v3560_v10  ;;  %v3567_v59 = vld [vmem:[#allocation12_spill] sm:$0xff] }
 0x219   :  { %v2897_v22 = vmul.f32 %v2765_v3, %v3561_v5  ;;  %v2901_v2 = vmul.f32 %v2765_v3, %v3562_v60  ;;  %v2905_v4 = vmul.f32 %v2765_v3, %v3563_v38  ;;  %v2909_v8 = vmul.f32 %v2765_v3, %v3564_v31  ;;  %v3568_v5 = vld [vmem:[#allocation13_spill] sm:$0xff]  ;;  %v3569_v31 = vld [vmem:[#allocation14_spill] sm:$0xff] }
 0x21a   :  { %v2913_v21 = vmul.f32 %v2765_v3, %v3565_v14  ;;  %v2917_v54 = vmul.f32 %v2765_v3, %v3566_v7  ;;  %v2921_v10 = vmul.f32 %v2765_v3, %v3567_v59  ;;  %v2925_v60 = vmul.f32 %v2765_v3, %v3568_v5 }
 0x21b   :  { %v2929_v38 = vmul.f32 %v2765_v3, %v2692_v24  ;;  %v2933_v14 = vmul.f32 %v2765_v3, %v3569_v31  ;;  %v2937_v7 = vmul.f32 %v2765_v3, %v2704_v45  ;;  %v2941_v59 = vmul.f32 %v2765_v3, %v2710_v37 }
 0x21c   :  { %v2945_v5 = vmul.f32 %v2765_v3, %v2716_v62  ;;  %v2949_v24 = vmul.f32 %v2765_v3, %v2398_v50  ;;  %v2953_v31 = vmul.f32 %v2765_v3, %v2401_v26  ;;  %v2957_v45 = vmul.f32 %v2765_v3, %v2404_v32 }
 0x21d   :  { %v2961_v37 = vmul.f32 %v2765_v3, %v2407_v35  ;;  %v2965_v62 = vmul.f32 %v2765_v3, %v2410_v1  ;;  %v2969_v50 = vmul.f32 %v2765_v3, %v2413_v57  ;;  %v2973_v26 = vmul.f32 %v2765_v3, %v2416_v25  ;;  %v2994_v25 = vld [vmem:[%s3458_s4] ss:$0 sm:$0xff] }
 0x21e   :  { %v2977_v32 = vmul.f32 %v2765_v3, %v2419_v23  ;;  %v2981_v35 = vmul.f32 %v2765_v3, %v2422_v17  ;;  %v2985_v1 = vmul.f32 %v2765_v3, %v2425_v29  ;;  %v2989_v57 = vmul.f32 %v2765_v3, %v2428_v13 }
 0x21f   :  { %3570 = vst [vmem:[#allocation15_spill] sm:$0xff] %v2969_v50  ;;  %3571 = vst [vmem:[#allocation16_spill] sm:$0xff] %v2973_v26  ;;  %v2998_v23 = vmul.f32 %v2765_v3, %v2431_v27  ;;  %v3581_v50 = vld [vmem:[#allocation24_spill] sm:$0xff] }
 0x220   :  { %3572 = vst [vmem:[#allocation17_spill] sm:$0xff] %v2977_v32  ;;  %3573 = vst [vmem:[#allocation18_spill] sm:$0xff] %v2981_v35  ;;  %v3576_v32 = vld [vmem:[#allocation20_spill] sm:$0xff]  ;;  %v3578_v35 = vld [vmem:[#allocation21_spill] sm:$0xff]  ;;  %v3018_v27 = vmul.f32 %v2765_v3, %v3581_v50  ;;  %v3038_v50 = vadd.f32 %v2994_v25, %v2777_v15  ;;  %v3058_v15 = vadd.f32 %v2994_v25, %v2797_v58 }
 0x221   :  { %3574 = vst [vmem:[#allocation19_spill] sm:$0xff] %v2985_v1  ;;  %3575 = vst [vmem:[#allocation2_spill] sm:$0xff] %v2989_v57  ;;  %v3002_v17 = vmul.f32 %v2765_v3, %v3576_v32  ;;  %v3006_v29 = vmul.f32 %v2765_v3, %v3578_v35  ;;  %v3579_v1 = vld [vmem:[#allocation22_spill] sm:$0xff]  ;;  %v3580_v57 = vld [vmem:[#allocation23_spill] sm:$0xff]  ;;  %v3022_v32 = vmul.f32 %v2765_v3, %v2449_v28 }
 0x222   :  { %v3010_v13 = vmul.f32 %v2765_v3, %v3579_v1  ;;  %v3014_v26 = vmul.f32 %v2765_v3, %v3580_v57  ;;  %v3030_v1 = vadd.f32 %v2994_v25, %v2769_v44  ;;  %v3034_v57 = vadd.f32 %v2994_v25, %v2773_v34  ;;  %3585 = vst [vmem:[#allocation6_spill] sm:$0xff] %v3038_v50 }
 0x223   :  { %3577 = vst [vmem:[#allocation3_spill] sm:$0xff] %v3002_v17  ;;  %v3582_v17 = vld [vmem:[#allocation25_spill] sm:$0xff]  ;;  %v3042_v28 = vadd.f32 %v2994_v25, %v2781_v42  ;;  %v3050_v44 = vadd.f32 %v2994_v25, %v2789_v9  ;;  %v3054_v34 = vadd.f32 %v2994_v25, %v2793_v19  ;;  %v3062_v42 = vadd.f32 %v2994_v25, %v2801_v33 }
 0x224   :  { %v3026_v35 = vmul.f32 %v2765_v3, %v3582_v17  ;;  %3583 = vst [vmem:[#allocation4_spill] sm:$0xff] %v3030_v1  ;;  %3584 = vst [vmem:[#allocation5_spill] sm:$0xff] %v3034_v57  ;;  %v3046_v3 = vadd.f32 %v2994_v25, %v2785_v16  ;;  %v3066_v16 = vadd.f32 %v2994_v25, %v2805_v51 }
 0x225   :  { %3586 = vst [vmem:[#allocation7_spill] sm:$0xff] %v3042_v28  ;;  %v3070_v9 = vadd.f32 %v2994_v25, %v2809_v39  ;;  %v3074_v19 = vadd.f32 %v2994_v25, %v2813_v41  ;;  %v3078_v58 = vadd.f32 %v2994_v25, %v2817_v43  ;;  %v3082_v33 = vadd.f32 %v2994_v25, %v2821_v48 }
 0x226   :  { %3587 = vst [vmem:[#allocation8_spill] sm:$0xff] %v3046_v3  ;;  %v3086_v51 = vadd.f32 %v2994_v25, %v2825_v55  ;;  %v3090_v39 = vadd.f32 %v2994_v25, %v2829_v36  ;;  %v3094_v41 = vadd.f32 %v2994_v25, %v2833_v12  ;;  %v3098_v43 = vadd.f32 %v2994_v25, %v2837_v18  ;;  %v3593_v17 = vld [vmem:[#allocation15_spill] sm:$0xff] }
 0x227   :  { %v3102_v48 = vadd.f32 %v2994_v25, %v2841_v46  ;;  %v3106_v55 = vadd.f32 %v2994_v25, %v2845_v0  ;;  %v3110_v36 = vadd.f32 %v2994_v25, %v2849_v63  ;;  %v3114_v12 = vadd.f32 %v2994_v25, %v2853_v49 }
 0x228   :  { %v3118_v18 = vadd.f32 %v2994_v25, %v2857_v6  ;;  %v3122_v46 = vadd.f32 %v2994_v25, %v2861_v11  ;;  %v3126_v0 = vadd.f32 %v2994_v25, %v2865_v61  ;;  %v3130_v63 = vadd.f32 %v2994_v25, %v2869_v40 }
 0x229   :  { %v3134_v49 = vadd.f32 %v2994_v25, %v2873_v47  ;;  %v3138_v6 = vadd.f32 %v2994_v25, %v2877_v52  ;;  %v3142_v11 = vadd.f32 %v2994_v25, %v2881_v53  ;;  %v3146_v61 = vadd.f32 %v2994_v25, %v2885_v56 }
 0x22a   :  { %v3150_v40 = vadd.f32 %v2994_v25, %v2889_v30  ;;  %v3154_v47 = vadd.f32 %v2994_v25, %v2893_v20  ;;  %v3158_v52 = vadd.f32 %v2994_v25, %v2897_v22  ;;  %v3162_v53 = vadd.f32 %v2994_v25, %v2901_v2 }
 0x22b   :  { %v3166_v56 = vadd.f32 %v2994_v25, %v2905_v4  ;;  %v3170_v30 = vadd.f32 %v2994_v25, %v2909_v8  ;;  %v3174_v20 = vadd.f32 %v2994_v25, %v2913_v21  ;;  %v3178_v22 = vadd.f32 %v2994_v25, %v2917_v54 }
 0x22c   :  { %v3182_v2 = vadd.f32 %v2994_v25, %v2921_v10  ;;  %v3186_v4 = vadd.f32 %v2994_v25, %v2925_v60  ;;  %v3190_v8 = vadd.f32 %v2994_v25, %v2929_v38  ;;  %v3194_v21 = vadd.f32 %v2994_v25, %v2933_v14 }
 0x22d   :  { %v3198_v54 = vadd.f32 %v2994_v25, %v2937_v7  ;;  %v3202_v10 = vadd.f32 %v2994_v25, %v2941_v59  ;;  %v3206_v60 = vadd.f32 %v2994_v25, %v2945_v5  ;;  %v3210_v38 = vadd.f32 %v2994_v25, %v2949_v24 }
 0x22e   :  { %v3214_v14 = vadd.f32 %v2994_v25, %v2953_v31  ;;  %v3218_v7 = vadd.f32 %v2994_v25, %v2957_v45  ;;  %v3222_v59 = vadd.f32 %v2994_v25, %v2961_v37  ;;  %v3226_v5 = vadd.f32 %v2994_v25, %v2965_v62 }
 0x22f   :  { %3588 = vst [vmem:[#allocation9_spill] sm:$0xff] %v3210_v38  ;;  %v3230_v24 = vadd.f32 %v2994_v25, %v3593_v17  ;;  %v3594_v38 = vld [vmem:[#allocation16_spill] sm:$0xff] }
 0x230   :  { %3589 = vst [vmem:[#allocation10_spill] sm:$0xff] %v3214_v14  ;;  %3590 = vst [vmem:[#allocation11_spill] sm:$0xff] %v3218_v7  ;;  %v3234_v31 = vadd.f32 %v2994_v25, %v3594_v38  ;;  %v3596_v14 = vld [vmem:[#allocation17_spill] sm:$0xff]  ;;  %v3597_v7 = vld [vmem:[#allocation18_spill] sm:$0xff]  ;;  %v3254_v38 = vadd.f32 %v2994_v25, %v2998_v23  ;;  %v3274_v23 = vadd.f32 %v2994_v25, %v3018_v27  ;;  %v1059_v27 = vmax.f32 %v3050_v44, 0.0 }
 0x231   :  { %3591 = vst [vmem:[#allocation12_spill] sm:$0xff] %v3222_v59  ;;  %3592 = vst [vmem:[#allocation13_spill] sm:$0xff] %v3226_v5  ;;  %v3238_v45 = vadd.f32 %v2994_v25, %v3596_v14  ;;  %v3242_v37 = vadd.f32 %v2994_v25, %v3597_v7  ;;  %v3598_v59 = vld [vmem:[#allocation19_spill] sm:$0xff]  ;;  %v3599_v5 = vld [vmem:[#allocation2_spill] sm:$0xff]  ;;  %v3262_v7 = vadd.f32 %v2994_v25, %v3006_v29  ;;  %v1069_v44 = vmax.f32 %v3090_v39, 0.0 }
 0x232   :  { %3595 = vst [vmem:[#allocation14_spill] sm:$0xff] %v3234_v31  ;;  %v3246_v62 = vadd.f32 %v2994_v25, %v3598_v59  ;;  %v3250_v17 = vadd.f32 %v2994_v25, %v3599_v5  ;;  %v3600_v31 = vld [vmem:[#allocation3_spill] sm:$0xff]  ;;  %v3266_v59 = vadd.f32 %v2994_v25, %v3010_v13  ;;  %v3270_v5 = vadd.f32 %v2994_v25, %v3014_v26 }
 0x233   :  { %v3258_v14 = vadd.f32 %v2994_v25, %v3600_v31  ;;  %3601 = vst [vmem:[#allocation20_spill] sm:$0xff] %v3262_v7  ;;  %3604 = vst [vmem:[#allocation23_spill] sm:$0xff] %v3274_v23  ;;  %v3278_v31 = vadd.f32 %v2994_v25, %v3022_v32  ;;  %v3282_v29 = vadd.f32 %v2994_v25, %v3026_v35  ;;  %v1060_v23 = vmax.f32 %v3054_v34, 0.0 }
 0x234   :  { %3602 = vst [vmem:[#allocation21_spill] sm:$0xff] %v3266_v59  ;;  %3603 = vst [vmem:[#allocation22_spill] sm:$0xff] %v3270_v5  ;;  %v1061_v32 = vmax.f32 %v3058_v15, 0.0  ;;  %v1063_v25 = vmax.f32 %v3066_v16, 0.0  ;;  %v1064_v35 = vmax.f32 %v3070_v9, 0.0  ;;  %v1065_v13 = vmax.f32 %v3074_v19, 0.0 }
 0x235   :  { %3605 = vst [vmem:[#allocation24_spill] sm:$0xff] %v3278_v31  ;;  %3606 = vst [vmem:[#allocation25_spill] sm:$0xff] %v3282_v29  ;;  %v1062_v31 = vmax.f32 %v3062_v42, 0.0  ;;  %v1066_v59 = vmax.f32 %v3078_v58, 0.0  ;;  %v1067_v26 = vmax.f32 %v3082_v33, 0.0  ;;  %v1068_v5 = vmax.f32 %v3086_v51, 0.0 }
 0x236   :  { %v1070_v34 = vmax.f32 %v3094_v41, 0.0  ;;  %v1071_v15 = vmax.f32 %v3098_v43, 0.0  ;;  %v1072_v42 = vmax.f32 %v3102_v48, 0.0  ;;  %v1073_v16 = vmax.f32 %v3106_v55, 0.0  ;;  %v3607_v7 = vld [vmem:[#allocation9_spill] sm:$0xff] }
 0x237   :  { %v1074_v9 = vmax.f32 %v3110_v36, 0.0  ;;  %v1075_v19 = vmax.f32 %v3114_v12, 0.0  ;;  %v1076_v58 = vmax.f32 %v3118_v18, 0.0  ;;  %v1077_v33 = vmax.f32 %v3122_v46, 0.0  ;;  %v3608_v3 = vld [vmem:[#allocation10_spill] sm:$0xff]  ;;  %v3609_v28 = vld [vmem:[#allocation11_spill] sm:$0xff] }
 0x238   :  { %v1078_v51 = vmax.f32 %v3126_v0, 0.0  ;;  %v1079_v39 = vmax.f32 %v3130_v63, 0.0  ;;  %v1080_v41 = vmax.f32 %v3134_v49, 0.0  ;;  %v1081_v43 = vmax.f32 %v3138_v6, 0.0  ;;  %v3610_v50 = vld [vmem:[#allocation12_spill] sm:$0xff]  ;;  %v3611_v57 = vld [vmem:[#allocation13_spill] sm:$0xff] }
 0x239   :  { %v1082_v48 = vmax.f32 %v3142_v11, 0.0  ;;  %v1083_v55 = vmax.f32 %v3146_v61, 0.0  ;;  %v1084_v36 = vmax.f32 %v3150_v40, 0.0  ;;  %v1085_v12 = vmax.f32 %v3154_v47, 0.0  ;;  %v3612_v1 = vld [vmem:[#allocation14_spill] sm:$0xff] }
 0x23a   :  { %v1086_v18 = vmax.f32 %v3158_v52, 0.0  ;;  %v1087_v46 = vmax.f32 %v3162_v53, 0.0  ;;  %v1088_v0 = vmax.f32 %v3166_v56, 0.0  ;;  %v1089_v63 = vmax.f32 %v3170_v30, 0.0  ;;  %v3613_v29 = vld [vmem:[#allocation20_spill] sm:$0xff] }
 0x23b   :  { %v1090_v49 = vmax.f32 %v3174_v20, 0.0  ;;  %v1091_v6 = vmax.f32 %v3178_v22, 0.0  ;;  %v1092_v11 = vmax.f32 %v3182_v2, 0.0  ;;  %v1093_v61 = vmax.f32 %v3186_v4, 0.0 }
 0x23c   :  { %v1094_v40 = vmax.f32 %v3190_v8, 0.0  ;;  %v1095_v47 = vmax.f32 %v3194_v21, 0.0  ;;  %v1096_v52 = vmax.f32 %v3198_v54, 0.0  ;;  %v1097_v53 = vmax.f32 %v3202_v10, 0.0 }
 0x23d   :  { %v1098_v56 = vmax.f32 %v3206_v60, 0.0  ;;  %v1099_v30 = vmax.f32 %v3607_v7, 0.0  ;;  %v1100_v20 = vmax.f32 %v3608_v3, 0.0  ;;  %v1101_v22 = vmax.f32 %v3609_v28, 0.0 }
 0x23e   :  { %v1102_v2 = vmax.f32 %v3610_v50, 0.0  ;;  %v1103_v4 = vmax.f32 %v3611_v57, 0.0  ;;  %v1104_v8 = vmax.f32 %v3230_v24, 0.0  ;;  %v1105_v21 = vmax.f32 %v3612_v1, 0.0  ;;  %v3614_v57 = vld [vmem:[#allocation21_spill] sm:$0xff]  ;;  %v3615_v1 = vld [vmem:[#allocation22_spill] sm:$0xff] }
 0x23f   :  { %v1106_v54 = vmax.f32 %v3238_v45, 0.0  ;;  %v1107_v10 = vmax.f32 %v3242_v37, 0.0  ;;  %v1108_v60 = vmax.f32 %v3246_v62, 0.0  ;;  %v1109_v7 = vmax.f32 %v3250_v17, 0.0  ;;  %v3616_v37 = vld [vmem:[#allocation23_spill] sm:$0xff]  ;;  %v3617_v17 = vld [vmem:[#allocation24_spill] sm:$0xff] }
 0x240   :  { %v1110_v3 = vmax.f32 %v3254_v38, 0.0  ;;  %v1111_v28 = vmax.f32 %v3258_v14, 0.0  ;;  %v1112_v50 = vmax.f32 %v3613_v29, 0.0  ;;  %v1113_v24 = vmax.f32 %v3614_v57, 0.0  ;;  %v3618_v14 = vld [vmem:[#allocation25_spill] sm:$0xff]  ;;  %v3619_v57 = vld [vmem:[#allocation4_spill] sm:$0xff] }
 0x241   :  { %v1114_v45 = vmax.f32 %v3615_v1, 0.0  ;;  %v1115_v62 = vmax.f32 %v3616_v37, 0.0  ;;  %v1116_v38 = vmax.f32 %v3617_v17, 0.0  ;;  %v1117_v29 = vmax.f32 %v3618_v14, 0.0  ;;  %v3621_v37 = vld [vmem:[#allocation5_spill] sm:$0xff] }
 0x242   :  { %v3620_v1 = vmax.f32 %v3619_v57, 0.0  ;;  %v3622_v17 = vmax.f32 %v3621_v37, 0.0  ;;  %v3623_v57 = vld [vmem:[#allocation6_spill] sm:$0xff] }
 0x243   :  { %v3624_v37 = vmax.f32 %v3623_v57, 0.0 }
 0x244   :  { %v1639_v14 = vpack.c.bf16 %v3622_v17, %v3620_v1  ;;  %v3625_v1 = vld [vmem:[#allocation7_spill] sm:$0xff] }
 0x245   :  { %v3626_v17 = vmax.f32 %v3625_v1, 0.0  ;;  %v3627_v1 = vld [vmem:[#allocation8_spill] sm:$0xff] }
 0x246   :  { %1640 = vst [vmem:[%s3459_s5] sm:$0xff] %v1639_v14  }
 0x247   :  { %v1644_v57 = vpack.c.bf16 %v3626_v17, %v3624_v37  ;;  %v3628_v17 = vmax.f32 %v3627_v1, 0.0  ;;  %v1654_v1 = vpack.c.bf16 %v1061_v32, %v1060_v23  ;;  %v1669_v23 = vpack.c.bf16 %v1067_v26, %v1066_v59 }
 0x248   :  { %v1674_v32 = vpack.c.bf16 %v1069_v44, %v1068_v5  ;;  %v1689_v59 = vpack.c.bf16 %v1075_v19, %v1074_v9  ;;  %v1694_v5 = vpack.c.bf16 %v1077_v33, %v1076_v58  ;;  %v1699_v26 = vpack.c.bf16 %v1079_v39, %v1078_v51 }
 0x249   :  { %v1649_v37 = vpack.c.bf16 %v1059_v27, %v3628_v17  ;;  %v1659_v17 = vpack.c.bf16 %v1063_v25, %v1062_v31  ;;  %v1664_v27 = vpack.c.bf16 %v1065_v13, %v1064_v35  ;;  %1796 = vst [vmem:[%s3459_s5 + $0x8] sm:$0xff] %v1644_v57   ;;  %1798 = vst [vmem:[%s3459_s5 + $0x18] sm:$0xff] %v1654_v1  }
 0x24a   :  { %v1679_v31 = vpack.c.bf16 %v1071_v15, %v1070_v34  ;;  %v1684_v13 = vpack.c.bf16 %v1073_v16, %v1072_v42  ;;  %1801 = vst [vmem:[%s3459_s5 + $0x30] sm:$0xff] %v1669_v23   ;;  %1802 = vst [vmem:[%s3459_s5 + $0x38] sm:$0xff] %v1674_v32   ;;  %v1704_v25 = vpack.c.bf16 %v1081_v43, %v1080_v41 }
 0x24b   :  { %1797 = vst [vmem:[%s3459_s5 + $0x10] sm:$0xff] %v1649_v37   ;;  %1799 = vst [vmem:[%s3459_s5 + $0x20] sm:$0xff] %v1659_v17   ;;  %v1709_v35 = vpack.c.bf16 %v1083_v55, %v1082_v48  ;;  %v1714_v44 = vpack.c.bf16 %v1085_v12, %v1084_v36  ;;  %v1719_v34 = vpack.c.bf16 %v1087_v46, %v1086_v18 }
 0x24c   :  { %1800 = vst [vmem:[%s3459_s5 + $0x28] sm:$0xff] %v1664_v27   ;;  %1803 = vst [vmem:[%s3459_s5 + $0x40] sm:$0xff] %v1679_v31   ;;  %v1724_v15 = vpack.c.bf16 %v1089_v63, %v1088_v0  ;;  %v1729_v42 = vpack.c.bf16 %v1091_v6, %v1090_v49  ;;  %v1734_v16 = vpack.c.bf16 %v1093_v61, %v1092_v11 }
 0x24d   :  { %1804 = vst [vmem:[%s3459_s5 + $0x48] sm:$0xff] %v1684_v13   ;;  %1805 = vst [vmem:[%s3459_s5 + $0x50] sm:$0xff] %v1689_v59   ;;  %v1739_v9 = vpack.c.bf16 %v1095_v47, %v1094_v40  ;;  %v1744_v19 = vpack.c.bf16 %v1097_v53, %v1096_v52  ;;  %v1749_v58 = vpack.c.bf16 %v1099_v30, %v1098_v56 }
 0x24e   :  { %1806 = vst [vmem:[%s3459_s5 + $0x58] sm:$0xff] %v1694_v5   ;;  %1807 = vst [vmem:[%s3459_s5 + $0x60] sm:$0xff] %v1699_v26   ;;  %v1754_v33 = vpack.c.bf16 %v1101_v22, %v1100_v20  ;;  %v1759_v51 = vpack.c.bf16 %v1103_v4, %v1102_v2  ;;  %v1764_v39 = vpack.c.bf16 %v1105_v21, %v1104_v8 }
 0x24f   :  { %1808 = vst [vmem:[%s3459_s5 + $0x68] sm:$0xff] %v1704_v25   ;;  %1809 = vst [vmem:[%s3459_s5 + $0x70] sm:$0xff] %v1709_v35   ;;  %v1769_v41 = vpack.c.bf16 %v1107_v10, %v1106_v54  ;;  %v1774_v43 = vpack.c.bf16 %v1109_v7, %v1108_v60  ;;  %v1779_v48 = vpack.c.bf16 %v1111_v28, %v1110_v3 }
 0x250   :  { %1810 = vst [vmem:[%s3459_s5 + $0x78] sm:$0xff] %v1714_v44   ;;  %1811 = vst [vmem:[%s3459_s5 + $0x80] sm:$0xff] %v1719_v34   ;;  %v1784_v55 = vpack.c.bf16 %v1113_v24, %v1112_v50  ;;  %v1789_v36 = vpack.c.bf16 %v1115_v62, %v1114_v45  ;;  %v1794_v12 = vpack.c.bf16 %v1117_v29, %v1116_v38 }
 0x251   :  { %1812 = vst [vmem:[%s3459_s5 + $0x88] sm:$0xff] %v1724_v15   ;;  %1813 = vst [vmem:[%s3459_s5 + $0x90] sm:$0xff] %v1729_v42  }
 0x252   :  { %1814 = vst [vmem:[%s3459_s5 + $0x98] sm:$0xff] %v1734_v16   ;;  %1815 = vst [vmem:[%s3459_s5 + $0xa0] sm:$0xff] %v1739_v9  }
 0x253   :  { %1816 = vst [vmem:[%s3459_s5 + $0xa8] sm:$0xff] %v1744_v19   ;;  %1817 = vst [vmem:[%s3459_s5 + $0xb0] sm:$0xff] %v1749_v58  }
 0x254   :  { %1818 = vst [vmem:[%s3459_s5 + $0xb8] sm:$0xff] %v1754_v33   ;;  %1819 = vst [vmem:[%s3459_s5 + $0xc0] sm:$0xff] %v1759_v51  }
 0x255   :  { %1820 = vst [vmem:[%s3459_s5 + $0xc8] sm:$0xff] %v1764_v39   ;;  %1821 = vst [vmem:[%s3459_s5 + $0xd0] sm:$0xff] %v1769_v41  }
 0x256   :  { %1822 = vst [vmem:[%s3459_s5 + $0xd8] sm:$0xff] %v1774_v43   ;;  %1823 = vst [vmem:[%s3459_s5 + $0xe0] sm:$0xff] %v1779_v48  }
 0x257   :  { %1824 = vst [vmem:[%s3459_s5 + $0xe8] sm:$0xff] %v1784_v55   ;;  %1825 = vst [vmem:[%s3459_s5 + $0xf0] sm:$0xff] %v1789_v36  }
 0x258   :  { %1826 = vst [vmem:[%s3459_s5 + $0xf8] sm:$0xff] %v1794_v12  }

// kernel: encoder_forward.5
= control target key start
LH: loop header
LB: loop body
LE: loop exit
PB: predicated region body
PF: predicated region fallthrough
CT: control target
= control target key end

     0   :  { %v3004_v0 = vmov 0   ;;  %vm780_vm0 = vcmask 261120   ;;  %s4860_s1 = inlined_call_operand.vmem [shape: bf16[288,128], index: 1, kind: input, shape index: {}]   ;;  %s4861_s0 = inlined_call_operand.vmem [shape: bf16[512,288], index: 0, kind: input, shape index: {}]   ;;  %s4862_s2 = inlined_call_operand.vmem [shape: f32[1,128], index: 2, kind: input, shape index: {}]   ;;  %s4863_s3 = inlined_call_operand.vmem [shape: f32[1,128], index: 3, kind: input, shape index: {}]   ;;  %s4864_s4 = inlined_call_operand.vmem [shape: f32[1,128], index: 4, kind: input, shape index: {}]   ;;  %s4865_s5 = inlined_call_operand.vmem [shape: bf16[512,128], index: 5, kind: output, shape index: {}]  }
   0x1   :  { %877 = vmatprep.subr.bf16.mxu0 %v3004_v0  ;;  %2823 = vmatprep.subr.bf16.mxu1 %v3004_v0  ;;  %v2856_v1 = vld [vmem:[%s4860_s1] sm:$0xff]   ;;  %v2857_v2 = vld [vmem:[%s4860_s1 + $0x8] sm:$0xff]   ;;  %v2858_v3 = vld [vmem:[%s4860_s1 + $0x10] sm:$0xff]  }
   0x2   :  { %878 = vmatpush1.bf16.msra.mxu0 %v2856_v1  ;;  %2839 = vmatpush1.bf16.msra.mxu1 %v2856_v1  ;;  %v2859_v4 = vld [vmem:[%s4860_s1 + $0x18] sm:$0xff]   ;;  %v2860_v5 = vld [vmem:[%s4860_s1 + $0x20] sm:$0xff]   ;;  %v2861_v7 = vld [vmem:[%s4860_s1 + $0x28] sm:$0xff]  }
   0x3   :  { %879 = vmatprep.subr.bf16.mxu0 %v3004_v0  ;;  %2824 = vmatprep.subr.bf16.mxu1 %v3004_v0  ;;  %v2874_v6 = vld [vmem:[%s4861_s0 + $0x4] ss:$12 sps:$4 sm:$0xff]   ;;  %v2863_v10 = vld [vmem:[%s4860_s1 + $0x38] sm:$0xff]   ;;  %v2865_v12 = vld [vmem:[%s4860_s1 + $0x48] sm:$0xff]  }
   0x4   :  { %v2877_v8 = vld [vmem:[%s4861_s0 + $0x244] ss:$12 sps:$4 sm:$0xff]   ;;  %909 = vmatprep.mubr.bf16.mxu0 %v2874_v6  ;;  %v2867_v14 = vld [vmem:[%s4860_s1 + $0x58] sm:$0xff]   ;;  %v2869_v16 = vld [vmem:[%s4860_s1 + $0x68] sm:$0xff]  }
   0x5   :  { %1101 = vmatprep.mubr.bf16.mxu1 %v2877_v8  ;;  %v2862_v9 = vld [vmem:[%s4860_s1 + $0x30] sm:$0xff]   ;;  %v2864_v11 = vld [vmem:[%s4860_s1 + $0x40] sm:$0xff]   ;;  %v2871_v18 = vld [vmem:[%s4860_s1 + $0x78] sm:$0xff]  }
   0x6   :  { %880 = vmatpush1.bf16.msra.mxu0 %v2857_v2  ;;  %2840 = vmatpush1.bf16.msra.mxu1 %v2857_v2  ;;  %v2866_v13 = vld [vmem:[%s4860_s1 + $0x50] sm:$0xff]   ;;  %v2868_v15 = vld [vmem:[%s4860_s1 + $0x60] sm:$0xff]   ;;  %v2878_v22 = vld [vmem:[%s4861_s0 + $0x1c] ss:$12 sps:$4 sm:$0xff]  }
   0x7   :  { %881 = vmatprep.subr.bf16.mxu0 %v3004_v0  ;;  %2825 = vmatprep.subr.bf16.mxu1 %v3004_v0  ;;  %v2870_v17 = vld [vmem:[%s4860_s1 + $0x70] sm:$0xff]   ;;  %v2896_v19 = vld [vmem:[%s4860_s1 + $0x80] sm:$0xff]   ;;  %v2880_v23 = vld [vmem:[%s4861_s0 + $0x25c] ss:$12 sps:$4 sm:$0xff]  }
   0x8   :  { %v2872_v20 = vld [vmem:[%s4861_s0] ss:$12 sps:$4 sm:$0xff]   ;;  %v2882_v25 = vld [vmem:[%s4861_s0 + $0x18] ss:$12 sps:$4 sm:$0xff]   ;;  %v2888_v29 = vld [vmem:[%s4861_s0 + $0x30] ss:$12 sps:$4 sm:$0xff]  }
   0x9   :  { %v2875_v21 = vld [vmem:[%s4861_s0 + $0x240] ss:$12 sps:$4 sm:$0xff]   ;;  %v2883_v26 = vld [vmem:[%s4861_s0 + $0x258] ss:$12 sps:$4 sm:$0xff]   ;;  %v2889_v30 = vld [vmem:[%s4861_s0 + $0x270] ss:$12 sps:$4 sm:$0xff]  }
   0xa   :  { %882 = vmatpush1.bf16.msra.mxu0 %v2858_v3  ;;  %2841 = vmatpush1.bf16.msra.mxu1 %v2858_v3  ;;  %v2921_v24 = vld [vmem:[%s4860_s1 + $0x88] sm:$0xff]   ;;  %v2884_v27 = vld [vmem:[%s4861_s0 + $0x34] ss:$12 sps:$4 sm:$0xff]   ;;  %v2897_v35 = vld [vmem:[%s4861_s0 + $0x64] ss:$12 sps:$4 sm:$0xff]  }
   0xb   :  { %883 = vmatprep.subr.bf16.mxu0 %v3004_v0  ;;  %2826 = vmatprep.subr.bf16.mxu1 %v3004_v0  ;;  %v2886_v28 = vld [vmem:[%s4861_s0 + $0x274] ss:$12 sps:$4 sm:$0xff]   ;;  %v2890_v31 = vld [vmem:[%s4861_s0 + $0x4c] ss:$12 sps:$4 sm:$0xff]   ;;  %v2899_v36 = vld [vmem:[%s4861_s0 + $0x2a4] ss:$12 sps:$4 sm:$0xff]  }
   0xc   :  { %v2892_v32 = vld [vmem:[%s4861_s0 + $0x28c] ss:$12 sps:$4 sm:$0xff]   ;;  %v2894_v33 = vld [vmem:[%s4861_s0 + $0x48] ss:$12 sps:$4 sm:$0xff]   ;;  %v2913_v45 = vld [vmem:[%s4861_s0 + $0x90] ss:$12 sps:$4 sm:$0xff]  }
   0xd   :  { %v2895_v34 = vld [vmem:[%s4861_s0 + $0x288] ss:$12 sps:$4 sm:$0xff]   ;;  %v2901_v37 = vld [vmem:[%s4861_s0 + $0x60] ss:$12 sps:$4 sm:$0xff]   ;;  %v2907_v41 = vld [vmem:[%s4861_s0 + $0x78] ss:$12 sps:$4 sm:$0xff]  }
   0xe   :  { %884 = vmatpush1.bf16.msra.mxu0 %v2859_v4  ;;  %2842 = vmatpush1.bf16.msra.mxu1 %v2859_v4  ;;  %v2902_v38 = vld [vmem:[%s4861_s0 + $0x2a0] ss:$12 sps:$4 sm:$0xff]   ;;  %v2903_v39 = vld [vmem:[%s4861_s0 + $0x7c] ss:$12 sps:$4 sm:$0xff]   ;;  %v2908_v42 = vld [vmem:[%s4861_s0 + $0x2b8] ss:$12 sps:$4 sm:$0xff]  }
   0xf   :  { %885 = vmatprep.subr.bf16.mxu0 %v3004_v0  ;;  %2827 = vmatprep.subr.bf16.mxu1 %v3004_v0  ;;  %v2905_v40 = vld [vmem:[%s4861_s0 + $0x2bc] ss:$12 sps:$4 sm:$0xff]   ;;  %v2909_v43 = vld [vmem:[%s4861_s0 + $0x94] ss:$12 sps:$4 sm:$0xff]   ;;  %v2915_v47 = vld [vmem:[%s4861_s0 + $0xac] ss:$12 sps:$4 sm:$0xff]  }
  0x10   :  { %v2911_v44 = vld [vmem:[%s4861_s0 + $0x2d4] ss:$12 sps:$4 sm:$0xff]   ;;  %v2914_v46 = vld [vmem:[%s4861_s0 + $0x2d0] ss:$12 sps:$4 sm:$0xff]   ;;  %v2917_v48 = vld [vmem:[%s4861_s0 + $0x2ec] ss:$12 sps:$4 sm:$0xff]  }
  0x11   :  { %v2919_v49 = vld [vmem:[%s4861_s0 + $0xa8] ss:$12 sps:$4 sm:$0xff]   ;;  %v2922_v51 = vld [vmem:[%s4861_s0 + $0xc4] ss:$12 sps:$4 sm:$0xff]   ;;  %v2925_v53 = vld [vmem:[%s4861_s0 + $0xc0] ss:$12 sps:$4 sm:$0xff]  }
  0x12   :  { %886 = vmatpush1.bf16.msra.mxu0 %v2860_v5  ;;  %2843 = vmatpush1.bf16.msra.mxu1 %v2860_v5  ;;  %v2920_v50 = vld [vmem:[%s4861_s0 + $0x2e8] ss:$12 sps:$4 sm:$0xff]   ;;  %v2926_v54 = vld [vmem:[%s4861_s0 + $0x20] ss:$12 sps:$4 sm:$0xff]   ;;  %v2929_v56 = vld [vmem:[%s4861_s0 + $0x38] ss:$12 sps:$4 sm:$0xff]  }
  0x13   :  { %887 = vmatprep.subr.bf16.mxu0 %v3004_v0  ;;  %2828 = vmatprep.subr.bf16.mxu1 %v3004_v0  ;;  %v2924_v52 = vld [vmem:[%s4861_s0 + $0x8] ss:$12 sps:$4 sm:$0xff]   ;;  %v2930_v57 = vld [vmem:[%s4861_s0 + $0xd8] ss:$12 sps:$4 sm:$0xff]   ;;  %v2931_v58 = vld [vmem:[%s4861_s0 + $0x50] ss:$12 sps:$4 sm:$0xff]  }
  0x14   :  { %v2927_v55 = vld [vmem:[%s4861_s0 + $0xdc] ss:$12 sps:$4 sm:$0xff]   ;;  %v2932_v59 = vld [vmem:[%s4861_s0 + $0xf4] ss:$12 sps:$4 sm:$0xff]   ;;  %v2937_v63 = vld [vmem:[%s4861_s0 + $0x10c] ss:$12 sps:$4 sm:$0xff]  }
  0x15   :  { %v2934_v60 = vld [vmem:[%s4861_s0 + $0x68] ss:$12 sps:$4 sm:$0xff]   ;;  %v2935_v61 = vld [vmem:[%s4861_s0 + $0xf0] ss:$12 sps:$4 sm:$0xff]   ;;  %v2936_v62 = vld [vmem:[%s4861_s0 + $0x80] ss:$12 sps:$4 sm:$0xff]  }
  0x16   :  { %888 = vmatpush1.bf16.msra.mxu0 %v2861_v7  ;;  %2844 = vmatpush1.bf16.msra.mxu1 %v2861_v7  ;;  %v2940_v1 = vld [vmem:[%s4861_s0 + $0x108] ss:$12 sps:$4 sm:$0xff]   ;;  %v2941_v2 = vld [vmem:[%s4861_s0 + $0xb0] ss:$12 sps:$4 sm:$0xff]   ;;  %v2945_v5 = vld [vmem:[%s4861_s0 + $0x120] ss:$12 sps:$4 sm:$0xff]  }
  0x17   :  { %889 = vmatprep.subr.bf16.mxu0 %v3004_v0  ;;  %2829 = vmatprep.subr.bf16.mxu1 %v3004_v0  ;;  %v2942_v3 = vld [vmem:[%s4861_s0 + $0x124] ss:$12 sps:$4 sm:$0xff]   ;;  %v2944_v4 = vld [vmem:[%s4861_s0 + $0xc8] ss:$12 sps:$4 sm:$0xff]   ;;  %v2946_v6 = vld [vmem:[%s4861_s0 + $0xe0] ss:$12 sps:$4 sm:$0xff]  }
  0x18   :  { %v2947_v7 = vld [vmem:[%s4861_s0 + $0x13c] ss:$12 sps:$4 sm:$0xff]   ;;  %v2949_v8 = vld [vmem:[%s4861_s0 + $0xf8] ss:$12 sps:$4 sm:$0xff]  }
  0x1a   :  { %890 = vmatpush1.bf16.msra.mxu0 %v2862_v9  ;;  %2845 = vmatpush1.bf16.msra.mxu1 %v2862_v9  ;;  %v2950_v9 = vld [vmem:[%s4861_s0 + $0x138] ss:$12 sps:$4 sm:$0xff]  }
  0x1b   :  { %891 = vmatprep.subr.bf16.mxu0 %v3004_v0  ;;  %2830 = vmatprep.subr.bf16.mxu1 %v3004_v0 }
  0x1e   :  { %892 = vmatpush1.bf16.msra.mxu0 %v2863_v10  ;;  %2846 = vmatpush1.bf16.msra.mxu1 %v2863_v10  ;;  %v2951_v10 = vld [vmem:[%s4861_s0 + $0x110] ss:$12 sps:$4 sm:$0xff]  }
  0x1f   :  { %893 = vmatprep.subr.bf16.mxu0 %v3004_v0  ;;  %2831 = vmatprep.subr.bf16.mxu1 %v3004_v0 }
  0x22   :  { %894 = vmatpush1.bf16.msra.mxu0 %v2864_v11  ;;  %2847 = vmatpush1.bf16.msra.mxu1 %v2864_v11  ;;  %v2952_v11 = vld [vmem:[%s4861_s0 + $0x154] ss:$12 sps:$4 sm:$0xff]  }
  0x23   :  { %895 = vmatprep.subr.bf16.mxu0 %v3004_v0  ;;  %2832 = vmatprep.subr.bf16.mxu1 %v3004_v0 }
  0x26   :  { %896 = vmatpush1.bf16.msra.mxu0 %v2865_v12  ;;  %2848 = vmatpush1.bf16.msra.mxu1 %v2865_v12  ;;  %v2954_v12 = vld [vmem:[%s4861_s0 + $0x128] ss:$12 sps:$4 sm:$0xff]  }
  0x27   :  { %897 = vmatprep.subr.bf16.mxu0 %v3004_v0  ;;  %2833 = vmatprep.subr.bf16.mxu1 %v3004_v0 }
  0x2a   :  { %898 = vmatpush1.bf16.msra.mxu0 %v2866_v13  ;;  %2849 = vmatpush1.bf16.msra.mxu1 %v2866_v13  ;;  %v2955_v13 = vld [vmem:[%s4861_s0 + $0x150] ss:$12 sps:$4 sm:$0xff]  }
  0x2b   :  { %899 = vmatprep.subr.bf16.mxu0 %v3004_v0  ;;  %2834 = vmatprep.subr.bf16.mxu1 %v3004_v0 }
  0x2e   :  { %900 = vmatpush1.bf16.msra.mxu0 %v2867_v14  ;;  %2850 = vmatpush1.bf16.msra.mxu1 %v2867_v14  ;;  %v2956_v14 = vld [vmem:[%s4861_s0 + $0x140] ss:$12 sps:$4 sm:$0xff]  }
  0x2f   :  { %901 = vmatprep.subr.bf16.mxu0 %v3004_v0  ;;  %2835 = vmatprep.subr.bf16.mxu1 %v3004_v0 }
  0x32   :  { %902 = vmatpush1.bf16.msra.mxu0 %v2868_v15  ;;  %2851 = vmatpush1.bf16.msra.mxu1 %v2868_v15  ;;  %v2957_v15 = vld [vmem:[%s4861_s0 + $0x16c] ss:$12 sps:$4 sm:$0xff]  }
  0x33   :  { %903 = vmatprep.subr.bf16.mxu0 %v3004_v0  ;;  %2836 = vmatprep.subr.bf16.mxu1 %v3004_v0 }
  0x36   :  { %904 = vmatpush1.bf16.msra.mxu0 %v2869_v16  ;;  %2852 = vmatpush1.bf16.msra.mxu1 %v2869_v16  ;;  %v2959_v16 = vld [vmem:[%s4861_s0 + $0x158] ss:$12 sps:$4 sm:$0xff]  }
  0x37   :  { %905 = vmatprep.subr.bf16.mxu0 %v3004_v0  ;;  %2837 = vmatprep.subr.bf16.mxu1 %v3004_v0 }
  0x3a   :  { %906 = vmatpush1.bf16.msra.mxu0 %v2870_v17  ;;  %2853 = vmatpush1.bf16.msra.mxu1 %v2870_v17  ;;  %v2960_v17 = vld [vmem:[%s4861_s0 + $0x168] ss:$12 sps:$4 sm:$0xff]  }
  0x3b   :  { %907 = vmatprep.subr.bf16.mxu0 %v3004_v0  ;;  %2838 = vmatprep.subr.bf16.mxu1 %v3004_v0  ;;  %v2939_v0 = vld [vmem:[%s4861_s0 + $0x98] ss:$12 sps:$4 sm:$0xff]  }
  0x3e   :  { %908 = vmatpush1.bf16.msra.mxu0 %v2871_v18  ;;  %2854 = vmatpush1.bf16.msra.mxu1 %v2871_v18  ;;  %v2961_v18 = vld [vmem:[%s4861_s0 + $0x170] ss:$12 sps:$4 sm:$0xff]  }
  0x3f   :  { %2755 = vmatprep.subr.bf16.mxu1 %v2896_v19 }
  0x41   :  { %910 = vmatmul.mubr.bf16.vlgmr.msra.gmra.mrb[0].mxu0 %v2872_v20  ;;  %1102 = vmatmul.mubr.bf16.vlgmr.msra.gmra.mrb[0].mxu1 %v2875_v21  ;;  %v2964_v20 = vld [vmem:[%s4861_s0 + $0x188] ss:$12 sps:$4 sm:$0xff]   ;;  %v2965_v21 = vld [vmem:[%s4861_s0 + $0x180] ss:$12 sps:$4 sm:$0xff]  }
  0x42   :  { %917 = vmatprep.mubr.bf16.mxu0 %v2878_v22  ;;  %1109 = vmatprep.mubr.bf16.mxu1 %v2880_v23  ;;  %v2966_v22 = vld [vmem:[%s4861_s0 + $0x1a0] ss:$12 sps:$4 sm:$0xff]   ;;  %v2967_v23 = vld [vmem:[%s4861_s0 + $0x19c] ss:$12 sps:$4 sm:$0xff]  }
  0x43   :  { %2756 = vmatpush3.bf16.msra.mxu1 %v2896_v19  ;;  %v2962_v19 = vld [vmem:[%s4861_s0 + $0x184] ss:$12 sps:$4 sm:$0xff]  }
  0x44   :  { %2757 = vmatprep.subr.bf16.mxu1 %v2921_v24 }
  0x47   :  { %2758 = vmatpush3.bf16.msra.mxu1 %v2921_v24  ;;  %v2969_v24 = vld [vmem:[%s4861_s0 + $0x1b8] ss:$12 sps:$4 sm:$0xff]  }
  0x49   :  { %918 = vmatmul.mubr.bf16.gmra.mrb[4].mxu0 %v2882_v25  ;;  %1110 = vmatmul.mubr.bf16.gmra.mrb[4].mxu1 %v2883_v26  ;;  %v2970_v25 = vld [vmem:[%s4861_s0 + $0x198] ss:$12 sps:$4 sm:$0xff]   ;;  %v2971_v26 = vld [vmem:[%s4861_s0 + $0x1d0] ss:$12 sps:$4 sm:$0xff]  }
  0x4a   :  { %925 = vmatprep.mubr.bf16.mxu0 %v2884_v27  ;;  %1117 = vmatprep.mubr.bf16.mxu1 %v2886_v28  ;;  %v2972_v27 = vld [vmem:[%s4861_s0 + $0x1b4] ss:$12 sps:$4 sm:$0xff]  }
  0x4b   :  { %v2974_v28 = vld [vmem:[%s4861_s0 + $0x1e8] ss:$12 sps:$4 sm:$0xff]  }
  0x51   :  { %926 = vmatmul.mubr.bf16.gmra.mrb[8].mxu0 %v2888_v29  ;;  %1118 = vmatmul.mubr.bf16.gmra.mrb[8].mxu1 %v2889_v30  ;;  %v2975_v29 = vld [vmem:[%s4861_s0 + $0x1b0] ss:$12 sps:$4 sm:$0xff]   ;;  %v2976_v30 = vld [vmem:[%s4861_s0 + $0x200] ss:$12 sps:$4 sm:$0xff]  }
  0x52   :  { %933 = vmatprep.mubr.bf16.mxu0 %v2890_v31  ;;  %1125 = vmatprep.mubr.bf16.mxu1 %v2892_v32  ;;  %v2977_v31 = vld [vmem:[%s4861_s0 + $0x1cc] ss:$12 sps:$4 sm:$0xff]  }
  0x53   :  { %v2979_v32 = vld [vmem:[%s4861_s0 + $0x218] ss:$12 sps:$4 sm:$0xff]  }
  0x59   :  { %934 = vmatmul.mubr.bf16.gmra.mrb[12].mxu0 %v2894_v33  ;;  %1126 = vmatmul.mubr.bf16.gmra.mrb[12].mxu1 %v2895_v34  ;;  %v2980_v33 = vld [vmem:[%s4861_s0 + $0x1c8] ss:$12 sps:$4 sm:$0xff]   ;;  %v2981_v34 = vld [vmem:[%s4861_s0 + $0x230] ss:$12 sps:$4 sm:$0xff]  }
  0x5a   :  { %941 = vmatprep.mubr.bf16.mxu0 %v2897_v35  ;;  %1133 = vmatprep.mubr.bf16.mxu1 %v2899_v36  ;;  %v2982_v35 = vld [vmem:[%s4861_s0 + $0x1e4] ss:$12 sps:$4 sm:$0xff]   ;;  %v2984_v36 = vld [vmem:[%s4861_s0 + $0x248] ss:$12 sps:$4 sm:$0xff]  }
  0x61   :  { %942 = vmatmul.mubr.bf16.gmra.mrb[16].mxu0 %v2901_v37  ;;  %1134 = vmatmul.mubr.bf16.gmra.mrb[16].mxu1 %v2902_v38  ;;  %v2985_v37 = vld [vmem:[%s4861_s0 + $0x1e0] ss:$12 sps:$4 sm:$0xff]  }
  0x62   :  { %949 = vmatprep.mubr.bf16.mxu0 %v2903_v39  ;;  %1141 = vmatprep.mubr.bf16.mxu1 %v2905_v40  ;;  %v2986_v38 = vld [vmem:[%s4861_s0 + $0x260] ss:$12 sps:$4 sm:$0xff]   ;;  %v2987_v39 = vld [vmem:[%s4861_s0 + $0x1fc] ss:$12 sps:$4 sm:$0xff]   ;;  %v2989_v40 = vld [vmem:[%s4861_s0 + $0x278] ss:$12 sps:$4 sm:$0xff]  }
  0x69   :  { %950 = vmatmul.mubr.bf16.gmra.mrb[20].mxu0 %v2907_v41  ;;  %1142 = vmatmul.mubr.bf16.gmra.mrb[20].mxu1 %v2908_v42  ;;  %v2990_v41 = vld [vmem:[%s4861_s0 + $0x1f8] ss:$12 sps:$4 sm:$0xff]   ;;  %v2991_v42 = vld [vmem:[%s4861_s0 + $0x290] ss:$12 sps:$4 sm:$0xff]  }
  0x6a   :  { %957 = vmatprep.mubr.bf16.mxu0 %v2909_v43  ;;  %1149 = vmatprep.mubr.bf16.mxu1 %v2911_v44  ;;  %v2992_v43 = vld [vmem:[%s4861_s0 + $0x214] ss:$12 sps:$4 sm:$0xff]  }
  0x6b   :  { %v2994_v44 = vld [vmem:[%s4861_s0 + $0x2a8] ss:$12 sps:$4 sm:$0xff]  }
  0x71   :  { %958 = vmatmul.mubr.bf16.gmra.mrb[24].mxu0 %v2913_v45  ;;  %1150 = vmatmul.mubr.bf16.gmra.mrb[24].mxu1 %v2914_v46  ;;  %v2995_v45 = vld [vmem:[%s4861_s0 + $0x210] ss:$12 sps:$4 sm:$0xff]   ;;  %v2996_v46 = vld [vmem:[%s4861_s0 + $0x2c0] ss:$12 sps:$4 sm:$0xff]  }
  0x72   :  { %965 = vmatprep.mubr.bf16.mxu0 %v2915_v47  ;;  %1157 = vmatprep.mubr.bf16.mxu1 %v2917_v48  ;;  %v2997_v47 = vld [vmem:[%s4861_s0 + $0x22c] ss:$12 sps:$4 sm:$0xff]  }
  0x73   :  { %v2999_v48 = vld [vmem:[%s4861_s0 + $0x2d8] ss:$12 sps:$4 sm:$0xff]  }
  0x79   :  { %966 = vmatmul.mubr.bf16.gmra.mrb[28].mxu0 %v2919_v49  ;;  %1158 = vmatmul.mubr.bf16.gmra.mrb[28].mxu1 %v2920_v50  ;;  %v3000_v49 = vld [vmem:[%s4861_s0 + $0x228] ss:$12 sps:$4 sm:$0xff]   ;;  %v3001_v50 = vld [vmem:[%s4861_s0 + $0x2f0] ss:$12 sps:$4 sm:$0xff]  }
  0x7a   :  { %973 = vmatprep.mubr.bf16.mxu0 %v2922_v51  ;;  %2759 = vmatprep.mubr.msk.bf16.mxu1 %vm780_vm0, %v2924_v52 }
  0x81   :  { %974 = vmatmul.mubr.bf16.gmra.mrb[32].mxu0 %v2925_v53  ;;  %2760 = vmatmul.mubr.msk.bf16.vlgmr.msra.gmra.mrb[32].mxu1 %vm780_vm0, %v2926_v54 }
  0x82   :  { %981 = vmatprep.mubr.bf16.mxu0 %v2927_v55  ;;  %2763 = vmatprep.mubr.msk.bf16.mxu1 %vm780_vm0, %v2929_v56 }
  0x89   :  { %982 = vmatmul.mubr.bf16.gmra.mrb[36].mxu0 %v2930_v57  ;;  %2764 = vmatmul.mubr.msk.bf16.gmra.mrb[36].mxu1 %vm780_vm0, %v2931_v58 }
  0x8a   :  { %989 = vmatprep.mubr.bf16.mxu0 %v2932_v59  ;;  %2767 = vmatprep.mubr.msk.bf16.mxu1 %vm780_vm0, %v2934_v60 }
  0x91   :  { %990 = vmatmul.mubr.bf16.gmra.mrb[40].mxu0 %v2935_v61  ;;  %2768 = vmatmul.mubr.msk.bf16.gmra.mrb[40].mxu1 %vm780_vm0, %v2936_v62 }
  0x92   :  { %997 = vmatprep.mubr.bf16.mxu0 %v2937_v63  ;;  %2771 = vmatprep.mubr.msk.bf16.mxu1 %vm780_vm0, %v2939_v0 }
  0x99   :  { %998 = vmatmul.mubr.bf16.gmra.mrb[44].mxu0 %v2940_v1  ;;  %2772 = vmatmul.mubr.msk.bf16.gmra.mrb[44].mxu1 %vm780_vm0, %v2941_v2 }
  0x9a   :  { %1005 = vmatprep.mubr.bf16.mxu0 %v2942_v3  ;;  %2775 = vmatprep.mubr.msk.bf16.mxu1 %vm780_vm0, %v2944_v4 }
  0xa1   :  { %1006 = vmatmul.mubr.bf16.gmra.mrb[48].mxu0 %v2945_v5  ;;  %2776 = vmatmul.mubr.msk.bf16.gmra.mrb[48].mxu1 %vm780_vm0, %v2946_v6 }
  0xa2   :  { %1013 = vmatprep.mubr.bf16.mxu0 %v2947_v7  ;;  %2779 = vmatprep.mubr.msk.bf16.mxu1 %vm780_vm0, %v2949_v8 }
  0xa9   :  { %1014 = vmatmul.mubr.bf16.gmra.mrb[52].mxu0 %v2950_v9  ;;  %2780 = vmatmul.mubr.msk.bf16.gmra.mrb[52].mxu1 %vm780_vm0, %v2951_v10 }
  0xaa   :  { %1021 = vmatprep.mubr.bf16.mxu0 %v2952_v11  ;;  %2783 = vmatprep.mubr.msk.bf16.mxu1 %vm780_vm0, %v2954_v12 }
  0xb1   :  { %1022 = vmatmul.mubr.bf16.gmra.mrb[56].mxu0 %v2955_v13  ;;  %2784 = vmatmul.mubr.msk.bf16.gmra.mrb[56].mxu1 %vm780_vm0, %v2956_v14 }
  0xb2   :  { %1029 = vmatprep.mubr.bf16.mxu0 %v2957_v15  ;;  %2787 = vmatprep.mubr.msk.bf16.mxu1 %vm780_vm0, %v2959_v16 }
  0xb9   :  { %1030 = vmatmul.mubr.bf16.gmra.mrb[60].mxu0 %v2960_v17  ;;  %2788 = vmatmul.mubr.msk.bf16.gmra.mrb[60].mxu1 %vm780_vm0, %v2961_v18 }
  0xba   :  { %1037 = vmatprep.mubr.bf16.mxu0 %v2962_v19  ;;  %2791 = vmatprep.mubr.msk.bf16.mxu1 %vm780_vm0, %v2964_v20 }
  0xc1   :  { %1038 = vmatmul.mubr.bf16.gmra.mrb[64].mxu0 %v2965_v21  ;;  %2792 = vmatmul.mubr.msk.bf16.gmra.mrb[64].mxu1 %vm780_vm0, %v2966_v22 }
  0xc2   :  { %1045 = vmatprep.mubr.bf16.mxu0 %v2967_v23  ;;  %2795 = vmatprep.mubr.msk.bf16.mxu1 %vm780_vm0, %v2969_v24 }
  0xc9   :  { %1046 = vmatmul.mubr.bf16.gmra.mrb[68].mxu0 %v2970_v25  ;;  %2796 = vmatmul.mubr.msk.bf16.gmra.mrb[68].mxu1 %vm780_vm0, %v2971_v26 }
  0xca   :  { %1053 = vmatprep.mubr.bf16.mxu0 %v2972_v27  ;;  %2799 = vmatprep.mubr.msk.bf16.mxu1 %vm780_vm0, %v2974_v28 }
  0xd1   :  { %1054 = vmatmul.mubr.bf16.gmra.mrb[72].mxu0 %v2975_v29  ;;  %2800 = vmatmul.mubr.msk.bf16.gmra.mrb[72].mxu1 %vm780_vm0, %v2976_v30 }
  0xd2   :  { %1061 = vmatprep.mubr.bf16.mxu0 %v2977_v31  ;;  %2803 = vmatprep.mubr.msk.bf16.mxu1 %vm780_vm0, %v2979_v32 }
  0xd9   :  { %1062 = vmatmul.mubr.bf16.gmra.mrb[76].mxu0 %v2980_v33  ;;  %2804 = vmatmul.mubr.msk.bf16.gmra.mrb[76].mxu1 %vm780_vm0, %v2981_v34 }
  0xda   :  { %1069 = vmatprep.mubr.bf16.mxu0 %v2982_v35  ;;  %2807 = vmatprep.mubr.msk.bf16.mxu1 %vm780_vm0, %v2984_v36 }
  0xe1   :  { %1070 = vmatmul.mubr.bf16.gmra.mrb[80].mxu0 %v2985_v37  ;;  %2808 = vmatmul.mubr.msk.bf16.gmra.mrb[80].mxu1 %vm780_vm0, %v2986_v38 }
  0xe2   :  { %1077 = vmatprep.mubr.bf16.mxu0 %v2987_v39  ;;  %2811 = vmatprep.mubr.msk.bf16.mxu1 %vm780_vm0, %v2989_v40 }
  0xe9   :  { %1078 = vmatmul.mubr.bf16.gmra.mrb[84].mxu0 %v2990_v41  ;;  %2812 = vmatmul.mubr.msk.bf16.gmra.mrb[84].mxu1 %vm780_vm0, %v2991_v42 }
  0xea   :  { %1085 = vmatprep.mubr.bf16.mxu0 %v2992_v43  ;;  %2815 = vmatprep.mubr.msk.bf16.mxu1 %vm780_vm0, %v2994_v44 }
  0xf1   :  { %1086 = vmatmul.mubr.bf16.gmra.mrb[88].mxu0 %v2995_v45  ;;  %2816 = vmatmul.mubr.msk.bf16.gmra.mrb[88].mxu1 %vm780_vm0, %v2996_v46 }
  0xf2   :  { %1093 = vmatprep.mubr.bf16.mxu0 %v2997_v47  ;;  %2819 = vmatprep.mubr.msk.bf16.mxu1 %vm780_vm0, %v2999_v48 }
  0xf9   :  { %1094 = vmatmul.mubr.bf16.gmra.mrb[92].mxu0 %v3000_v49  ;;  %2820 = vmatmul.mubr.msk.bf16.gmra.mrb[92].mxu1 %vm780_vm0, %v3001_v50 }
 0x114   :  { %v3441_v51 = vpop.f32.mrb[0].mxu0  ;;  %v3443_v52 = vpop.f32.mrb[0].mxu1 }
 0x115   :  { %v913_v53 = vpop.f32.mrb[1].mxu0  ;;  %v1105_v54 = vpop.f32.mrb[1].mxu1 }
 0x116   :  { %v3445_v55 = vpop.f32.mrb[2].mxu0  ;;  %v3447_v56 = vpop.f32.mrb[2].mxu1  ;;  %v3500_v53 = vld [vmem:[%s4862_s2] ss:$0 sm:$0xff] }
 0x117   :  { %v916_v57 = vpop.f32.mrb[3].mxu0  ;;  %v1108_v58 = vpop.f32.mrb[3].mxu1 }
 0x118   :  { %v912_v57 = vadd.f32 %v3500_v53, %v3441_v51 }
 0x11c   :  { %v919_v59 = vpop.f32.mrb[4].mxu0  ;;  %v3449_v60 = vpop.f32.mrb[4].mxu1 }
 0x11d   :  { %v921_v61 = vpop.f32.mrb[5].mxu0  ;;  %v1113_v62 = vpop.f32.mrb[5].mxu1  ;;  %v920_v54 = vadd.f32 %v3500_v53, %v919_v59 }
 0x11e   :  { %v922_v63 = vpop.f32.mrb[6].mxu0  ;;  %v3451_v0 = vpop.f32.mrb[6].mxu1 }
 0x11f   :  { %v924_v1 = vpop.f32.mrb[7].mxu0  ;;  %v1116_v2 = vpop.f32.mrb[7].mxu1  ;;  %v923_v62 = vadd.f32 %v3500_v53, %v922_v63 }
 0x124   :  { %v3453_v3 = vpop.f32.mrb[8].mxu0  ;;  %v3455_v4 = vpop.f32.mrb[8].mxu1 }
 0x125   :  { %v929_v5 = vpop.f32.mrb[9].mxu0  ;;  %v1121_v6 = vpop.f32.mrb[9].mxu1 }
 0x126   :  { %v3457_v7 = vpop.f32.mrb[10].mxu0  ;;  %v3459_v8 = vpop.f32.mrb[10].mxu1  ;;  %v915_v6 = vadd.f32 %v3500_v53, %v3445_v55 }
 0x127   :  { %v932_v9 = vpop.f32.mrb[11].mxu0  ;;  %v1124_v10 = vpop.f32.mrb[11].mxu1 }
 0x12c   :  { %v935_v11 = vpop.f32.mrb[12].mxu0  ;;  %v3461_v12 = vpop.f32.mrb[12].mxu1 }
 0x12d   :  { %v937_v13 = vpop.f32.mrb[13].mxu0  ;;  %v1129_v14 = vpop.f32.mrb[13].mxu1 }
 0x12e   :  { %v938_v15 = vpop.f32.mrb[14].mxu0  ;;  %v3463_v16 = vpop.f32.mrb[14].mxu1 }
 0x12f   :  { %v940_v17 = vpop.f32.mrb[15].mxu0  ;;  %v1132_v18 = vpop.f32.mrb[15].mxu1 }
 0x130   :  { %v936_v18 = vadd.f32 %v3500_v53, %v935_v11 }
 0x134   :  { %v3465_v19 = vpop.f32.mrb[16].mxu0  ;;  %v3467_v20 = vpop.f32.mrb[16].mxu1 }
 0x135   :  { %v945_v21 = vpop.f32.mrb[17].mxu0  ;;  %v1137_v22 = vpop.f32.mrb[17].mxu1 }
 0x136   :  { %v3469_v23 = vpop.f32.mrb[18].mxu0  ;;  %v3471_v24 = vpop.f32.mrb[18].mxu1  ;;  %v928_v21 = vadd.f32 %v3500_v53, %v3453_v3 }
 0x137   :  { %v948_v25 = vpop.f32.mrb[19].mxu0  ;;  %v1140_v26 = vpop.f32.mrb[19].mxu1 }
 0x138   :  { %v939_v26 = vadd.f32 %v3500_v53, %v938_v15 }
 0x13c   :  { %v3473_v27 = vpop.f32.mrb[20].mxu0  ;;  %v3475_v28 = vpop.f32.mrb[20].mxu1 }
 0x13d   :  { %v953_v29 = vpop.f32.mrb[21].mxu0  ;;  %v1145_v30 = vpop.f32.mrb[21].mxu1 }
 0x13e   :  { %v3477_v31 = vpop.f32.mrb[22].mxu0  ;;  %v3479_v32 = vpop.f32.mrb[22].mxu1 }
 0x13f   :  { %v956_v33 = vpop.f32.mrb[23].mxu0  ;;  %v1148_v34 = vpop.f32.mrb[23].mxu1 }
 0x140   :  { %v931_v34 = vadd.f32 %v3500_v53, %v3457_v7  ;;  %v944_v7 = vadd.f32 %v3500_v53, %v3465_v19 }
 0x144   :  { %v3481_v35 = vpop.f32.mrb[24].mxu0  ;;  %v3483_v36 = vpop.f32.mrb[24].mxu1 }
 0x145   :  { %v961_v37 = vpop.f32.mrb[25].mxu0  ;;  %v1153_v38 = vpop.f32.mrb[25].mxu1 }
 0x146   :  { %v3485_v39 = vpop.f32.mrb[26].mxu0  ;;  %v3487_v40 = vpop.f32.mrb[26].mxu1 }
 0x147   :  { %v964_v41 = vpop.f32.mrb[27].mxu0  ;;  %v1156_v42 = vpop.f32.mrb[27].mxu1 }
 0x14c   :  { %v3489_v43 = vpop.f32.mrb[28].mxu0  ;;  %v3491_v44 = vpop.f32.mrb[28].mxu1 }
 0x14d   :  { %v969_v45 = vpop.f32.mrb[29].mxu0  ;;  %v1161_v46 = vpop.f32.mrb[29].mxu1 }
 0x14e   :  { %v3493_v47 = vpop.f32.mrb[30].mxu0  ;;  %v3495_v48 = vpop.f32.mrb[30].mxu1 }
 0x14f   :  { %v972_v49 = vpop.f32.mrb[31].mxu0  ;;  %v1164_v50 = vpop.f32.mrb[31].mxu1 }
 0x150   :  { %v952_v50 = vadd.f32 %v3500_v53, %v3473_v27 }
 0x154   :  { %v3505_v58 = vpop.f32.mrb[32].mxu0  ;;  %v2761_v61 = vpop.f32.mrb[32].mxu1 }
 0x155   :  { %v3508_v1 = vadd.f32 %v2761_v61, %v920_v54  ;;  %v977_v2 = vpop.f32.mrb[33].mxu0  ;;  %v1200_v5 = vpop.f32.mrb[33].mxu1 }
 0x156   :  { %v3512_v9 = vadd.f32 %v1200_v5, %v912_v57  ;;  %v3514_v10 = vpop.f32.mrb[34].mxu0  ;;  %v2762_v59 = vpop.f32.mrb[34].mxu1 }
 0x157   :  { %v3516_v13 = vadd.f32 %v2762_v59, %v923_v62  ;;  %v980_v51 = vpop.f32.mrb[35].mxu0  ;;  %v1203_v14 = vpop.f32.mrb[35].mxu1  ;;  %v955_v62 = vadd.f32 %v3500_v53, %v3477_v31  ;;  %v947_v59 = vadd.f32 %v3500_v53, %v3469_v23  ;;  %v960_v23 = vadd.f32 %v3500_v53, %v3481_v35 }
 0x158   :  { %v3518_v17 = vadd.f32 %v1203_v14, %v915_v6 }
 0x15a   :  { %v1455_v63 = vadd.f32 %v3518_v17, %v3512_v9 }
 0x15c   :  { %v1456_v55 = vadd.f32 %v1455_v63, %v3508_v1  ;;  %v983_v22 = vpop.f32.mrb[36].mxu0  ;;  %v2765_v25 = vpop.f32.mrb[36].mxu1 }
 0x15d   :  { %v3527_v29 = vadd.f32 %v2765_v25, %v936_v18  ;;  %v985_v30 = vpop.f32.mrb[37].mxu0  ;;  %v1216_v33 = vpop.f32.mrb[37].mxu1 }
 0x15e   :  { %v3531_v37 = vadd.f32 %v1216_v33, %v928_v21  ;;  %v1457_v11 = vadd.f32 %v1456_v55, %v3516_v13  ;;  %v986_v38 = vpop.f32.mrb[38].mxu0  ;;  %v2766_v41 = vpop.f32.mrb[38].mxu1 }
 0x15f   :  { %v3534_v3 = vadd.f32 %v2766_v41, %v939_v26  ;;  %v988_v42 = vpop.f32.mrb[39].mxu0  ;;  %v1219_v45 = vpop.f32.mrb[39].mxu1  ;;  %v968_v26 = vadd.f32 %v3500_v53, %v3489_v43 }
 0x160   :  { %v1458_v46 = vadd.f32 %v1457_v11, %v3531_v37  ;;  %v3537_v15 = vadd.f32 %v1219_v45, %v931_v34  ;;  %v971_v11 = vadd.f32 %v3500_v53, %v3493_v47 }
 0x162   :  { %v1459_v49 = vadd.f32 %v1458_v46, %v3537_v15  ;;  %v963_v46 = vadd.f32 %v3500_v53, %v3485_v39  ;;  %v976_v39 = vadd.f32 %v3500_v53, %v3505_v58 }
 0x164   :  { %v1460_v54 = vadd.f32 %v1459_v49, %v3527_v29  ;;  %v991_v57 = vpop.f32.mrb[40].mxu0  ;;  %v2769_v61 = vpop.f32.mrb[40].mxu1 }
 0x165   :  { %v3547_v2 = vadd.f32 %v2769_v61, %v952_v50  ;;  %v993_v5 = vpop.f32.mrb[41].mxu0  ;;  %v1232_v6 = vpop.f32.mrb[41].mxu1 }
 0x166   :  { %v3551_v51 = vadd.f32 %v1232_v6, %v944_v7  ;;  %v1461_v27 = vadd.f32 %v1460_v54, %v3534_v3  ;;  %v994_v14 = vpop.f32.mrb[42].mxu0  ;;  %v2770_v19 = vpop.f32.mrb[42].mxu1  ;;  %v984_v6 = vadd.f32 %v3500_v53, %v983_v22 }
 0x167   :  { %v3554_v63 = vadd.f32 %v2770_v19, %v955_v62  ;;  %v996_v18 = vpop.f32.mrb[43].mxu0  ;;  %v1235_v21 = vpop.f32.mrb[43].mxu1 }
 0x168   :  { %v1462_v55 = vadd.f32 %v1461_v27, %v3551_v51  ;;  %v3557_v31 = vadd.f32 %v1235_v21, %v947_v59  ;;  %v987_v18 = vadd.f32 %v3500_v53, %v986_v38 }
 0x16a   :  { %v1463_v25 = vadd.f32 %v1462_v55, %v3557_v31 }
 0x16c   :  { %v1464_v30 = vadd.f32 %v1463_v25, %v3547_v2  ;;  %v999_v33 = vpop.f32.mrb[44].mxu0  ;;  %v2773_v34 = vpop.f32.mrb[44].mxu1 }
 0x16d   :  { %v3567_v41 = vadd.f32 %v2773_v34, %v968_v26  ;;  %v1001_v42 = vpop.f32.mrb[45].mxu0  ;;  %v1248_v45 = vpop.f32.mrb[45].mxu1  ;;  %v979_v26 = vadd.f32 %v3500_v53, %v3514_v10  ;;  %v992_v10 = vadd.f32 %v3500_v53, %v991_v57 }
 0x16e   :  { %v3571_v49 = vadd.f32 %v1248_v45, %v960_v23  ;;  %v1465_v43 = vadd.f32 %v1464_v30, %v3554_v63  ;;  %v1002_v50 = vpop.f32.mrb[46].mxu0  ;;  %v2774_v35 = vpop.f32.mrb[46].mxu1 }
 0x16f   :  { %v3574_v7 = vadd.f32 %v2774_v35, %v971_v11  ;;  %v1004_v54 = vpop.f32.mrb[47].mxu0  ;;  %v1251_v61 = vpop.f32.mrb[47].mxu1 }
 0x170   :  { %v1466_v62 = vadd.f32 %v1465_v43, %v3571_v49  ;;  %v3577_v47 = vadd.f32 %v1251_v61, %v963_v46  ;;  %v1000_v43 = vadd.f32 %v3500_v53, %v999_v33 }
 0x172   :  { %v1467_v5 = vadd.f32 %v1466_v62, %v3577_v47  ;;  %v1003_v62 = vadd.f32 %v3500_v53, %v1002_v50 }
 0x174   :  { %v1468_v59 = vadd.f32 %v1467_v5, %v3567_v41  ;;  %v1007_v27 = vpop.f32.mrb[48].mxu0  ;;  %v2777_v19 = vpop.f32.mrb[48].mxu1 }
 0x175   :  { %v3585_v21 = vadd.f32 %v2777_v19, %v984_v6  ;;  %v1009_v55 = vpop.f32.mrb[49].mxu0  ;;  %v1264_v25 = vpop.f32.mrb[49].mxu1 }
 0x176   :  { %v3589_v23 = vadd.f32 %v1264_v25, %v976_v39  ;;  %v1469_v22 = vadd.f32 %v1468_v59, %v3574_v7  ;;  %v1010_v30 = vpop.f32.mrb[50].mxu0  ;;  %v2778_v34 = vpop.f32.mrb[50].mxu1  ;;  %v995_v59 = vadd.f32 %v3500_v53, %v994_v14  ;;  %v1008_v14 = vadd.f32 %v3500_v53, %v1007_v27 }
 0x177   :  { %v3592_v58 = vadd.f32 %v2778_v34, %v987_v18  ;;  %v1012_v11 = vpop.f32.mrb[51].mxu0  ;;  %v1267_v42 = vpop.f32.mrb[51].mxu1 }
 0x178   :  { %v1470_v45 = vadd.f32 %v1469_v22, %v3589_v23  ;;  %v3595_v38 = vadd.f32 %v1267_v42, %v979_v26 }
 0x17a   :  { %v1471_v46 = vadd.f32 %v1470_v45, %v3595_v38 }
 0x17c   :  { %v1472_v35 = vadd.f32 %v1471_v46, %v3585_v21  ;;  %v1015_v54 = vpop.f32.mrb[52].mxu0  ;;  %v2781_v61 = vpop.f32.mrb[52].mxu1 }
 0x17d   :  { %v3602_v5 = vadd.f32 %v2781_v61, %v1000_v43  ;;  %v1017_v6 = vpop.f32.mrb[53].mxu0  ;;  %v1280_v39 = vpop.f32.mrb[53].mxu1  ;;  %v1016_v11 = vadd.f32 %v3500_v53, %v1015_v54 }
 0x17e   :  { %v3605_v19 = vadd.f32 %v1280_v39, %v992_v10  ;;  %v1473_v18 = vadd.f32 %v1472_v35, %v3592_v58  ;;  %v1018_v55 = vpop.f32.mrb[54].mxu0  ;;  %v2782_v33 = vpop.f32.mrb[54].mxu1 }
 0x17f   :  { %4909 = vst [vmem:[#allocation2_spill] sm:$0xff] %v3602_v5  ;;  %v3608_v25 = vadd.f32 %v2782_v33, %v1003_v62  ;;  %v1020_v57 = vpop.f32.mrb[55].mxu0  ;;  %v1283_v26 = vpop.f32.mrb[55].mxu1  ;;  %v1019_v43 = vadd.f32 %v3500_v53, %v1018_v55  ;;  %v1011_v62 = vadd.f32 %v3500_v53, %v1010_v30 }
 0x180   :  { %4910 = vst [vmem:[#allocation3_spill] sm:$0xff] %v3605_v19  ;;  %v1474_v22 = vadd.f32 %v1473_v18, %v3605_v19  ;;  %v3611_v34 = vadd.f32 %v1283_v26, %v995_v59 }
 0x181   :  { %4911 = vst [vmem:[#allocation4_spill] sm:$0xff] %v3608_v25 }
 0x182   :  { %4912 = vst [vmem:[#allocation5_spill] sm:$0xff] %v3611_v34  ;;  %v1475_v50 = vadd.f32 %v1474_v22, %v3611_v34 }
 0x184   :  { %v1476_v42 = vadd.f32 %v1475_v50, %v3602_v5  ;;  %v1023_v45 = vpop.f32.mrb[56].mxu0  ;;  %v2785_v46 = vpop.f32.mrb[56].mxu1 }
 0x185   :  { %v3618_v10 = vadd.f32 %v2785_v46, %v1016_v11  ;;  %v1025_v35 = vpop.f32.mrb[57].mxu0  ;;  %v1296_v61 = vpop.f32.mrb[57].mxu1  ;;  %v1024_v22 = vadd.f32 %v3500_v53, %v1023_v45 }
 0x186   :  { %v3621_v6 = vadd.f32 %v1296_v61, %v1008_v14  ;;  %v1477_v39 = vadd.f32 %v1476_v42, %v3608_v25  ;;  %v1026_v59 = vpop.f32.mrb[58].mxu0  ;;  %v2786_v54 = vpop.f32.mrb[58].mxu1 }
 0x187   :  { %4913 = vst [vmem:[#allocation6_spill] sm:$0xff] %v3618_v10  ;;  %v3624_v18 = vadd.f32 %v2786_v54, %v1019_v43  ;;  %v1028_v27 = vpop.f32.mrb[59].mxu0  ;;  %v1299_v33 = vpop.f32.mrb[59].mxu1  ;;  %v1027_v46 = vadd.f32 %v3500_v53, %v1026_v59 }
 0x188   :  { %4914 = vst [vmem:[#allocation7_spill] sm:$0xff] %v3621_v6  ;;  %v1478_v57 = vadd.f32 %v1477_v39, %v3621_v6  ;;  %v3627_v26 = vadd.f32 %v1299_v33, %v1011_v62 }
 0x189   :  { %4915 = vst [vmem:[#allocation8_spill] sm:$0xff] %v3624_v18 }
 0x18a   :  { %4916 = vst [vmem:[#allocation9_spill] sm:$0xff] %v3627_v26  ;;  %v1479_v55 = vadd.f32 %v1478_v57, %v3627_v26 }
 0x18c   :  { %v1031_v50 = vpop.f32.mrb[60].mxu0  ;;  %v2789_v30 = vpop.f32.mrb[60].mxu1  ;;  %v1480_v39 = vadd.f32 %v1479_v55, %v3618_v10 }
 0x18d   :  { %v1032_v11 = vadd.f32 %v3500_v53, %v1031_v50  ;;  %v1033_v14 = vpop.f32.mrb[61].mxu0  ;;  %v1312_v42 = vpop.f32.mrb[61].mxu1 }
 0x18e   :  { %v3633_v43 = vadd.f32 %v1312_v42, %v1024_v22  ;;  %v1034_v35 = vpop.f32.mrb[62].mxu0  ;;  %v2790_v61 = vpop.f32.mrb[62].mxu1  ;;  %v1481_v50 = vadd.f32 %v1480_v39, %v3624_v18 }
 0x18f   :  { %v3636_v62 = vadd.f32 %v2789_v30, %v1032_v11  ;;  %v1035_v54 = vadd.f32 %v3500_v53, %v1034_v35  ;;  %v1036_v27 = vpop.f32.mrb[63].mxu0  ;;  %v1315_v45 = vpop.f32.mrb[63].mxu1 }
 0x190   :  { %4917 = vst [vmem:[#allocation10_spill] sm:$0xff] %v3633_v43  ;;  %v3639_v33 = vadd.f32 %v1315_v45, %v1027_v46  ;;  %v1482_v30 = vadd.f32 %v1481_v50, %v3633_v43 }
 0x191   :  { %4918 = vst [vmem:[#allocation11_spill] sm:$0xff] %v3636_v62  ;;  %v3641_v57 = vadd.f32 %v2790_v61, %v1035_v54 }
 0x192   :  { %4919 = vst [vmem:[#allocation12_spill] sm:$0xff] %v3639_v33  ;;  %v1483_v39 = vadd.f32 %v1482_v30, %v3639_v33 }
 0x193   :  { %4920 = vst [vmem:[#allocation13_spill] sm:$0xff] %v3641_v57 }
 0x194   :  { %v1039_v14 = vpop.f32.mrb[64].mxu0  ;;  %v2793_v59 = vpop.f32.mrb[64].mxu1  ;;  %v1484_v50 = vadd.f32 %v1483_v39, %v3636_v62 }
 0x195   :  { %v1040_v22 = vadd.f32 %v3500_v53, %v1039_v14  ;;  %v1041_v42 = vpop.f32.mrb[65].mxu0  ;;  %v1328_v26 = vpop.f32.mrb[65].mxu1 }
 0x196   :  { %v1042_v6 = vpop.f32.mrb[66].mxu0  ;;  %v2794_v55 = vpop.f32.mrb[66].mxu1  ;;  %v1485_v30 = vadd.f32 %v1484_v50, %v3641_v57 }
 0x197   :  { %v1043_v11 = vadd.f32 %v3500_v53, %v1042_v6  ;;  %v3647_v35 = vadd.f32 %v1328_v26, %v1040_v22  ;;  %v1044_v46 = vpop.f32.mrb[67].mxu0  ;;  %v1331_v27 = vpop.f32.mrb[67].mxu1 }
 0x199   :  { %4921 = vst [vmem:[#allocation14_spill] sm:$0xff] %v3647_v35  ;;  %v3649_v61 = vadd.f32 %v1331_v27, %v1043_v11 }
 0x19b   :  { %4922 = vst [vmem:[#allocation15_spill] sm:$0xff] %v3649_v61 }
 0x19c   :  { %v1047_v54 = vpop.f32.mrb[68].mxu0  ;;  %v2797_v45 = vpop.f32.mrb[68].mxu1 }
 0x19d   :  { %v1048_v14 = vadd.f32 %v3500_v53, %v1047_v54  ;;  %v1049_v42 = vpop.f32.mrb[69].mxu0  ;;  %v1344_v18 = vpop.f32.mrb[69].mxu1 }
 0x19e   :  { %v1050_v10 = vpop.f32.mrb[70].mxu0  ;;  %v2798_v25 = vpop.f32.mrb[70].mxu1 }
 0x19f   :  { %v3654_v43 = vadd.f32 %v2793_v59, %v1048_v14  ;;  %v1051_v6 = vadd.f32 %v3500_v53, %v1050_v10  ;;  %v1052_v26 = vpop.f32.mrb[71].mxu0  ;;  %v1347_v22 = vpop.f32.mrb[71].mxu1  ;;  %v1486_v59 = vadd.f32 %v1485_v30, %v3647_v35 }
 0x1a1   :  { %4923 = vst [vmem:[#allocation16_spill] sm:$0xff] %v3654_v43  ;;  %v3657_v11 = vadd.f32 %v2794_v55, %v1051_v6  ;;  %v1487_v50 = vadd.f32 %v1486_v59, %v3649_v61 }
 0x1a3   :  { %4924 = vst [vmem:[#allocation17_spill] sm:$0xff] %v3657_v11 }
 0x1a4   :  { %v1055_v46 = vpop.f32.mrb[72].mxu0  ;;  %v3660_v27 = vpop.f32.mrb[72].mxu1 }
 0x1a5   :  { %v1056_v54 = vadd.f32 %v3500_v53, %v1055_v46  ;;  %v1057_v42 = vpop.f32.mrb[73].mxu0  ;;  %v1360_v33 = vpop.f32.mrb[73].mxu1  ;;  %v1488_v46 = vadd.f32 %v1487_v50, %v3654_v43  ;;  %v1112_v50 = vadd.f32 %v3500_v53, %v3449_v60 }
 0x1a6   :  { %v1058_v5 = vpop.f32.mrb[74].mxu0  ;;  %v3663_v34 = vpop.f32.mrb[74].mxu1 }
 0x1a7   :  { %v1059_v10 = vadd.f32 %v3500_v53, %v1058_v5  ;;  %v3667_v39 = vadd.f32 %v1344_v18, %v1056_v54  ;;  %v1060_v55 = vpop.f32.mrb[75].mxu0  ;;  %v1363_v14 = vpop.f32.mrb[75].mxu1  ;;  %v1489_v59 = vadd.f32 %v1488_v46, %v3657_v11 }
 0x1a9   :  { %4925 = vst [vmem:[#allocation18_spill] sm:$0xff] %v3667_v39  ;;  %v3669_v6 = vadd.f32 %v1347_v22, %v1059_v10 }
 0x1ac   :  { %v1063_v26 = vpop.f32.mrb[76].mxu0  ;;  %v3672_v57 = vpop.f32.mrb[76].mxu1 }
 0x1ad   :  { %v1064_v42 = vadd.f32 %v3500_v53, %v1063_v26  ;;  %v1065_v62 = vpop.f32.mrb[77].mxu0  ;;  %v3676_v19 = vpop.f32.mrb[77].mxu1  ;;  %v1104_v26 = vadd.f32 %v3500_v53, %v3443_v52 }
 0x1ae   :  { %v1066_v30 = vpop.f32.mrb[78].mxu0  ;;  %v3678_v5 = vpop.f32.mrb[78].mxu1  ;;  %v1490_v62 = vadd.f32 %v1489_v59, %v3667_v39 }
 0x1af   :  { %v3680_v18 = vadd.f32 %v2797_v45, %v1064_v42  ;;  %v1067_v22 = vadd.f32 %v3500_v53, %v1066_v30  ;;  %v1068_v54 = vpop.f32.mrb[79].mxu0  ;;  %v3683_v10 = vpop.f32.mrb[79].mxu1  ;;  %v1115_v42 = vadd.f32 %v3500_v53, %v3451_v0 }
 0x1b0   :  { %v1491_v52 = vadd.f32 %v1490_v62, %v3669_v6  ;;  %v1120_v62 = vadd.f32 %v3500_v53, %v3455_v4 }
 0x1b1   :  { %v3686_v55 = vadd.f32 %v2798_v25, %v1067_v22  ;;  %v1107_v22 = vadd.f32 %v3500_v53, %v3447_v56  ;;  %v1128_v56 = vadd.f32 %v3500_v53, %v3461_v12 }
 0x1b4   :  { %v1071_v43 = vpop.f32.mrb[80].mxu0  ;;  %v2809_v45 = vpop.f32.mrb[80].mxu1 }
 0x1b5   :  { %v1072_v30 = vadd.f32 %v3500_v53, %v1071_v43  ;;  %v3696_v54 = vadd.f32 %v2809_v45, %v1112_v50  ;;  %v1073_v46 = vpop.f32.mrb[81].mxu0  ;;  %v1392_v25 = vpop.f32.mrb[81].mxu1 }
 0x1b6   :  { %v3700_v60 = vadd.f32 %v1392_v25, %v1104_v26  ;;  %v1074_v59 = vpop.f32.mrb[82].mxu0  ;;  %v2810_v39 = vpop.f32.mrb[82].mxu1  ;;  %v1492_v46 = vadd.f32 %v1491_v52, %v3680_v18 }
 0x1b7   :  { %v3703_v11 = vadd.f32 %v1360_v33, %v1072_v30  ;;  %v1075_v61 = vadd.f32 %v3500_v53, %v1074_v59  ;;  %v3706_v0 = vadd.f32 %v2810_v39, %v1115_v42  ;;  %v1076_v43 = vpop.f32.mrb[83].mxu0  ;;  %v1395_v50 = vpop.f32.mrb[83].mxu1  ;;  %v1131_v39 = vadd.f32 %v3500_v53, %v3463_v16 }
 0x1b8   :  { %v3708_v45 = vadd.f32 %v1395_v50, %v1107_v22  ;;  %v1493_v42 = vadd.f32 %v1492_v46, %v3686_v55 }
 0x1b9   :  { %v3711_v35 = vadd.f32 %v1363_v14, %v1075_v61  ;;  %v1123_v14 = vadd.f32 %v3500_v53, %v3459_v8  ;;  %v1144_v8 = vadd.f32 %v3500_v53, %v3475_v28  ;;  %v1139_v28 = vadd.f32 %v3500_v53, %v3471_v24 }
 0x1ba   :  { %v1494_v52 = vadd.f32 %v1493_v42, %v3703_v11  ;;  %v1160_v24 = vadd.f32 %v3500_v53, %v3491_v44 }
 0x1bc   :  { %v1079_v33 = vpop.f32.mrb[84].mxu0  ;;  %v2813_v26 = vpop.f32.mrb[84].mxu1 }
 0x1bd   :  { %v1080_v30 = vadd.f32 %v3500_v53, %v1079_v33  ;;  %v3721_v25 = vadd.f32 %v2813_v26, %v1128_v56  ;;  %v1081_v22 = vpop.f32.mrb[85].mxu0  ;;  %v1408_v61 = vpop.f32.mrb[85].mxu1 }
 0x1be   :  { %v3725_v12 = vadd.f32 %v1408_v61, %v1120_v62  ;;  %v1082_v59 = vpop.f32.mrb[86].mxu0  ;;  %v2814_v4 = vpop.f32.mrb[86].mxu1  ;;  %v1495_v62 = vadd.f32 %v1494_v52, %v3711_v35 }
 0x1bf   :  { %v3729_v43 = vadd.f32 %v3660_v27, %v1080_v30  ;;  %v1083_v16 = vadd.f32 %v3500_v53, %v1082_v59  ;;  %v3732_v50 = vadd.f32 %v2814_v4, %v1131_v39  ;;  %v1084_v46 = vpop.f32.mrb[87].mxu0  ;;  %v1411_v56 = vpop.f32.mrb[87].mxu1  ;;  %v1136_v27 = vadd.f32 %v3500_v53, %v3467_v20 }
 0x1c0   :  { %v3734_v33 = vadd.f32 %v1411_v56, %v1123_v14  ;;  %v1147_v39 = vadd.f32 %v3500_v53, %v3479_v32 }
 0x1c1   :  { %v3737_v26 = vadd.f32 %v3663_v34, %v1083_v16  ;;  %v1496_v22 = vadd.f32 %v1495_v62, %v3729_v43 }
 0x1c3   :  { %4926 = vst [vmem:[#allocation19_spill] sm:$0xff] %v3737_v26 }
 0x1c4   :  { %v1087_v42 = vpop.f32.mrb[88].mxu0  ;;  %v2817_v30 = vpop.f32.mrb[88].mxu1 }
 0x1c5   :  { %v1088_v61 = vadd.f32 %v3500_v53, %v1087_v42  ;;  %v3748_v14 = vadd.f32 %v2817_v30, %v1144_v8  ;;  %v1089_v34 = vpop.f32.mrb[89].mxu0  ;;  %v1424_v59 = vpop.f32.mrb[89].mxu1  ;;  %v1497_v42 = vadd.f32 %v1496_v22, %v3737_v26 }
 0x1c6   :  { %v3752_v4 = vadd.f32 %v1424_v59, %v1136_v27  ;;  %v1090_v52 = vpop.f32.mrb[90].mxu0  ;;  %v2818_v20 = vpop.f32.mrb[90].mxu1 }
 0x1c7   :  { %v3755_v16 = vadd.f32 %v3676_v19, %v1088_v61  ;;  %v1091_v32 = vadd.f32 %v3500_v53, %v1090_v52  ;;  %v3758_v46 = vadd.f32 %v2818_v20, %v1147_v39  ;;  %v1092_v56 = vpop.f32.mrb[91].mxu0  ;;  %v1427_v62 = vpop.f32.mrb[91].mxu1  ;;  %v1152_v19 = vadd.f32 %v3500_v53, %v3483_v36 }
 0x1c8   :  { %v1428_v8 = vadd.f32 %v1427_v62, %v1139_v28  ;;  %v1163_v39 = vadd.f32 %v3500_v53, %v3495_v48 }
 0x1c9   :  { %4927 = vst [vmem:[#allocation20_spill] sm:$0xff] %v3755_v16  ;;  %v3762_v30 = vadd.f32 %v3683_v10, %v1091_v32  ;;  %v1498_v27 = vadd.f32 %v1497_v42, %v3755_v16  ;;  %v1155_v10 = vadd.f32 %v3500_v53, %v3487_v40 }
 0x1cb   :  { %v1499_v56 = vadd.f32 %v1498_v27, %v3762_v30 }
 0x1cc   :  { %v1095_v61 = vpop.f32.mrb[92].mxu0  ;;  %v2821_v34 = vpop.f32.mrb[92].mxu1 }
 0x1cd   :  { %v1096_v59 = vadd.f32 %v3500_v53, %v1095_v61  ;;  %v1449_v28 = vadd.f32 %v2821_v34, %v1160_v24  ;;  %v1097_v22 = vpop.f32.mrb[93].mxu0  ;;  %v1440_v52 = vpop.f32.mrb[93].mxu1 }
 0x1ce   :  { %v1441_v20 = vadd.f32 %v1440_v52, %v1152_v19  ;;  %v1098_v44 = vpop.f32.mrb[94].mxu0  ;;  %v2822_v32 = vpop.f32.mrb[94].mxu1 }
 0x1cf   :  { %v1385_v36 = vadd.f32 %v3672_v57, %v1096_v59  ;;  %v1099_v62 = vadd.f32 %v3500_v53, %v1098_v44  ;;  %v1452_v42 = vadd.f32 %v2822_v32, %v1163_v39  ;;  %v1100_v16 = vpop.f32.mrb[95].mxu0  ;;  %v1443_v48 = vpop.f32.mrb[95].mxu1 }
 0x1d0   :  { %v1444_v26 = vadd.f32 %v1443_v48, %v1155_v10 }
 0x1d1   :  { %v1500_v61 = vadd.f32 %v1499_v56, %v1385_v36  ;;  %v1388_v24 = vadd.f32 %v3678_v5, %v1099_v62 }
 0x1d3   :  { %v1501_v34 = vadd.f32 %v1500_v61, %v1388_v24 }
 0x1d5   :  { %v1502_v22 = vadd.f32 %v1501_v34, %v3700_v60 }
 0x1d7   :  { %v1503_v40 = vadd.f32 %v1502_v22, %v3708_v45 }
 0x1d9   :  { %v1504_v19 = vadd.f32 %v1503_v40, %v3696_v54 }
 0x1db   :  { %v1505_v27 = vadd.f32 %v1504_v19, %v3706_v0 }
 0x1dd   :  { %v1506_v57 = vadd.f32 %v1505_v27, %v3725_v12 }
 0x1df   :  { %v1507_v53 = vadd.f32 %v1506_v57, %v3734_v33 }
 0x1e1   :  { %v1508_v16 = vadd.f32 %v1507_v53, %v3721_v25 }
 0x1e3   :  { %v1509_v39 = vadd.f32 %v1508_v16, %v3732_v50 }
 0x1e5   :  { %v1510_v59 = vadd.f32 %v1509_v39, %v3752_v4 }
 0x1e7   :  { %v1511_v5 = vadd.f32 %v1510_v59, %v1428_v8 }
 0x1e9   :  { %v1512_v52 = vadd.f32 %v1511_v5, %v3748_v14 }
 0x1eb   :  { %v1513_v10 = vadd.f32 %v1512_v52, %v3758_v46 }
 0x1ed   :  { %v1514_v44 = vadd.f32 %v1513_v10, %v1441_v20 }
 0x1ef   :  { %v1515_v32 = vadd.f32 %v1514_v44, %v1444_v26 }
 0x1f1   :  { %v1516_v56 = vadd.f32 %v1515_v32, %v1449_v28 }
 0x1f3   :  { %v1517_v62 = vadd.f32 %v1516_v56, %v1452_v42 }
 0x1f5   :  { %v1518_v48 = vrot.slane %v1517_v62, 4 }
 0x1f7   :  { %v1519_v61 = vadd.f32 %v1518_v48, %v1517_v62 }
 0x1f9   :  { %v1520_v34 = vrot.slane %v1519_v61, 2 }
 0x1fb   :  { %v1521_v22 = vadd.f32 %v1520_v34, %v1519_v61 }
 0x1fd   :  { %v1522_v40 = vrot.slane %v1521_v22, 1 }
 0x1ff   :  { %v1523_v19 = vadd.f32 %v1522_v40, %v1521_v22 }
 0x201   :  { %v3789_v27 = vmul.f32 0.001953125, %v1523_v19 }
 0x203   :  { %v3792_v57 = vsub.f32 %v1385_v36, %v3789_v27  ;;  %v3795_v53 = vsub.f32 %v1388_v24, %v3789_v27  ;;  %v3799_v16 = vsub.f32 %v3700_v60, %v3789_v27  ;;  %v3803_v39 = vsub.f32 %v3708_v45, %v3789_v27 }
 0x204   :  { %v3807_v59 = vsub.f32 %v3696_v54, %v3789_v27  ;;  %v3811_v5 = vsub.f32 %v3706_v0, %v3789_v27  ;;  %v3815_v36 = vsub.f32 %v3725_v12, %v3789_v27  ;;  %v3819_v60 = vsub.f32 %v3734_v33, %v3789_v27 }
 0x205   :  { %v3823_v45 = vsub.f32 %v3721_v25, %v3789_v27  ;;  %v3827_v54 = vsub.f32 %v3732_v50, %v3789_v27  ;;  %v3831_v0 = vsub.f32 %v3752_v4, %v3789_v27  ;;  %v3834_v24 = vsub.f32 %v1428_v8, %v3789_v27 }
 0x206   :  { %v3838_v12 = vsub.f32 %v3748_v14, %v3789_v27  ;;  %v3842_v33 = vsub.f32 %v3758_v46, %v3789_v27  ;;  %v3845_v25 = vsub.f32 %v1441_v20, %v3789_v27  ;;  %v3848_v50 = vsub.f32 %v1444_v26, %v3789_v27 }
 0x207   :  { %4928 = vst [vmem:[#allocation21_spill] sm:$0xff] %v3834_v24  ;;  %v3851_v4 = vsub.f32 %v1449_v28, %v3789_v27  ;;  %v3854_v8 = vsub.f32 %v1452_v42, %v3789_v27  ;;  %v3858_v14 = vsub.f32 %v3512_v9, %v3789_v27  ;;  %v3862_v46 = vsub.f32 %v3518_v17, %v3789_v27 }
 0x208   :  { %4929 = vst [vmem:[#allocation22_spill] sm:$0xff] %v3838_v12  ;;  %4930 = vst [vmem:[#allocation23_spill] sm:$0xff] %v3842_v33  ;;  %v3866_v20 = vsub.f32 %v3508_v1, %v3789_v27  ;;  %v3874_v42 = vsub.f32 %v3516_v13, %v3789_v27  ;;  %v3878_v9 = vsub.f32 %v3531_v37, %v3789_v27 }
 0x209   :  { %4931 = vst [vmem:[#allocation24_spill] sm:$0xff] %v3845_v25  ;;  %4932 = vst [vmem:[#allocation25_spill] sm:$0xff] %v3848_v50  ;;  %v1589_v26 = vmul.f32 %v3858_v14, %v3858_v14  ;;  %v1590_v28 = vmul.f32 %v3862_v46, %v3862_v46  ;;  %v3884_v1 = vsub.f32 %v3537_v15, %v3789_v27 }
 0x20a   :  { %4933 = vst [vmem:[#allocation26_spill] sm:$0xff] %v3854_v8  ;;  %v1591_v17 = vmul.f32 %v3866_v20, %v3866_v20  ;;  %v1592_v10 = vmul.f32 %v3874_v42, %v3874_v42  ;;  %v3890_v13 = vsub.f32 %v3527_v29, %v3789_v27  ;;  %v1593_v37 = vmul.f32 %v3878_v9, %v3878_v9 }
 0x20b   :  { %v1653_v52 = vadd.f32 %v1590_v28, %v1589_v26  ;;  %v3896_v56 = vsub.f32 %v3534_v3, %v3789_v27  ;;  %v1594_v15 = vmul.f32 %v3884_v1, %v3884_v1  ;;  %v3902_v48 = vsub.f32 %v3551_v51, %v3789_v27 }
 0x20c   :  { %v1595_v29 = vmul.f32 %v3890_v13, %v3890_v13  ;;  %v3908_v34 = vsub.f32 %v3557_v31, %v3789_v27  ;;  %v3914_v40 = vsub.f32 %v3547_v2, %v3789_v27  ;;  %v3920_v26 = vsub.f32 %v3554_v63, %v3789_v27 }
 0x20d   :  { %v1654_v44 = vadd.f32 %v1653_v52, %v1591_v17  ;;  %v1596_v3 = vmul.f32 %v3896_v56, %v3896_v56  ;;  %v1597_v51 = vmul.f32 %v3902_v48, %v3902_v48  ;;  %v3926_v17 = vsub.f32 %v3571_v49, %v3789_v27 }
 0x20e   :  { %v1598_v31 = vmul.f32 %v3908_v34, %v3908_v34  ;;  %v1599_v2 = vmul.f32 %v3914_v40, %v3914_v40  ;;  %v1600_v63 = vmul.f32 %v3920_v26, %v3920_v26 }
 0x20f   :  { %v1655_v32 = vadd.f32 %v1654_v44, %v1592_v10  ;;  %v3932_v10 = vsub.f32 %v3577_v47, %v3789_v27  ;;  %v1601_v49 = vmul.f32 %v3926_v17, %v3926_v17 }
 0x211   :  { %v1656_v62 = vadd.f32 %v1655_v32, %v1593_v37  ;;  %v3938_v37 = vsub.f32 %v3567_v41, %v3789_v27  ;;  %v1602_v47 = vmul.f32 %v3932_v10, %v3932_v10 }
 0x213   :  { %v1657_v61 = vadd.f32 %v1656_v62, %v1594_v15  ;;  %v3944_v15 = vsub.f32 %v3574_v7, %v3789_v27  ;;  %v1603_v41 = vmul.f32 %v3938_v37, %v3938_v37 }
 0x215   :  { %v1658_v22 = vadd.f32 %v1657_v61, %v1595_v29  ;;  %v3950_v29 = vsub.f32 %v3589_v23, %v3789_v27  ;;  %v1604_v7 = vmul.f32 %v3944_v15, %v3944_v15 }
 0x217   :  { %v1659_v19 = vadd.f32 %v1658_v22, %v1596_v3  ;;  %v3956_v3 = vsub.f32 %v3595_v38, %v3789_v27  ;;  %v1605_v23 = vmul.f32 %v3950_v29, %v3950_v29 }
 0x219   :  { %v1660_v28 = vadd.f32 %v1659_v19, %v1597_v51  ;;  %v3962_v51 = vsub.f32 %v3585_v21, %v3789_v27  ;;  %v1606_v38 = vmul.f32 %v3956_v3, %v3956_v3 }
 0x21b   :  { %v1661_v52 = vadd.f32 %v1660_v28, %v1598_v31  ;;  %v3968_v31 = vsub.f32 %v3592_v58, %v3789_v27  ;;  %v1607_v21 = vmul.f32 %v3962_v51, %v3962_v51 }
 0x21d   :  { %v1662_v44 = vadd.f32 %v1661_v52, %v1599_v2  ;;  %v4934_v2 = vld [vmem:[#allocation3_spill] sm:$0xff]  ;;  %v1608_v58 = vmul.f32 %v3968_v31, %v3968_v31 }
 0x21e   :  { %v3974_v52 = vsub.f32 %v4934_v2, %v3789_v27 }
 0x21f   :  { %v1663_v32 = vadd.f32 %v1662_v44, %v1600_v63  ;;  %v4935_v44 = vld [vmem:[#allocation5_spill] sm:$0xff] }
 0x221   :  { %v1664_v62 = vadd.f32 %v1663_v32, %v1601_v49  ;;  %v3980_v49 = vsub.f32 %v4935_v44, %v3789_v27 }
 0x223   :  { %v1665_v61 = vadd.f32 %v1664_v62, %v1602_v47  ;;  %v4936_v47 = vld [vmem:[#allocation2_spill] sm:$0xff] }
 0x224   :  { %v3986_v62 = vsub.f32 %v4936_v47, %v3789_v27  ;;  %v4944_v47 = vld [vmem:[#allocation6_spill] sm:$0xff] }
 0x225   :  { %v1666_v22 = vadd.f32 %v1665_v61, %v1603_v41  ;;  %v1609_v41 = vmul.f32 %v3974_v52, %v3974_v52 }
 0x226   :  { %4937 = vst [vmem:[#allocation3_spill] sm:$0xff] %v3986_v62  ;;  %v1611_v2 = vmul.f32 %v3986_v62, %v3986_v62 }
 0x227   :  { %v1667_v19 = vadd.f32 %v1666_v22, %v1604_v7  ;;  %v4938_v7 = vld [vmem:[#allocation4_spill] sm:$0xff] }
 0x228   :  { %v3992_v22 = vsub.f32 %v4938_v7, %v3789_v27  ;;  %v4010_v7 = vsub.f32 %v4944_v47, %v3789_v27  ;;  %v4950_v47 = vld [vmem:[#allocation12_spill] sm:$0xff] }
 0x229   :  { %v1668_v28 = vadd.f32 %v1667_v19, %v1605_v23  ;;  %v1610_v23 = vmul.f32 %v3980_v49, %v3980_v49 }
 0x22a   :  { %4939 = vst [vmem:[#allocation5_spill] sm:$0xff] %v3992_v22 }
 0x22b   :  { %v1669_v63 = vadd.f32 %v1668_v28, %v1606_v38  ;;  %v4940_v38 = vld [vmem:[#allocation7_spill] sm:$0xff] }
 0x22c   :  { %v3998_v28 = vsub.f32 %v4940_v38, %v3789_v27  ;;  %4945 = vst [vmem:[#allocation7_spill] sm:$0xff] %v4010_v7  ;;  %v4946_v38 = vld [vmem:[#allocation8_spill] sm:$0xff] }
 0x22d   :  { %v1670_v32 = vadd.f32 %v1669_v63, %v1607_v21  ;;  %v4942_v63 = vld [vmem:[#allocation9_spill] sm:$0xff]  ;;  %v4016_v62 = vsub.f32 %v4946_v38, %v3789_v27  ;;  %v4952_v38 = vld [vmem:[#allocation11_spill] sm:$0xff] }
 0x22e   :  { %4941 = vst [vmem:[#allocation2_spill] sm:$0xff] %v3998_v28  ;;  %v4004_v44 = vsub.f32 %v4942_v63, %v3789_v27  ;;  %v4948_v63 = vld [vmem:[#allocation10_spill] sm:$0xff] }
 0x22f   :  { %v1671_v61 = vadd.f32 %v1670_v32, %v1608_v58  ;;  %v1612_v58 = vmul.f32 %v3992_v22, %v3992_v22  ;;  %4947 = vst [vmem:[#allocation9_spill] sm:$0xff] %v4016_v62  ;;  %v4022_v22 = vsub.f32 %v4948_v63, %v3789_v27  ;;  %v4954_v63 = vld [vmem:[#allocation13_spill] sm:$0xff] }
 0x230   :  { %4943 = vst [vmem:[#allocation4_spill] sm:$0xff] %v4004_v44 }
 0x231   :  { %v1672_v19 = vadd.f32 %v1671_v61, %v1609_v41  ;;  %v1613_v41 = vmul.f32 %v3998_v28, %v3998_v28  ;;  %4949 = vst [vmem:[#allocation6_spill] sm:$0xff] %v4022_v22  ;;  %v4028_v28 = vsub.f32 %v4950_v47, %v3789_v27  ;;  %v4956_v47 = vld [vmem:[#allocation14_spill] sm:$0xff] }
 0x233   :  { %v1673_v21 = vadd.f32 %v1672_v19, %v1610_v23  ;;  %v1614_v23 = vmul.f32 %v4004_v44, %v4004_v44  ;;  %4951 = vst [vmem:[#allocation8_spill] sm:$0xff] %v4028_v28  ;;  %v4034_v44 = vsub.f32 %v4952_v38, %v3789_v27  ;;  %v4957_v38 = vld [vmem:[#allocation15_spill] sm:$0xff] }
 0x235   :  { %v1674_v32 = vadd.f32 %v1673_v21, %v1611_v2  ;;  %v1615_v2 = vmul.f32 %v4010_v7, %v4010_v7  ;;  %4953 = vst [vmem:[#allocation10_spill] sm:$0xff] %v4034_v44  ;;  %v4040_v7 = vsub.f32 %v4954_v63, %v3789_v27  ;;  %v4958_v63 = vld [vmem:[#allocation16_spill] sm:$0xff] }
 0x237   :  { %v1675_v61 = vadd.f32 %v1674_v32, %v1612_v58  ;;  %v1616_v58 = vmul.f32 %v4016_v62, %v4016_v62  ;;  %4955 = vst [vmem:[#allocation12_spill] sm:$0xff] %v4040_v7  ;;  %v4046_v62 = vsub.f32 %v4956_v47, %v3789_v27  ;;  %v4959_v47 = vld [vmem:[#allocation17_spill] sm:$0xff] }
 0x239   :  { %v1676_v19 = vadd.f32 %v1675_v61, %v1613_v41  ;;  %v1617_v41 = vmul.f32 %v4022_v22, %v4022_v22  ;;  %v4052_v22 = vsub.f32 %v4957_v38, %v3789_v27  ;;  %v4960_v38 = vld [vmem:[#allocation18_spill] sm:$0xff] }
 0x23b   :  { %v1677_v21 = vadd.f32 %v1676_v19, %v1614_v23  ;;  %v1618_v23 = vmul.f32 %v4028_v28, %v4028_v28  ;;  %v4058_v28 = vsub.f32 %v4958_v63, %v3789_v27  ;;  %v4076_v63 = vsub.f32 %v3669_v6, %v3789_v27 }
 0x23d   :  { %v1678_v32 = vadd.f32 %v1677_v21, %v1615_v2  ;;  %v1619_v2 = vmul.f32 %v4034_v44, %v4034_v44  ;;  %v4064_v44 = vsub.f32 %v4959_v47, %v3789_v27  ;;  %v4082_v47 = vsub.f32 %v3680_v18, %v3789_v27 }
 0x23e   :  { %v1626_v6 = vmul.f32 %v4076_v63, %v4076_v63 }
 0x23f   :  { %v1679_v61 = vadd.f32 %v1678_v32, %v1616_v58  ;;  %v1620_v58 = vmul.f32 %v4040_v7, %v4040_v7  ;;  %v4070_v7 = vsub.f32 %v4960_v38, %v3789_v27  ;;  %4961 = vst [vmem:[#allocation11_spill] sm:$0xff] %v4082_v47  ;;  %v4088_v38 = vsub.f32 %v3686_v55, %v3789_v27 }
 0x240   :  { %v1627_v18 = vmul.f32 %v4082_v47, %v4082_v47 }
 0x241   :  { %v1680_v19 = vadd.f32 %v1679_v61, %v1617_v41  ;;  %v1621_v41 = vmul.f32 %v4046_v62, %v4046_v62  ;;  %4962 = vst [vmem:[#allocation13_spill] sm:$0xff] %v4088_v38  ;;  %v1628_v55 = vmul.f32 %v4088_v38, %v4088_v38 }
 0x243   :  { %v1681_v21 = vadd.f32 %v1680_v19, %v1618_v23  ;;  %v1622_v23 = vmul.f32 %v4052_v22, %v4052_v22 }
 0x245   :  { %v1682_v32 = vadd.f32 %v1681_v21, %v1619_v2  ;;  %v1623_v2 = vmul.f32 %v4058_v28, %v4058_v28 }
 0x247   :  { %v1683_v61 = vadd.f32 %v1682_v32, %v1620_v58  ;;  %v1624_v58 = vmul.f32 %v4064_v44, %v4064_v44 }
 0x249   :  { %v1684_v19 = vadd.f32 %v1683_v61, %v1621_v41  ;;  %v1625_v41 = vmul.f32 %v4070_v7, %v4070_v7 }
 0x24b   :  { %v1685_v21 = vadd.f32 %v1684_v19, %v1622_v23  ;;  %v4094_v19 = vsub.f32 %v3703_v11, %v3789_v27 }
 0x24d   :  { %v1686_v32 = vadd.f32 %v1685_v21, %v1623_v2  ;;  %v4100_v21 = vsub.f32 %v3711_v35, %v3789_v27  ;;  %v1629_v11 = vmul.f32 %v4094_v19, %v4094_v19 }
 0x24f   :  { %v1687_v61 = vadd.f32 %v1686_v32, %v1624_v58  ;;  %v4106_v32 = vsub.f32 %v3729_v43, %v3789_v27  ;;  %v1630_v35 = vmul.f32 %v4100_v21, %v4100_v21 }
 0x251   :  { %v1688_v23 = vadd.f32 %v1687_v61, %v1625_v41  ;;  %4963 = vst [vmem:[#allocation14_spill] sm:$0xff] %v4106_v32  ;;  %v4964_v61 = vld [vmem:[#allocation19_spill] sm:$0xff]  ;;  %v1631_v43 = vmul.f32 %v4106_v32, %v4106_v32  ;;  %v1635_v32 = vmul.f32 %v3792_v57, %v3792_v57 }
 0x252   :  { %v4112_v47 = vsub.f32 %v4964_v61, %v3789_v27 }
 0x253   :  { %v1689_v2 = vadd.f32 %v1688_v23, %v1626_v6  ;;  %v4965_v23 = vld [vmem:[#allocation20_spill] sm:$0xff] }
 0x254   :  { %v4118_v38 = vsub.f32 %v4965_v23, %v3789_v27 }
 0x255   :  { %v1690_v58 = vadd.f32 %v1689_v2, %v1627_v18  ;;  %v4124_v2 = vsub.f32 %v3762_v30, %v3789_v27  ;;  %v1636_v30 = vmul.f32 %v3795_v53, %v3795_v53 }
 0x256   :  { %v1633_v61 = vmul.f32 %v4118_v38, %v4118_v38 }
 0x257   :  { %v1691_v41 = vadd.f32 %v1690_v58, %v1628_v55  ;;  %v1632_v55 = vmul.f32 %v4112_v47, %v4112_v47 }
 0x259   :  { %v1692_v6 = vadd.f32 %v1691_v41, %v1629_v11  ;;  %v1634_v41 = vmul.f32 %v4124_v2, %v4124_v2 }
 0x25b   :  { %v1693_v18 = vadd.f32 %v1692_v6, %v1630_v35  ;;  %v1637_v6 = vmul.f32 %v3799_v16, %v3799_v16 }
 0x25d   :  { %v1694_v58 = vadd.f32 %v1693_v18, %v1631_v43  ;;  %v1638_v18 = vmul.f32 %v3803_v39, %v3803_v39 }
 0x25f   :  { %v1695_v11 = vadd.f32 %v1694_v58, %v1632_v55  ;;  %v1639_v58 = vmul.f32 %v3807_v59, %v3807_v59 }
 0x261   :  { %v1696_v23 = vadd.f32 %v1695_v11, %v1633_v61  ;;  %v1640_v11 = vmul.f32 %v3811_v5, %v3811_v5 }
 0x263   :  { %v1697_v35 = vadd.f32 %v1696_v23, %v1634_v41  ;;  %v1641_v23 = vmul.f32 %v3815_v36, %v3815_v36 }
 0x265   :  { %v1698_v27 = vadd.f32 %v1697_v35, %v1635_v32  ;;  %v1642_v35 = vmul.f32 %v3819_v60, %v3819_v60 }
 0x267   :  { %v1699_v43 = vadd.f32 %v1698_v27, %v1636_v30  ;;  %v1643_v27 = vmul.f32 %v3823_v45, %v3823_v45 }
 0x269   :  { %v1700_v55 = vadd.f32 %v1699_v43, %v1637_v6  ;;  %v1644_v43 = vmul.f32 %v3827_v54, %v3827_v54 }
 0x26b   :  { %v1701_v61 = vadd.f32 %v1700_v55, %v1638_v18  ;;  %v1645_v55 = vmul.f32 %v3831_v0, %v3831_v0 }
 0x26d   :  { %v1702_v41 = vadd.f32 %v1701_v61, %v1639_v58  ;;  %v1646_v61 = vmul.f32 %v3834_v24, %v3834_v24 }
 0x26f   :  { %v1703_v32 = vadd.f32 %v1702_v41, %v1640_v11  ;;  %v1647_v41 = vmul.f32 %v3838_v12, %v3838_v12 }
 0x271   :  { %v1704_v30 = vadd.f32 %v1703_v32, %v1641_v23  ;;  %v1648_v32 = vmul.f32 %v3842_v33, %v3842_v33 }
 0x273   :  { %v1705_v6 = vadd.f32 %v1704_v30, %v1642_v35  ;;  %v1649_v30 = vmul.f32 %v3845_v25, %v3845_v25 }
 0x275   :  { %v1706_v18 = vadd.f32 %v1705_v6, %v1643_v27  ;;  %v1650_v6 = vmul.f32 %v3848_v50, %v3848_v50  ;;  %v1727_v50 = vlaneseq }
 0x277   :  { %v1707_v58 = vadd.f32 %v1706_v18, %v1644_v43  ;;  %v1651_v18 = vmul.f32 %v3851_v4, %v3851_v4 }
 0x279   :  { %v1708_v11 = vadd.f32 %v1707_v58, %v1645_v55  ;;  %v1652_v58 = vmul.f32 %v3854_v8, %v3854_v8 }
 0x27b   :  { %v1709_v23 = vadd.f32 %v1708_v11, %v1646_v61 }
 0x27d   :  { %v1710_v35 = vadd.f32 %v1709_v23, %v1647_v41 }
 0x27f   :  { %v1711_v27 = vadd.f32 %v1710_v35, %v1648_v32 }
 0x281   :  { %v1712_v43 = vadd.f32 %v1711_v27, %v1649_v30  ;;  %v1728_v30 = vshrl.u32 %v1727_v50, 7  ;;  %v1725_v27 = vld [vmem:[%s4863_s3] sm:$0x1] }
 0x283   :  { %v1713_v55 = vadd.f32 %v1712_v43, %v1650_v6  ;;  %v1729_v6 = vsub.s32 0, %v1728_v30  ;;  %v4973_v30 = vld [vmem:[#allocation8_spill] sm:$0xff] }
 0x285   :  { %v1714_v61 = vadd.f32 %v1713_v55, %v1651_v18  ;;  %v4967_v55 = vld [vmem:[#allocation5_spill] sm:$0xff] }
 0x287   :  { %v1715_v11 = vadd.f32 %v1714_v61, %v1652_v58  ;;  %v4968_v58 = vld [vmem:[#allocation2_spill] sm:$0xff]  ;;  %v4969_v61 = vld [vmem:[#allocation4_spill] sm:$0xff] }
 0x289   :  { %v1716_v12 = vrot.slane %v1715_v11, 4 }
 0x28b   :  { %v1717_v33 = vadd.f32 %v1716_v12, %v1715_v11  ;;  %v4970_v11 = vld [vmem:[#allocation7_spill] sm:$0xff] }
 0x28d   :  { %v1718_v41 = vrot.slane %v1717_v33, 2 }
 0x28f   :  { %v1719_v23 = vadd.f32 %v1718_v41, %v1717_v33  ;;  %v4971_v41 = vld [vmem:[#allocation9_spill] sm:$0xff] }
 0x291   :  { %v1720_v24 = vrot.slane %v1719_v23, 1 }
 0x293   :  { %v1721_v25 = vadd.f32 %v1720_v24, %v1719_v23 }
 0x295   :  { %v1722_v32 = vmul.f32 0.001953125, %v1721_v25 }
 0x297   :  { %v1723_v35 = vadd.f32 1e-05, %v1722_v32  ;;  %v4972_v32 = vld [vmem:[#allocation6_spill] sm:$0xff] }
 0x299   :  { %3002 = vrsqrt.f32 %v1723_v35 }
 0x2a3   :  { %v3003_v43 = vpop.eup %3002 }
 0x2a4   :  { %v1726_v8 = vmul.f32 %v3003_v43, %v1725_v27 }
 0x2a6   :  { %v4171_v18 = vrot.slane %v1726_v8, %v1729_v6  ;;  %v4974_v6 = vld [vmem:[#allocation10_spill] sm:$0xff] }
 0x2a8   :  { %v4175_v12 = vmul.f32 %v4171_v18, %v3858_v14  ;;  %v4179_v24 = vmul.f32 %v4171_v18, %v3862_v46  ;;  %v4183_v33 = vmul.f32 %v4171_v18, %v3866_v20  ;;  %v4187_v25 = vmul.f32 %v4171_v18, %v3874_v42 }
 0x2a9   :  { %v4191_v50 = vmul.f32 %v4171_v18, %v3878_v9  ;;  %v4195_v8 = vmul.f32 %v4171_v18, %v3884_v1  ;;  %v4199_v14 = vmul.f32 %v4171_v18, %v3890_v13  ;;  %v4203_v46 = vmul.f32 %v4171_v18, %v3896_v56 }
 0x2aa   :  { %v4207_v20 = vmul.f32 %v4171_v18, %v3902_v48  ;;  %v4211_v42 = vmul.f32 %v4171_v18, %v3908_v34  ;;  %v4215_v9 = vmul.f32 %v4171_v18, %v3914_v40  ;;  %v4219_v1 = vmul.f32 %v4171_v18, %v3920_v26 }
 0x2ab   :  { %v4223_v13 = vmul.f32 %v4171_v18, %v3926_v17  ;;  %v4227_v56 = vmul.f32 %v4171_v18, %v3932_v10  ;;  %v4231_v48 = vmul.f32 %v4171_v18, %v3938_v37  ;;  %v4235_v34 = vmul.f32 %v4171_v18, %v3944_v15 }
 0x2ac   :  { %v4239_v40 = vmul.f32 %v4171_v18, %v3950_v29  ;;  %v4243_v26 = vmul.f32 %v4171_v18, %v3956_v3  ;;  %v4247_v17 = vmul.f32 %v4171_v18, %v3962_v51  ;;  %v4251_v10 = vmul.f32 %v4171_v18, %v3968_v31  ;;  %v4966_v29 = vld [vmem:[#allocation3_spill] sm:$0xff] }
 0x2ad   :  { %v4255_v37 = vmul.f32 %v4171_v18, %v3974_v52  ;;  %v4259_v15 = vmul.f32 %v4171_v18, %v3980_v49  ;;  %v4263_v3 = vmul.f32 %v4171_v18, %v4966_v29  ;;  %v4267_v51 = vmul.f32 %v4171_v18, %v4967_v55  ;;  %v4975_v29 = vld [vmem:[#allocation12_spill] sm:$0xff] }
 0x2ae   :  { %v4271_v31 = vmul.f32 %v4171_v18, %v4968_v58  ;;  %v4275_v52 = vmul.f32 %v4171_v18, %v4969_v61  ;;  %v4279_v49 = vmul.f32 %v4171_v18, %v4970_v11  ;;  %v4283_v23 = vmul.f32 %v4171_v18, %v4971_v41 }
 0x2af   :  { %v4287_v35 = vmul.f32 %v4171_v18, %v4972_v32  ;;  %v4291_v27 = vmul.f32 %v4171_v18, %v4973_v30  ;;  %v4295_v43 = vmul.f32 %v4171_v18, %v4974_v6  ;;  %v4299_v55 = vmul.f32 %v4171_v18, %v4975_v29  ;;  %v4976_v30 = vld [vmem:[#allocation11_spill] sm:$0xff]  ;;  %v4977_v6 = vld [vmem:[#allocation13_spill] sm:$0xff]  ;;  %v4978_v29 = vld [vmem:[#allocation14_spill] sm:$0xff] }
 0x2b0   :  { %v4303_v58 = vmul.f32 %v4171_v18, %v4046_v62  ;;  %v4307_v61 = vmul.f32 %v4171_v18, %v4052_v22  ;;  %v4311_v11 = vmul.f32 %v4171_v18, %v4058_v28  ;;  %v4315_v41 = vmul.f32 %v4171_v18, %v4064_v44 }
 0x2b1   :  { %v4319_v32 = vmul.f32 %v4171_v18, %v4070_v7  ;;  %v4323_v62 = vmul.f32 %v4171_v18, %v4076_v63  ;;  %v4327_v22 = vmul.f32 %v4171_v18, %v4976_v30  ;;  %v4331_v28 = vmul.f32 %v4171_v18, %v4977_v6 }
 0x2b2   :  { %v4335_v44 = vmul.f32 %v4171_v18, %v4094_v19  ;;  %v4339_v7 = vmul.f32 %v4171_v18, %v4100_v21  ;;  %v4343_v63 = vmul.f32 %v4171_v18, %v4978_v29  ;;  %v4347_v30 = vmul.f32 %v4171_v18, %v4112_v47 }
 0x2b3   :  { %v4351_v6 = vmul.f32 %v4171_v18, %v4118_v38  ;;  %v4355_v19 = vmul.f32 %v4171_v18, %v4124_v2  ;;  %v4359_v21 = vmul.f32 %v4171_v18, %v3792_v57  ;;  %v4363_v29 = vmul.f32 %v4171_v18, %v3795_v53 }
 0x2b4   :  { %v4367_v47 = vmul.f32 %v4171_v18, %v3799_v16  ;;  %v4371_v38 = vmul.f32 %v4171_v18, %v3803_v39  ;;  %v4375_v2 = vmul.f32 %v4171_v18, %v3807_v59  ;;  %v4379_v57 = vmul.f32 %v4171_v18, %v3811_v5  ;;  %v4400_v5 = vld [vmem:[%s4864_s4] ss:$0 sm:$0xff] }
 0x2b5   :  { %v4383_v53 = vmul.f32 %v4171_v18, %v3815_v36  ;;  %v4387_v16 = vmul.f32 %v4171_v18, %v3819_v60  ;;  %v4391_v39 = vmul.f32 %v4171_v18, %v3823_v45  ;;  %v4395_v59 = vmul.f32 %v4171_v18, %v3827_v54 }
 0x2b6   :  { %4979 = vst [vmem:[#allocation15_spill] sm:$0xff] %v4375_v2  ;;  %4980 = vst [vmem:[#allocation16_spill] sm:$0xff] %v4379_v57  ;;  %v4404_v36 = vmul.f32 %v4171_v18, %v3831_v0  ;;  %v4990_v2 = vld [vmem:[#allocation25_spill] sm:$0xff] }
 0x2b7   :  { %4981 = vst [vmem:[#allocation17_spill] sm:$0xff] %v4383_v53  ;;  %4982 = vst [vmem:[#allocation18_spill] sm:$0xff] %v4387_v16  ;;  %v4985_v53 = vld [vmem:[#allocation21_spill] sm:$0xff]  ;;  %v4987_v16 = vld [vmem:[#allocation22_spill] sm:$0xff]  ;;  %v4424_v0 = vmul.f32 %v4171_v18, %v4990_v2  ;;  %v4444_v2 = vadd.f32 %v4400_v5, %v4183_v33  ;;  %v4464_v33 = vadd.f32 %v4400_v5, %v4203_v46 }
 0x2b8   :  { %4983 = vst [vmem:[#allocation19_spill] sm:$0xff] %v4391_v39  ;;  %4984 = vst [vmem:[#allocation20_spill] sm:$0xff] %v4395_v59  ;;  %v4408_v60 = vmul.f32 %v4171_v18, %v4985_v53  ;;  %v4412_v45 = vmul.f32 %v4171_v18, %v4987_v16  ;;  %v4988_v39 = vld [vmem:[#allocation23_spill] sm:$0xff]  ;;  %v4989_v59 = vld [vmem:[#allocation24_spill] sm:$0xff]  ;;  %v4428_v53 = vmul.f32 %v4171_v18, %v3851_v4 }
 0x2b9   :  { %v4416_v54 = vmul.f32 %v4171_v18, %v4988_v39  ;;  %v4420_v57 = vmul.f32 %v4171_v18, %v4989_v59  ;;  %v4436_v39 = vadd.f32 %v4400_v5, %v4175_v12  ;;  %v4440_v59 = vadd.f32 %v4400_v5, %v4179_v24  ;;  %4994 = vst [vmem:[#allocation4_spill] sm:$0xff] %v4444_v2 }
 0x2ba   :  { %4986 = vst [vmem:[#allocation3_spill] sm:$0xff] %v4408_v60  ;;  %v4991_v60 = vld [vmem:[#allocation26_spill] sm:$0xff]  ;;  %v4448_v4 = vadd.f32 %v4400_v5, %v4187_v25  ;;  %v4456_v12 = vadd.f32 %v4400_v5, %v4195_v8  ;;  %v4460_v24 = vadd.f32 %v4400_v5, %v4199_v14  ;;  %v4468_v25 = vadd.f32 %v4400_v5, %v4207_v20 }
 0x2bb   :  { %v4432_v16 = vmul.f32 %v4171_v18, %v4991_v60  ;;  %4992 = vst [vmem:[#allocation5_spill] sm:$0xff] %v4436_v39  ;;  %4993 = vst [vmem:[#allocation2_spill] sm:$0xff] %v4440_v59  ;;  %v4452_v18 = vadd.f32 %v4400_v5, %v4191_v50  ;;  %v4472_v50 = vadd.f32 %v4400_v5, %v4211_v42 }
 0x2bc   :  { %4995 = vst [vmem:[#allocation7_spill] sm:$0xff] %v4448_v4  ;;  %v4476_v8 = vadd.f32 %v4400_v5, %v4215_v9  ;;  %v4480_v14 = vadd.f32 %v4400_v5, %v4219_v1  ;;  %v4484_v46 = vadd.f32 %v4400_v5, %v4223_v13  ;;  %v4488_v20 = vadd.f32 %v4400_v5, %v4227_v56 }
 0x2bd   :  { %4996 = vst [vmem:[#allocation9_spill] sm:$0xff] %v4452_v18  ;;  %v4492_v42 = vadd.f32 %v4400_v5, %v4231_v48  ;;  %v4496_v9 = vadd.f32 %v4400_v5, %v4235_v34  ;;  %v4500_v1 = vadd.f32 %v4400_v5, %v4239_v40  ;;  %v4504_v13 = vadd.f32 %v4400_v5, %v4243_v26  ;;  %v5002_v60 = vld [vmem:[#allocation15_spill] sm:$0xff] }
 0x2be   :  { %v4508_v56 = vadd.f32 %v4400_v5, %v4247_v17  ;;  %v4512_v48 = vadd.f32 %v4400_v5, %v4251_v10  ;;  %v4516_v34 = vadd.f32 %v4400_v5, %v4255_v37  ;;  %v4520_v40 = vadd.f32 %v4400_v5, %v4259_v15 }
 0x2bf   :  { %v4524_v26 = vadd.f32 %v4400_v5, %v4263_v3  ;;  %v4528_v17 = vadd.f32 %v4400_v5, %v4267_v51  ;;  %v4532_v10 = vadd.f32 %v4400_v5, %v4271_v31  ;;  %v4536_v37 = vadd.f32 %v4400_v5, %v4275_v52 }
 0x2c0   :  { %v4540_v15 = vadd.f32 %v4400_v5, %v4279_v49  ;;  %v4544_v3 = vadd.f32 %v4400_v5, %v4283_v23  ;;  %v4548_v51 = vadd.f32 %v4400_v5, %v4287_v35  ;;  %v4552_v31 = vadd.f32 %v4400_v5, %v4291_v27 }
 0x2c1   :  { %v4556_v52 = vadd.f32 %v4400_v5, %v4295_v43  ;;  %v4560_v49 = vadd.f32 %v4400_v5, %v4299_v55  ;;  %v4564_v23 = vadd.f32 %v4400_v5, %v4303_v58  ;;  %v4568_v35 = vadd.f32 %v4400_v5, %v4307_v61 }
 0x2c2   :  { %v4572_v27 = vadd.f32 %v4400_v5, %v4311_v11  ;;  %v4576_v43 = vadd.f32 %v4400_v5, %v4315_v41  ;;  %v4580_v55 = vadd.f32 %v4400_v5, %v4319_v32  ;;  %v4584_v58 = vadd.f32 %v4400_v5, %v4323_v62 }
 0x2c3   :  { %v4588_v61 = vadd.f32 %v4400_v5, %v4327_v22  ;;  %v4592_v11 = vadd.f32 %v4400_v5, %v4331_v28  ;;  %v4596_v41 = vadd.f32 %v4400_v5, %v4335_v44  ;;  %v4600_v32 = vadd.f32 %v4400_v5, %v4339_v7 }
 0x2c4   :  { %v4604_v62 = vadd.f32 %v4400_v5, %v4343_v63  ;;  %v4608_v22 = vadd.f32 %v4400_v5, %v4347_v30  ;;  %v4612_v28 = vadd.f32 %v4400_v5, %v4351_v6  ;;  %v4616_v44 = vadd.f32 %v4400_v5, %v4355_v19 }
 0x2c5   :  { %v4620_v7 = vadd.f32 %v4400_v5, %v4359_v21  ;;  %v4624_v63 = vadd.f32 %v4400_v5, %v4363_v29  ;;  %v4628_v30 = vadd.f32 %v4400_v5, %v4367_v47  ;;  %v4632_v6 = vadd.f32 %v4400_v5, %v4371_v38 }
 0x2c6   :  { %4997 = vst [vmem:[#allocation6_spill] sm:$0xff] %v4616_v44  ;;  %v4636_v19 = vadd.f32 %v4400_v5, %v5002_v60  ;;  %v5003_v44 = vld [vmem:[#allocation16_spill] sm:$0xff] }
 0x2c7   :  { %4998 = vst [vmem:[#allocation8_spill] sm:$0xff] %v4620_v7  ;;  %4999 = vst [vmem:[#allocation10_spill] sm:$0xff] %v4624_v63  ;;  %v4640_v21 = vadd.f32 %v4400_v5, %v5003_v44  ;;  %v5005_v7 = vld [vmem:[#allocation17_spill] sm:$0xff]  ;;  %v5006_v63 = vld [vmem:[#allocation18_spill] sm:$0xff]  ;;  %v4660_v44 = vadd.f32 %v4400_v5, %v4404_v36  ;;  %v4680_v36 = vadd.f32 %v4400_v5, %v4424_v0  ;;  %v1871_v0 = vmax.f32 %v4456_v12, 0.0 }
 0x2c8   :  { %5000 = vst [vmem:[#allocation12_spill] sm:$0xff] %v4628_v30  ;;  %5001 = vst [vmem:[#allocation11_spill] sm:$0xff] %v4632_v6  ;;  %v4644_v29 = vadd.f32 %v4400_v5, %v5005_v7  ;;  %v4648_v47 = vadd.f32 %v4400_v5, %v5006_v63  ;;  %v5007_v30 = vld [vmem:[#allocation19_spill] sm:$0xff]  ;;  %v5008_v6 = vld [vmem:[#allocation20_spill] sm:$0xff]  ;;  %v4668_v63 = vadd.f32 %v4400_v5, %v4412_v45  ;;  %v1881_v12 = vmax.f32 %v4496_v9, 0.0 }
 0x2c9   :  { %5004 = vst [vmem:[#allocation13_spill] sm:$0xff] %v4640_v21  ;;  %v4652_v38 = vadd.f32 %v4400_v5, %v5007_v30  ;;  %v4656_v60 = vadd.f32 %v4400_v5, %v5008_v6  ;;  %v5009_v21 = vld [vmem:[#allocation3_spill] sm:$0xff]  ;;  %v4672_v30 = vadd.f32 %v4400_v5, %v4416_v54  ;;  %v4676_v6 = vadd.f32 %v4400_v5, %v4420_v57 }
 0x2ca   :  { %v4664_v7 = vadd.f32 %v4400_v5, %v5009_v21  ;;  %5010 = vst [vmem:[#allocation14_spill] sm:$0xff] %v4668_v63  ;;  %5013 = vst [vmem:[#allocation23_spill] sm:$0xff] %v4680_v36  ;;  %v4684_v21 = vadd.f32 %v4400_v5, %v4428_v53  ;;  %v4688_v45 = vadd.f32 %v4400_v5, %v4432_v16  ;;  %v1872_v36 = vmax.f32 %v4460_v24, 0.0 }
 0x2cb   :  { %5011 = vst [vmem:[#allocation21_spill] sm:$0xff] %v4672_v30  ;;  %5012 = vst [vmem:[#allocation22_spill] sm:$0xff] %v4676_v6  ;;  %v1873_v53 = vmax.f32 %v4464_v33, 0.0  ;;  %v1875_v5 = vmax.f32 %v4472_v50, 0.0  ;;  %v1876_v16 = vmax.f32 %v4476_v8, 0.0  ;;  %v1877_v54 = vmax.f32 %v4480_v14, 0.0 }
 0x2cc   :  { %5014 = vst [vmem:[#allocation24_spill] sm:$0xff] %v4684_v21  ;;  %5015 = vst [vmem:[#allocation25_spill] sm:$0xff] %v4688_v45  ;;  %v1874_v21 = vmax.f32 %v4468_v25, 0.0  ;;  %v1878_v30 = vmax.f32 %v4484_v46, 0.0  ;;  %v1879_v57 = vmax.f32 %v4488_v20, 0.0  ;;  %v1880_v6 = vmax.f32 %v4492_v42, 0.0 }
 0x2cd   :  { %v1882_v24 = vmax.f32 %v4500_v1, 0.0  ;;  %v1883_v33 = vmax.f32 %v4504_v13, 0.0  ;;  %v1884_v25 = vmax.f32 %v4508_v56, 0.0  ;;  %v1885_v50 = vmax.f32 %v4512_v48, 0.0  ;;  %v5016_v63 = vld [vmem:[#allocation6_spill] sm:$0xff] }
 0x2ce   :  { %v1886_v8 = vmax.f32 %v4516_v34, 0.0  ;;  %v1887_v14 = vmax.f32 %v4520_v40, 0.0  ;;  %v1888_v46 = vmax.f32 %v4524_v26, 0.0  ;;  %v1889_v20 = vmax.f32 %v4528_v17, 0.0  ;;  %v5017_v18 = vld [vmem:[#allocation8_spill] sm:$0xff]  ;;  %v5018_v4 = vld [vmem:[#allocation10_spill] sm:$0xff] }
 0x2cf   :  { %v1890_v42 = vmax.f32 %v4532_v10, 0.0  ;;  %v1891_v9 = vmax.f32 %v4536_v37, 0.0  ;;  %v1892_v1 = vmax.f32 %v4540_v15, 0.0  ;;  %v1893_v13 = vmax.f32 %v4544_v3, 0.0  ;;  %v5019_v2 = vld [vmem:[#allocation12_spill] sm:$0xff]  ;;  %v5020_v59 = vld [vmem:[#allocation11_spill] sm:$0xff] }
 0x2d0   :  { %v1894_v56 = vmax.f32 %v4548_v51, 0.0  ;;  %v1895_v48 = vmax.f32 %v4552_v31, 0.0  ;;  %v1896_v34 = vmax.f32 %v4556_v52, 0.0  ;;  %v1897_v40 = vmax.f32 %v4560_v49, 0.0  ;;  %v5021_v39 = vld [vmem:[#allocation13_spill] sm:$0xff] }
 0x2d1   :  { %v1898_v26 = vmax.f32 %v4564_v23, 0.0  ;;  %v1899_v17 = vmax.f32 %v4568_v35, 0.0  ;;  %v1900_v10 = vmax.f32 %v4572_v27, 0.0  ;;  %v1901_v37 = vmax.f32 %v4576_v43, 0.0  ;;  %v5022_v45 = vld [vmem:[#allocation14_spill] sm:$0xff] }
 0x2d2   :  { %v1902_v15 = vmax.f32 %v4580_v55, 0.0  ;;  %v1903_v3 = vmax.f32 %v4584_v58, 0.0  ;;  %v1904_v51 = vmax.f32 %v4588_v61, 0.0  ;;  %v1905_v31 = vmax.f32 %v4592_v11, 0.0 }
 0x2d3   :  { %v1906_v52 = vmax.f32 %v4596_v41, 0.0  ;;  %v1907_v49 = vmax.f32 %v4600_v32, 0.0  ;;  %v1908_v23 = vmax.f32 %v4604_v62, 0.0  ;;  %v1909_v35 = vmax.f32 %v4608_v22, 0.0 }
 0x2d4   :  { %v1910_v27 = vmax.f32 %v4612_v28, 0.0  ;;  %v1911_v43 = vmax.f32 %v5016_v63, 0.0  ;;  %v1912_v55 = vmax.f32 %v5017_v18, 0.0  ;;  %v1913_v58 = vmax.f32 %v5018_v4, 0.0 }
 0x2d5   :  { %v1914_v61 = vmax.f32 %v5019_v2, 0.0  ;;  %v1915_v11 = vmax.f32 %v5020_v59, 0.0  ;;  %v1916_v41 = vmax.f32 %v4636_v19, 0.0  ;;  %v1917_v32 = vmax.f32 %v5021_v39, 0.0  ;;  %v5023_v59 = vld [vmem:[#allocation21_spill] sm:$0xff]  ;;  %v5024_v39 = vld [vmem:[#allocation22_spill] sm:$0xff] }
 0x2d6   :  { %v1918_v62 = vmax.f32 %v4644_v29, 0.0  ;;  %v1919_v22 = vmax.f32 %v4648_v47, 0.0  ;;  %v1920_v28 = vmax.f32 %v4652_v38, 0.0  ;;  %v1921_v63 = vmax.f32 %v4656_v60, 0.0  ;;  %v5025_v47 = vld [vmem:[#allocation23_spill] sm:$0xff]  ;;  %v5026_v60 = vld [vmem:[#allocation24_spill] sm:$0xff] }
 0x2d7   :  { %v1922_v18 = vmax.f32 %v4660_v44, 0.0  ;;  %v1923_v4 = vmax.f32 %v4664_v7, 0.0  ;;  %v1924_v2 = vmax.f32 %v5022_v45, 0.0  ;;  %v1925_v19 = vmax.f32 %v5023_v59, 0.0  ;;  %v5027_v7 = vld [vmem:[#allocation25_spill] sm:$0xff] }
 0x2d8   :  { %v1926_v29 = vmax.f32 %v5024_v39, 0.0  ;;  %v1927_v38 = vmax.f32 %v5025_v47, 0.0  ;;  %v1928_v44 = vmax.f32 %v5026_v60, 0.0  ;;  %v1929_v45 = vmax.f32 %v5027_v7, 0.0  ;;  %v5028_v59 = vld [vmem:[#allocation5_spill] sm:$0xff]  ;;  %v5030_v47 = vld [vmem:[#allocation2_spill] sm:$0xff] }
 0x2d9   :  { %v5029_v39 = vmax.f32 %v5028_v59, 0.0  ;;  %v5031_v60 = vmax.f32 %v5030_v47, 0.0  ;;  %v5032_v59 = vld [vmem:[#allocation4_spill] sm:$0xff] }
 0x2da   :  { %v5033_v47 = vmax.f32 %v5032_v59, 0.0 }
 0x2db   :  { %v2533_v7 = vpack.c.bf16 %v5031_v60, %v5029_v39  ;;  %v5034_v39 = vld [vmem:[#allocation7_spill] sm:$0xff] }
 0x2dc   :  { %v5035_v60 = vmax.f32 %v5034_v39, 0.0  ;;  %v5036_v39 = vld [vmem:[#allocation9_spill] sm:$0xff] }
 0x2dd   :  { %2534 = vst [vmem:[%s4865_s5] sm:$0xff] %v2533_v7  }
 0x2de   :  { %v2538_v59 = vpack.c.bf16 %v5035_v60, %v5033_v47  ;;  %v5037_v47 = vmax.f32 %v5036_v39, 0.0  ;;  %v2548_v39 = vpack.c.bf16 %v1873_v53, %v1872_v36  ;;  %v2563_v36 = vpack.c.bf16 %v1879_v57, %v1878_v30 }
 0x2df   :  { %v2568_v53 = vpack.c.bf16 %v1881_v12, %v1880_v6  ;;  %v2583_v30 = vpack.c.bf16 %v1887_v14, %v1886_v8  ;;  %v2588_v6 = vpack.c.bf16 %v1889_v20, %v1888_v46  ;;  %v2593_v57 = vpack.c.bf16 %v1891_v9, %v1890_v42 }
 0x2e0   :  { %v2543_v60 = vpack.c.bf16 %v1871_v0, %v5037_v47  ;;  %v2553_v0 = vpack.c.bf16 %v1875_v5, %v1874_v21  ;;  %v2558_v47 = vpack.c.bf16 %v1877_v54, %v1876_v16  ;;  %2690 = vst [vmem:[%s4865_s5 + $0x8] sm:$0xff] %v2538_v59   ;;  %2692 = vst [vmem:[%s4865_s5 + $0x18] sm:$0xff] %v2548_v39  }
 0x2e1   :  { %v2573_v21 = vpack.c.bf16 %v1883_v33, %v1882_v24  ;;  %v2578_v54 = vpack.c.bf16 %v1885_v50, %v1884_v25  ;;  %2695 = vst [vmem:[%s4865_s5 + $0x30] sm:$0xff] %v2563_v36   ;;  %2696 = vst [vmem:[%s4865_s5 + $0x38] sm:$0xff] %v2568_v53   ;;  %v2598_v5 = vpack.c.bf16 %v1893_v13, %v1892_v1 }
 0x2e2   :  { %2691 = vst [vmem:[%s4865_s5 + $0x10] sm:$0xff] %v2543_v60   ;;  %2693 = vst [vmem:[%s4865_s5 + $0x20] sm:$0xff] %v2553_v0   ;;  %v2603_v16 = vpack.c.bf16 %v1895_v48, %v1894_v56  ;;  %v2608_v12 = vpack.c.bf16 %v1897_v40, %v1896_v34  ;;  %v2613_v24 = vpack.c.bf16 %v1899_v17, %v1898_v26 }
 0x2e3   :  { %2694 = vst [vmem:[%s4865_s5 + $0x28] sm:$0xff] %v2558_v47   ;;  %2697 = vst [vmem:[%s4865_s5 + $0x40] sm:$0xff] %v2573_v21   ;;  %v2618_v33 = vpack.c.bf16 %v1901_v37, %v1900_v10  ;;  %v2623_v25 = vpack.c.bf16 %v1903_v3, %v1902_v15  ;;  %v2628_v50 = vpack.c.bf16 %v1905_v31, %v1904_v51 }
 0x2e4   :  { %2698 = vst [vmem:[%s4865_s5 + $0x48] sm:$0xff] %v2578_v54   ;;  %2699 = vst [vmem:[%s4865_s5 + $0x50] sm:$0xff] %v2583_v30   ;;  %v2633_v8 = vpack.c.bf16 %v1907_v49, %v1906_v52  ;;  %v2638_v14 = vpack.c.bf16 %v1909_v35, %v1908_v23  ;;  %v2643_v46 = vpack.c.bf16 %v1911_v43, %v1910_v27 }
 0x2e5   :  { %2700 = vst [vmem:[%s4865_s5 + $0x58] sm:$0xff] %v2588_v6   ;;  %2701 = vst [vmem:[%s4865_s5 + $0x60] sm:$0xff] %v2593_v57   ;;  %v2648_v20 = vpack.c.bf16 %v1913_v58, %v1912_v55  ;;  %v2653_v42 = vpack.c.bf16 %v1915_v11, %v1914_v61  ;;  %v2658_v9 = vpack.c.bf16 %v1917_v32, %v1916_v41 }
 0x2e6   :  { %2702 = vst [vmem:[%s4865_s5 + $0x68] sm:$0xff] %v2598_v5   ;;  %2703 = vst [vmem:[%s4865_s5 + $0x70] sm:$0xff] %v2603_v16   ;;  %v2663_v1 = vpack.c.bf16 %v1919_v22, %v1918_v62  ;;  %v2668_v13 = vpack.c.bf16 %v1921_v63, %v1920_v28  ;;  %v2673_v56 = vpack.c.bf16 %v1923_v4, %v1922_v18 }
 0x2e7   :  { %2704 = vst [vmem:[%s4865_s5 + $0x78] sm:$0xff] %v2608_v12   ;;  %2705 = vst [vmem:[%s4865_s5 + $0x80] sm:$0xff] %v2613_v24   ;;  %v2678_v48 = vpack.c.bf16 %v1925_v19, %v1924_v2  ;;  %v2683_v34 = vpack.c.bf16 %v1927_v38, %v1926_v29  ;;  %v2688_v40 = vpack.c.bf16 %v1929_v45, %v1928_v44 }
 0x2e8   :  { %2706 = vst [vmem:[%s4865_s5 + $0x88] sm:$0xff] %v2618_v33   ;;  %2707 = vst [vmem:[%s4865_s5 + $0x90] sm:$0xff] %v2623_v25  }
 0x2e9   :  { %2708 = vst [vmem:[%s4865_s5 + $0x98] sm:$0xff] %v2628_v50   ;;  %2709 = vst [vmem:[%s4865_s5 + $0xa0] sm:$0xff] %v2633_v8  }
 0x2ea   :  { %2710 = vst [vmem:[%s4865_s5 + $0xa8] sm:$0xff] %v2638_v14   ;;  %2711 = vst [vmem:[%s4865_s5 + $0xb0] sm:$0xff] %v2643_v46  }
 0x2eb   :  { %2712 = vst [vmem:[%s4865_s5 + $0xb8] sm:$0xff] %v2648_v20   ;;  %2713 = vst [vmem:[%s4865_s5 + $0xc0] sm:$0xff] %v2653_v42  }
 0x2ec   :  { %2714 = vst [vmem:[%s4865_s5 + $0xc8] sm:$0xff] %v2658_v9   ;;  %2715 = vst [vmem:[%s4865_s5 + $0xd0] sm:$0xff] %v2663_v1  }
 0x2ed   :  { %2716 = vst [vmem:[%s4865_s5 + $0xd8] sm:$0xff] %v2668_v13   ;;  %2717 = vst [vmem:[%s4865_s5 + $0xe0] sm:$0xff] %v2673_v56  }
 0x2ee   :  { %2718 = vst [vmem:[%s4865_s5 + $0xe8] sm:$0xff] %v2678_v48   ;;  %2719 = vst [vmem:[%s4865_s5 + $0xf0] sm:$0xff] %v2683_v34  }
 0x2ef   :  { %2720 = vst [vmem:[%s4865_s5 + $0xf8] sm:$0xff] %v2688_v40  }

// kernel: encoder_forward.6
= control target key start
LH: loop header
LB: loop body
LE: loop exit
PB: predicated region body
PF: predicated region fallthrough
CT: control target
= control target key end

     0   :  { %vm564_vm0 = vcmask 523264   ;;  %s1958_s1 = inlined_call_operand.vmem [shape: bf16[576,128], index: 1, kind: input, shape index: {}]   ;;  %s1959_s0 = inlined_call_operand.vmem [shape: bf16[128,576], index: 0, kind: input, shape index: {}]   ;;  %s1960_s2 = inlined_call_operand.vmem [shape: f32[1,128], index: 2, kind: input, shape index: {}]   ;;  %s1961_s3 = inlined_call_operand.vmem [shape: f32[1,128], index: 3, kind: input, shape index: {}]   ;;  %s1962_s4 = inlined_call_operand.vmem [shape: f32[1,128], index: 4, kind: input, shape index: {}]   ;;  %s1963_s5 = inlined_call_operand.vmem [shape: bf16[128,128], index: 5, kind: output, shape index: {}]  }
   0x1   :  { %v1440_v0 = vld [vmem:[%s1958_s1 + $0x40] sm:$0xff]   ;;  %v1444_v4 = vld [vmem:[%s1958_s1 + $0x48] sm:$0xff]   ;;  %v1448_v8 = vld [vmem:[%s1958_s1 + $0x50] sm:$0xff]  }
   0x2   :  { %v1441_v1 = vld [vmem:[%s1958_s1 + $0xc0] sm:$0xff]   ;;  %1268 = vmatprep.subr.bf16.mxu0 %v1440_v0  ;;  %v1445_v5 = vld [vmem:[%s1958_s1 + $0xc8] sm:$0xff]   ;;  %v1449_v9 = vld [vmem:[%s1958_s1 + $0xd0] sm:$0xff]  }
   0x3   :  { %v1442_v2 = vld [vmem:[%s1958_s1] sm:$0xff]   ;;  %1332 = vmatprep.subr.bf16.mxu1 %v1441_v1  ;;  %v1446_v6 = vld [vmem:[%s1958_s1 + $0x8] sm:$0xff]   ;;  %v1450_v10 = vld [vmem:[%s1958_s1 + $0x10] sm:$0xff]  }
   0x4   :  { %v1443_v3 = vld [vmem:[%s1958_s1 + $0x80] sm:$0xff]   ;;  %1269 = vmatpush3.bf16.msra.mxu0 %v1442_v2  ;;  %v1447_v7 = vld [vmem:[%s1958_s1 + $0x88] sm:$0xff]   ;;  %v1451_v11 = vld [vmem:[%s1958_s1 + $0x90] sm:$0xff]  }
   0x5   :  { %1333 = vmatpush3.bf16.msra.mxu1 %v1443_v3  ;;  %1270 = vmatprep.subr.bf16.mxu0 %v1444_v4  ;;  %v1452_v12 = vld [vmem:[%s1958_s1 + $0x58] sm:$0xff]   ;;  %v1456_v16 = vld [vmem:[%s1958_s1 + $0x60] sm:$0xff]   ;;  %v1460_v20 = vld [vmem:[%s1958_s1 + $0x68] sm:$0xff]  }
   0x6   :  { %1334 = vmatprep.subr.bf16.mxu1 %v1445_v5  ;;  %v1453_v13 = vld [vmem:[%s1958_s1 + $0xd8] sm:$0xff]   ;;  %v1457_v17 = vld [vmem:[%s1958_s1 + $0xe0] sm:$0xff]   ;;  %v1461_v21 = vld [vmem:[%s1958_s1 + $0xe8] sm:$0xff]  }
   0x7   :  { %v1454_v14 = vld [vmem:[%s1958_s1 + $0x18] sm:$0xff]   ;;  %v1458_v18 = vld [vmem:[%s1958_s1 + $0x20] sm:$0xff]   ;;  %v1462_v22 = vld [vmem:[%s1958_s1 + $0x28] sm:$0xff]  }
   0x8   :  { %1271 = vmatpush3.bf16.msra.mxu0 %v1446_v6  ;;  %v1455_v15 = vld [vmem:[%s1958_s1 + $0x98] sm:$0xff]   ;;  %v1459_v19 = vld [vmem:[%s1958_s1 + $0xa0] sm:$0xff]   ;;  %v1463_v23 = vld [vmem:[%s1958_s1 + $0xa8] sm:$0xff]  }
   0x9   :  { %1335 = vmatpush3.bf16.msra.mxu1 %v1447_v7  ;;  %1272 = vmatprep.subr.bf16.mxu0 %v1448_v8  ;;  %v1464_v24 = vld [vmem:[%s1958_s1 + $0x70] sm:$0xff]   ;;  %v1468_v28 = vld [vmem:[%s1958_s1 + $0x78] sm:$0xff]   ;;  %v1477_v35 = vld [vmem:[%s1959_s0 + $0xc] ss:$20 sps:$4 sm:$0xff]  }
   0xa   :  { %1336 = vmatprep.subr.bf16.mxu1 %v1449_v9  ;;  %v1465_v25 = vld [vmem:[%s1958_s1 + $0xf0] sm:$0xff]   ;;  %v1469_v29 = vld [vmem:[%s1958_s1 + $0xf8] sm:$0xff]   ;;  %v1478_v36 = vld [vmem:[%s1958_s1 + $0x100] sm:$0xff]   ;;  %718 = vmatprep.mubr.bf16.mxu1 %v1477_v35 }
   0xb   :  { %v1466_v26 = vld [vmem:[%s1958_s1 + $0x30] sm:$0xff]   ;;  %v1470_v30 = vld [vmem:[%s1958_s1 + $0x38] sm:$0xff]   ;;  %v1479_v37 = vld [vmem:[%s1959_s0 + $0x2c] ss:$20 sps:$4 sm:$0xff]  }
   0xc   :  { %1273 = vmatpush3.bf16.msra.mxu0 %v1450_v10  ;;  %v1467_v27 = vld [vmem:[%s1958_s1 + $0xb0] sm:$0xff]   ;;  %v1471_v31 = vld [vmem:[%s1958_s1 + $0xb8] sm:$0xff]   ;;  %v1491_v42 = vld [vmem:[%s1958_s1 + $0x108] sm:$0xff]  }
   0xd   :  { %1337 = vmatpush3.bf16.msra.mxu1 %v1451_v11  ;;  %1274 = vmatprep.subr.bf16.mxu0 %v1452_v12  ;;  %v1472_v32 = vld [vmem:[%s1959_s0] ss:$20 sps:$4 sm:$0xff]   ;;  %v1474_v33 = vld [vmem:[%s1959_s0 + $0x4] ss:$20 sps:$4 sm:$0xff]   ;;  %v1475_v34 = vld [vmem:[%s1959_s0 + $0x8] ss:$20 sps:$4 sm:$0xff]  }
   0xe   :  { %1338 = vmatprep.subr.bf16.mxu1 %v1453_v13  ;;  %621 = vmatprep.mubr.bf16.mxu0 %v1474_v33  ;;  %v1481_v38 = vld [vmem:[%s1959_s0 + $0x34] ss:$20 sps:$4 sm:$0xff]   ;;  %v1484_v40 = vld [vmem:[%s1959_s0 + $0x30] ss:$20 sps:$4 sm:$0xff]   ;;  %v1490_v45 = vld [vmem:[%s1959_s0 + $0x58] ss:$20 sps:$4 sm:$0xff]  }
   0xf   :  { %v1483_v39 = vld [vmem:[%s1959_s0 + $0x28] ss:$20 sps:$4 sm:$0xff]   ;;  %v1489_v44 = vld [vmem:[%s1959_s0 + $0x50] ss:$20 sps:$4 sm:$0xff]   ;;  %v1496_v50 = vld [vmem:[%s1959_s0 + $0x78] ss:$20 sps:$4 sm:$0xff]  }
  0x10   :  { %1275 = vmatpush3.bf16.msra.mxu0 %v1454_v14  ;;  %v1485_v41 = vld [vmem:[%s1959_s0 + $0x54] ss:$20 sps:$4 sm:$0xff]   ;;  %v1487_v43 = vld [vmem:[%s1959_s0 + $0x5c] ss:$20 sps:$4 sm:$0xff]   ;;  %v1494_v48 = vld [vmem:[%s1959_s0 + $0x84] ss:$20 sps:$4 sm:$0xff]  }
  0x11   :  { %1339 = vmatpush3.bf16.msra.mxu1 %v1455_v15  ;;  %1276 = vmatprep.subr.bf16.mxu0 %v1456_v16  ;;  %v1504_v46 = vld [vmem:[%s1958_s1 + $0x110] sm:$0xff]   ;;  %v1517_v49 = vld [vmem:[%s1958_s1 + $0x118] sm:$0xff]   ;;  %v1500_v53 = vld [vmem:[%s1959_s0 + $0xac] ss:$20 sps:$4 sm:$0xff]  }
  0x12   :  { %1340 = vmatprep.subr.bf16.mxu1 %v1457_v17  ;;  %v1492_v47 = vld [vmem:[%s1959_s0 + $0x7c] ss:$20 sps:$4 sm:$0xff]   ;;  %v1497_v51 = vld [vmem:[%s1959_s0 + $0x80] ss:$20 sps:$4 sm:$0xff]   ;;  %v1498_v52 = vld [vmem:[%s1959_s0 + $0xa4] ss:$20 sps:$4 sm:$0xff]  }
  0x13   :  { %v1502_v54 = vld [vmem:[%s1959_s0 + $0xa0] ss:$20 sps:$4 sm:$0xff]   ;;  %v1503_v55 = vld [vmem:[%s1959_s0 + $0xa8] ss:$20 sps:$4 sm:$0xff]   ;;  %v1510_v59 = vld [vmem:[%s1959_s0 + $0xd0] ss:$20 sps:$4 sm:$0xff]  }
  0x14   :  { %1277 = vmatpush3.bf16.msra.mxu0 %v1458_v18  ;;  %v1505_v56 = vld [vmem:[%s1959_s0 + $0xcc] ss:$20 sps:$4 sm:$0xff]   ;;  %v1507_v57 = vld [vmem:[%s1959_s0 + $0xd4] ss:$20 sps:$4 sm:$0xff]   ;;  %v1513_v61 = vld [vmem:[%s1959_s0 + $0xfc] ss:$20 sps:$4 sm:$0xff]  }
  0x15   :  { %1341 = vmatpush3.bf16.msra.mxu1 %v1459_v19  ;;  %1278 = vmatprep.subr.bf16.mxu0 %v1460_v20  ;;  %v1509_v58 = vld [vmem:[%s1959_s0 + $0xc8] ss:$20 sps:$4 sm:$0xff]   ;;  %v1515_v62 = vld [vmem:[%s1959_s0 + $0xf0] ss:$20 sps:$4 sm:$0xff]   ;;  %v1516_v63 = vld [vmem:[%s1959_s0 + $0xf8] ss:$20 sps:$4 sm:$0xff]  }
  0x16   :  { %1342 = vmatprep.subr.bf16.mxu1 %v1461_v21  ;;  %v1511_v60 = vld [vmem:[%s1959_s0 + $0xf4] ss:$20 sps:$4 sm:$0xff]   ;;  %v1518_v0 = vld [vmem:[%s1959_s0 + $0x11c] ss:$20 sps:$4 sm:$0xff]   ;;  %v1520_v1 = vld [vmem:[%s1959_s0 + $0x124] ss:$20 sps:$4 sm:$0xff]  }
  0x17   :  { %v1522_v2 = vld [vmem:[%s1959_s0 + $0x118] ss:$20 sps:$4 sm:$0xff]   ;;  %v1523_v3 = vld [vmem:[%s1959_s0 + $0x120] ss:$20 sps:$4 sm:$0xff]   ;;  %v1524_v4 = vld [vmem:[%s1959_s0 + $0x10] ss:$20 sps:$4 sm:$0xff]  }
  0x18   :  { %1279 = vmatpush3.bf16.msra.mxu0 %v1462_v22  ;;  %v1525_v5 = vld [vmem:[%s1959_s0 + $0xb0] ss:$20 sps:$4 sm:$0xff]   ;;  %v1526_v6 = vld [vmem:[%s1959_s0 + $0x38] ss:$20 sps:$4 sm:$0xff]   ;;  %v1528_v8 = vld [vmem:[%s1959_s0 + $0x60] ss:$20 sps:$4 sm:$0xff]  }
  0x19   :  { %1343 = vmatpush3.bf16.msra.mxu1 %v1463_v23  ;;  %1280 = vmatprep.subr.bf16.mxu0 %v1464_v24  ;;  %v1527_v7 = vld [vmem:[%s1959_s0 + $0xd8] ss:$20 sps:$4 sm:$0xff]   ;;  %v1529_v9 = vld [vmem:[%s1959_s0 + $0x100] ss:$20 sps:$4 sm:$0xff]   ;;  %v1530_v10 = vld [vmem:[%s1959_s0 + $0x88] ss:$20 sps:$4 sm:$0xff]  }
  0x1a   :  { %1344 = vmatprep.subr.bf16.mxu1 %v1465_v25  ;;  %v1531_v11 = vld [vmem:[%s1959_s0 + $0x128] ss:$20 sps:$4 sm:$0xff]   ;;  %v1803_v13 = vld [vmem:[%s1960_s2] ss:$0 sm:$0xff] }
  0x1c   :  { %1281 = vmatpush3.bf16.msra.mxu0 %v1466_v26 }
  0x1d   :  { %1345 = vmatpush3.bf16.msra.mxu1 %v1467_v27  ;;  %1282 = vmatprep.subr.bf16.mxu0 %v1468_v28 }
  0x1e   :  { %1346 = vmatprep.subr.bf16.mxu1 %v1469_v29 }
  0x20   :  { %1283 = vmatpush3.bf16.msra.mxu0 %v1470_v30 }
  0x21   :  { %1347 = vmatpush3.bf16.msra.mxu1 %v1471_v31  ;;  %1408 = vmatprep.subr.bf16.mxu0 %v1478_v36 }
  0x22   :  { %1432 = vmatprep.subr.bf16.mxu1 %v1478_v36 }
  0x23   :  { %622 = vmatmul.mubr.bf16.vlgmr.msra.gmra.mrb[0].mxu0 %v1472_v32 }
  0x24   :  { %719 = vmatmul.mubr.bf16.vlgmr.msra.gmra.mrb[0].mxu1 %v1475_v34  ;;  %1409 = vmatpush3.bf16.msra.mxu0 %v1478_v36 }
  0x25   :  { %629 = vmatprep.mubr.bf16.mxu0 %v1479_v37  ;;  %726 = vmatprep.mubr.bf16.mxu1 %v1481_v38 }
  0x26   :  { %1436 = vmatpush3.bf16.msra.mxu1 %v1478_v36  ;;  %1410 = vmatprep.subr.bf16.mxu0 %v1491_v42 }
  0x27   :  { %1433 = vmatprep.subr.bf16.mxu1 %v1491_v42 }
  0x28   :  { %1411 = vmatpush3.bf16.msra.mxu0 %v1491_v42 }
  0x29   :  { %1412 = vmatprep.subr.bf16.mxu0 %v1504_v46 }
  0x2a   :  { %1437 = vmatpush3.bf16.msra.mxu1 %v1491_v42 }
  0x2b   :  { %630 = vmatmul.mubr.bf16.gmra.mrb[4].mxu0 %v1483_v39  ;;  %1434 = vmatprep.subr.bf16.mxu1 %v1504_v46 }
  0x2c   :  { %727 = vmatmul.mubr.bf16.gmra.mrb[4].mxu1 %v1484_v40  ;;  %637 = vmatprep.mubr.bf16.mxu0 %v1485_v41 }
  0x2d   :  { %734 = vmatprep.mubr.bf16.mxu1 %v1487_v43  ;;  %1413 = vmatpush3.bf16.msra.mxu0 %v1504_v46 }
  0x2e   :  { %1438 = vmatpush3.bf16.msra.mxu1 %v1504_v46  ;;  %1414 = vmatprep.subr.bf16.mxu0 %v1517_v49 }
  0x2f   :  { %1435 = vmatprep.subr.bf16.mxu1 %v1517_v49 }
  0x31   :  { %1415 = vmatpush3.bf16.msra.mxu0 %v1517_v49 }
  0x32   :  { %1439 = vmatpush3.bf16.msra.mxu1 %v1517_v49 }
  0x33   :  { %638 = vmatmul.mubr.bf16.gmra.mrb[8].mxu0 %v1489_v44 }
  0x34   :  { %735 = vmatmul.mubr.bf16.gmra.mrb[8].mxu1 %v1490_v45  ;;  %645 = vmatprep.mubr.bf16.mxu0 %v1492_v47 }
  0x35   :  { %742 = vmatprep.mubr.bf16.mxu1 %v1494_v48 }
  0x3b   :  { %646 = vmatmul.mubr.bf16.gmra.mrb[12].mxu0 %v1496_v50 }
  0x3c   :  { %743 = vmatmul.mubr.bf16.gmra.mrb[12].mxu1 %v1497_v51  ;;  %653 = vmatprep.mubr.bf16.mxu0 %v1498_v52 }
  0x3d   :  { %750 = vmatprep.mubr.bf16.mxu1 %v1500_v53 }
  0x43   :  { %654 = vmatmul.mubr.bf16.gmra.mrb[16].mxu0 %v1502_v54 }
  0x44   :  { %751 = vmatmul.mubr.bf16.gmra.mrb[16].mxu1 %v1503_v55  ;;  %661 = vmatprep.mubr.bf16.mxu0 %v1505_v56 }
  0x45   :  { %758 = vmatprep.mubr.bf16.mxu1 %v1507_v57 }
  0x4b   :  { %662 = vmatmul.mubr.bf16.gmra.mrb[20].mxu0 %v1509_v58 }
  0x4c   :  { %759 = vmatmul.mubr.bf16.gmra.mrb[20].mxu1 %v1510_v59  ;;  %669 = vmatprep.mubr.bf16.mxu0 %v1511_v60 }
  0x4d   :  { %766 = vmatprep.mubr.bf16.mxu1 %v1513_v61 }
  0x53   :  { %670 = vmatmul.mubr.bf16.gmra.mrb[24].mxu0 %v1515_v62 }
  0x54   :  { %767 = vmatmul.mubr.bf16.gmra.mrb[24].mxu1 %v1516_v63  ;;  %677 = vmatprep.mubr.bf16.mxu0 %v1518_v0 }
  0x55   :  { %774 = vmatprep.mubr.bf16.mxu1 %v1520_v1 }
  0x5b   :  { %678 = vmatmul.mubr.bf16.gmra.mrb[28].mxu0 %v1522_v2 }
  0x5c   :  { %775 = vmatmul.mubr.bf16.gmra.mrb[28].mxu1 %v1523_v3  ;;  %1416 = vmatprep.mubr.msk.bf16.mxu0 %vm564_vm0, %v1524_v4 }
  0x5d   :  { %1424 = vmatprep.mubr.msk.bf16.mxu1 %vm564_vm0, %v1525_v5 }
  0x63   :  { %1417 = vmatmul.mubr.msk.bf16.vlgmr.msra.gmra.mrb[32].mxu0 %vm564_vm0, %v1526_v6 }
  0x64   :  { %1425 = vmatmul.mubr.msk.bf16.vlgmr.msra.gmra.mrb[32].mxu1 %vm564_vm0, %v1527_v7  ;;  %1420 = vmatprep.mubr.msk.bf16.mxu0 %vm564_vm0, %v1528_v8 }
  0x65   :  { %1428 = vmatprep.mubr.msk.bf16.mxu1 %vm564_vm0, %v1529_v9 }
  0x6b   :  { %1421 = vmatmul.mubr.msk.bf16.gmra.mrb[36].mxu0 %vm564_vm0, %v1530_v10 }
  0x6c   :  { %1429 = vmatmul.mubr.msk.bf16.gmra.mrb[36].mxu1 %vm564_vm0, %v1531_v11 }
  0xf6   :  { %v1284_v12 = vpop.f32.mrb[0].mxu0 }
  0xf7   :  { %v1285_v14 = vpop.f32.mrb[1].mxu0  ;;  %v1348_v15 = vpop.f32.mrb[0].mxu1 }
  0xf8   :  { %v1286_v16 = vadd.f32 %v1285_v14, %v1284_v12  ;;  %v1287_v17 = vpop.f32.mrb[2].mxu0  ;;  %v1349_v18 = vpop.f32.mrb[1].mxu1 }
  0xf9   :  { %v1288_v19 = vpop.f32.mrb[3].mxu0  ;;  %v1350_v20 = vadd.f32 %v1349_v18, %v1348_v15  ;;  %v1351_v21 = vpop.f32.mrb[2].mxu1 }
  0xfa   :  { %v624_v22 = vadd.f32 %v1286_v16, %v1803_v13  ;;  %v1289_v23 = vadd.f32 %v1288_v19, %v1287_v17  ;;  %v1352_v24 = vpop.f32.mrb[3].mxu1 }
  0xfb   :  { %v1353_v25 = vadd.f32 %v1352_v24, %v1351_v21 }
  0xfc   :  { %v627_v26 = vadd.f32 %v1289_v23, %v1803_v13  ;;  %v1807_v27 = vadd.f32 %v1350_v20, %v624_v22 }
  0xfe   :  { %v1290_v28 = vpop.f32.mrb[4].mxu0  ;;  %v1809_v29 = vadd.f32 %v1353_v25, %v627_v26 }
  0xff   :  { %v1291_v30 = vpop.f32.mrb[5].mxu0  ;;  %v1354_v31 = vpop.f32.mrb[4].mxu1 }
 0x100   :  { %v1292_v32 = vadd.f32 %v1291_v30, %v1290_v28  ;;  %v1293_v33 = vpop.f32.mrb[6].mxu0  ;;  %v1355_v34 = vpop.f32.mrb[5].mxu1 }
 0x101   :  { %v1294_v35 = vpop.f32.mrb[7].mxu0  ;;  %v1356_v36 = vadd.f32 %v1355_v34, %v1354_v31  ;;  %v1357_v37 = vpop.f32.mrb[6].mxu1 }
 0x102   :  { %v632_v38 = vadd.f32 %v1292_v32, %v1803_v13  ;;  %v1295_v39 = vadd.f32 %v1294_v35, %v1293_v33  ;;  %v1358_v40 = vpop.f32.mrb[7].mxu1 }
 0x103   :  { %v1359_v41 = vadd.f32 %v1358_v40, %v1357_v37 }
 0x104   :  { %v635_v42 = vadd.f32 %v1295_v39, %v1803_v13  ;;  %v1813_v43 = vadd.f32 %v1356_v36, %v632_v38 }
 0x106   :  { %v1296_v44 = vpop.f32.mrb[8].mxu0  ;;  %v1815_v45 = vadd.f32 %v1359_v41, %v635_v42 }
 0x107   :  { %v1297_v46 = vpop.f32.mrb[9].mxu0  ;;  %v1360_v47 = vpop.f32.mrb[8].mxu1 }
 0x108   :  { %v1298_v48 = vadd.f32 %v1297_v46, %v1296_v44  ;;  %v1299_v49 = vpop.f32.mrb[10].mxu0  ;;  %v1361_v50 = vpop.f32.mrb[9].mxu1 }
 0x109   :  { %v1300_v51 = vpop.f32.mrb[11].mxu0  ;;  %v1362_v52 = vadd.f32 %v1361_v50, %v1360_v47  ;;  %v1363_v53 = vpop.f32.mrb[10].mxu1 }
 0x10a   :  { %v640_v54 = vadd.f32 %v1298_v48, %v1803_v13  ;;  %v1301_v55 = vadd.f32 %v1300_v51, %v1299_v49  ;;  %v1364_v56 = vpop.f32.mrb[11].mxu1 }
 0x10b   :  { %v1365_v57 = vadd.f32 %v1364_v56, %v1363_v53 }
 0x10c   :  { %v643_v58 = vadd.f32 %v1301_v55, %v1803_v13  ;;  %v1819_v59 = vadd.f32 %v1362_v52, %v640_v54 }
 0x10e   :  { %v1302_v60 = vpop.f32.mrb[12].mxu0  ;;  %v1821_v61 = vadd.f32 %v1365_v57, %v643_v58 }
 0x10f   :  { %v1303_v62 = vpop.f32.mrb[13].mxu0  ;;  %v1366_v63 = vpop.f32.mrb[12].mxu1 }
 0x110   :  { %v1304_v0 = vadd.f32 %v1303_v62, %v1302_v60  ;;  %v1305_v1 = vpop.f32.mrb[14].mxu0  ;;  %v1367_v2 = vpop.f32.mrb[13].mxu1 }
 0x111   :  { %v1306_v3 = vpop.f32.mrb[15].mxu0  ;;  %v1368_v4 = vadd.f32 %v1367_v2, %v1366_v63  ;;  %v1369_v5 = vpop.f32.mrb[14].mxu1 }
 0x112   :  { %v648_v6 = vadd.f32 %v1304_v0, %v1803_v13  ;;  %v1307_v7 = vadd.f32 %v1306_v3, %v1305_v1  ;;  %v1370_v8 = vpop.f32.mrb[15].mxu1 }
 0x113   :  { %v1371_v9 = vadd.f32 %v1370_v8, %v1369_v5 }
 0x114   :  { %v651_v10 = vadd.f32 %v1307_v7, %v1803_v13  ;;  %v1825_v11 = vadd.f32 %v1368_v4, %v648_v6 }
 0x116   :  { %v1308_v12 = vpop.f32.mrb[16].mxu0  ;;  %v1827_v14 = vadd.f32 %v1371_v9, %v651_v10 }
 0x117   :  { %v1309_v15 = vpop.f32.mrb[17].mxu0  ;;  %v1372_v16 = vpop.f32.mrb[16].mxu1 }
 0x118   :  { %v1310_v17 = vadd.f32 %v1309_v15, %v1308_v12  ;;  %v1311_v18 = vpop.f32.mrb[18].mxu0  ;;  %v1373_v19 = vpop.f32.mrb[17].mxu1 }
 0x119   :  { %v1312_v20 = vpop.f32.mrb[19].mxu0  ;;  %v1374_v21 = vadd.f32 %v1373_v19, %v1372_v16  ;;  %v1375_v22 = vpop.f32.mrb[18].mxu1 }
 0x11a   :  { %v656_v23 = vadd.f32 %v1310_v17, %v1803_v13  ;;  %v1313_v24 = vadd.f32 %v1312_v20, %v1311_v18  ;;  %v1376_v25 = vpop.f32.mrb[19].mxu1 }
 0x11b   :  { %v1377_v26 = vadd.f32 %v1376_v25, %v1375_v22 }
 0x11c   :  { %v659_v28 = vadd.f32 %v1313_v24, %v1803_v13  ;;  %v753_v30 = vadd.f32 %v1374_v21, %v656_v23 }
 0x11e   :  { %v1314_v31 = vpop.f32.mrb[20].mxu0  ;;  %v1831_v32 = vadd.f32 %v1377_v26, %v659_v28 }
 0x11f   :  { %v1315_v33 = vpop.f32.mrb[21].mxu0  ;;  %v1378_v34 = vpop.f32.mrb[20].mxu1 }
 0x120   :  { %v1316_v35 = vadd.f32 %v1315_v33, %v1314_v31  ;;  %v1317_v36 = vpop.f32.mrb[22].mxu0  ;;  %v1379_v37 = vpop.f32.mrb[21].mxu1 }
 0x121   :  { %v1318_v38 = vpop.f32.mrb[23].mxu0  ;;  %v1380_v39 = vadd.f32 %v1379_v37, %v1378_v34  ;;  %v1381_v40 = vpop.f32.mrb[22].mxu1 }
 0x122   :  { %v664_v41 = vadd.f32 %v1316_v35, %v1803_v13  ;;  %v1319_v42 = vadd.f32 %v1318_v38, %v1317_v36  ;;  %v1382_v44 = vpop.f32.mrb[23].mxu1 }
 0x123   :  { %v1383_v46 = vadd.f32 %v1382_v44, %v1381_v40 }
 0x124   :  { %v667_v47 = vadd.f32 %v1319_v42, %v1803_v13  ;;  %v761_v48 = vadd.f32 %v1380_v39, %v664_v41 }
 0x126   :  { %v1320_v49 = vpop.f32.mrb[24].mxu0  ;;  %v764_v50 = vadd.f32 %v1383_v46, %v667_v47 }
 0x127   :  { %v1321_v51 = vpop.f32.mrb[25].mxu0  ;;  %v1384_v52 = vpop.f32.mrb[24].mxu1 }
 0x128   :  { %v1322_v53 = vadd.f32 %v1321_v51, %v1320_v49  ;;  %v1323_v54 = vpop.f32.mrb[26].mxu0  ;;  %v1385_v55 = vpop.f32.mrb[25].mxu1 }
 0x129   :  { %v1324_v56 = vpop.f32.mrb[27].mxu0  ;;  %v1386_v57 = vadd.f32 %v1385_v55, %v1384_v52  ;;  %v1387_v58 = vpop.f32.mrb[26].mxu1 }
 0x12a   :  { %v672_v60 = vadd.f32 %v1322_v53, %v1803_v13  ;;  %v1325_v62 = vadd.f32 %v1324_v56, %v1323_v54  ;;  %v1388_v63 = vpop.f32.mrb[27].mxu1 }
 0x12b   :  { %v1389_v0 = vadd.f32 %v1388_v63, %v1387_v58 }
 0x12c   :  { %v675_v1 = vadd.f32 %v1325_v62, %v1803_v13  ;;  %v769_v2 = vadd.f32 %v1386_v57, %v672_v60 }
 0x12e   :  { %v1326_v3 = vpop.f32.mrb[28].mxu0  ;;  %v772_v4 = vadd.f32 %v1389_v0, %v675_v1 }
 0x12f   :  { %v1327_v5 = vpop.f32.mrb[29].mxu0  ;;  %v1390_v6 = vpop.f32.mrb[28].mxu1 }
 0x130   :  { %v1328_v7 = vadd.f32 %v1327_v5, %v1326_v3  ;;  %v1329_v8 = vpop.f32.mrb[30].mxu0  ;;  %v1391_v9 = vpop.f32.mrb[29].mxu1 }
 0x131   :  { %v1330_v10 = vpop.f32.mrb[31].mxu0  ;;  %v1392_v12 = vadd.f32 %v1391_v9, %v1390_v6  ;;  %v1393_v15 = vpop.f32.mrb[30].mxu1 }
 0x132   :  { %v680_v16 = vadd.f32 %v1328_v7, %v1803_v13  ;;  %v1331_v17 = vadd.f32 %v1330_v10, %v1329_v8  ;;  %v1394_v18 = vpop.f32.mrb[31].mxu1 }
 0x133   :  { %v1395_v19 = vadd.f32 %v1394_v18, %v1393_v15 }
 0x134   :  { %v683_v20 = vadd.f32 %v1331_v17, %v1803_v13  ;;  %v777_v21 = vadd.f32 %v1392_v12, %v680_v16 }
 0x136   :  { %v1418_v22 = vpop.f32.mrb[32].mxu0  ;;  %v780_v23 = vadd.f32 %v1395_v19, %v683_v20 }
 0x137   :  { %v826_v24 = vadd.f32 %v1418_v22, %v1813_v43  ;;  %v1426_v25 = vpop.f32.mrb[32].mxu1  ;;  %v817_v26 = vpop.f32.mrb[33].mxu0 }
 0x138   :  { %v858_v28 = vadd.f32 %v1426_v25, %v761_v48  ;;  %v818_v31 = vadd.f32 %v817_v26, %v1807_v27  ;;  %v849_v33 = vpop.f32.mrb[33].mxu1  ;;  %v1419_v34 = vpop.f32.mrb[34].mxu0 }
 0x139   :  { %v850_v35 = vadd.f32 %v849_v33, %v753_v30  ;;  %v829_v36 = vadd.f32 %v1419_v34, %v1815_v45  ;;  %v1427_v37 = vpop.f32.mrb[34].mxu1  ;;  %v820_v38 = vpop.f32.mrb[35].mxu0 }
 0x13a   :  { %v861_v39 = vadd.f32 %v1427_v37, %v764_v50  ;;  %v821_v13 = vadd.f32 %v820_v38, %v1809_v29  ;;  %v852_v40 = vpop.f32.mrb[35].mxu1 }
 0x13b   :  { %v853_v41 = vadd.f32 %v852_v40, %v1831_v32 }
 0x13c   :  { %v880_v42 = vadd.f32 %v821_v13, %v818_v31 }
 0x13e   :  { %v881_v43 = vadd.f32 %v880_v42, %v826_v24  ;;  %v1422_v44 = vpop.f32.mrb[36].mxu0 }
 0x13f   :  { %v842_v46 = vadd.f32 %v1422_v44, %v1825_v11  ;;  %v1430_v47 = vpop.f32.mrb[36].mxu1  ;;  %v833_v27 = vpop.f32.mrb[37].mxu0 }
 0x140   :  { %v874_v48 = vadd.f32 %v1430_v47, %v777_v21  ;;  %v834_v30 = vadd.f32 %v833_v27, %v1819_v59  ;;  %v882_v49 = vadd.f32 %v881_v43, %v829_v36  ;;  %v865_v45 = vpop.f32.mrb[37].mxu1  ;;  %v1423_v51 = vpop.f32.mrb[38].mxu0 }
 0x141   :  { %v866_v52 = vadd.f32 %v865_v45, %v769_v2  ;;  %v845_v50 = vadd.f32 %v1423_v51, %v1827_v14  ;;  %v1431_v29 = vpop.f32.mrb[38].mxu1  ;;  %v836_v53 = vpop.f32.mrb[39].mxu0 }
 0x142   :  { %v883_v54 = vadd.f32 %v882_v49, %v834_v30  ;;  %v877_v32 = vadd.f32 %v1431_v29, %v780_v23  ;;  %v837_v55 = vadd.f32 %v836_v53, %v1821_v61  ;;  %v868_v56 = vpop.f32.mrb[39].mxu1 }
 0x143   :  { %v869_v57 = vadd.f32 %v868_v56, %v772_v4 }
 0x144   :  { %v884_v11 = vadd.f32 %v883_v54, %v837_v55 }
 0x146   :  { %v885_v58 = vadd.f32 %v884_v11, %v842_v46 }
 0x148   :  { %v886_v60 = vadd.f32 %v885_v58, %v845_v50 }
 0x14a   :  { %v887_v62 = vadd.f32 %v886_v60, %v850_v35 }
 0x14c   :  { %v888_v63 = vadd.f32 %v887_v62, %v853_v41 }
 0x14e   :  { %v889_v59 = vadd.f32 %v888_v63, %v858_v28 }
 0x150   :  { %v890_v0 = vadd.f32 %v889_v59, %v861_v39 }
 0x152   :  { %v891_v1 = vadd.f32 %v890_v0, %v866_v52 }
 0x154   :  { %v892_v3 = vadd.f32 %v891_v1, %v869_v57 }
 0x156   :  { %v893_v2 = vadd.f32 %v892_v3, %v874_v48 }
 0x158   :  { %v894_v5 = vadd.f32 %v893_v2, %v877_v32  ;;  %v960_v2 = vlaneseq }
 0x15a   :  { %v895_v14 = vrot.slane %v894_v5, 4 }
 0x15c   :  { %v896_v6 = vadd.f32 %v895_v14, %v894_v5  ;;  %v961_v5 = vshrl.u32 %v960_v2, 7  ;;  %v958_v14 = vld [vmem:[%s1961_s3] sm:$0x1] }
 0x15e   :  { %v897_v7 = vrot.slane %v896_v6, 2 }
 0x160   :  { %v898_v8 = vadd.f32 %v897_v7, %v896_v6  ;;  %v962_v6 = vsub.s32 0, %v961_v5 }
 0x162   :  { %v899_v9 = vrot.slane %v898_v8, 1 }
 0x164   :  { %v900_v10 = vadd.f32 %v899_v9, %v898_v8 }
 0x166   :  { %v901_v61 = vmul.f32 0.0078125, %v900_v10 }
 0x168   :  { %v1848_v12 = vsub.f32 %v818_v31, %v901_v61  ;;  %v1850_v4 = vsub.f32 %v821_v13, %v901_v61  ;;  %v1852_v15 = vsub.f32 %v826_v24, %v901_v61  ;;  %v1854_v16 = vsub.f32 %v829_v36, %v901_v61 }
 0x169   :  { %v1856_v17 = vsub.f32 %v834_v30, %v901_v61  ;;  %v1858_v18 = vsub.f32 %v837_v55, %v901_v61  ;;  %v1860_v19 = vsub.f32 %v842_v46, %v901_v61  ;;  %v1862_v20 = vsub.f32 %v845_v50, %v901_v61 }
 0x16a   :  { %v1864_v21 = vsub.f32 %v850_v35, %v901_v61  ;;  %v1866_v22 = vsub.f32 %v853_v41, %v901_v61  ;;  %v1868_v23 = vsub.f32 %v858_v28, %v901_v61  ;;  %v1870_v25 = vsub.f32 %v861_v39, %v901_v61 }
 0x16b   :  { %v1872_v24 = vsub.f32 %v866_v52, %v901_v61  ;;  %v1874_v26 = vsub.f32 %v869_v57, %v901_v61  ;;  %v1876_v31 = vsub.f32 %v874_v48, %v901_v61  ;;  %v1878_v33 = vsub.f32 %v877_v32, %v901_v61 }
 0x16c   :  { %v918_v34 = vmul.f32 %v1848_v12, %v1848_v12  ;;  %v919_v35 = vmul.f32 %v1850_v4, %v1850_v4  ;;  %v920_v28 = vmul.f32 %v1852_v15, %v1852_v15  ;;  %v921_v37 = vmul.f32 %v1854_v16, %v1854_v16 }
 0x16d   :  { %v922_v39 = vmul.f32 %v1856_v17, %v1856_v17  ;;  %v923_v40 = vmul.f32 %v1858_v18, %v1858_v18  ;;  %v924_v42 = vmul.f32 %v1860_v19, %v1860_v19  ;;  %v925_v44 = vmul.f32 %v1862_v20, %v1862_v20 }
 0x16e   :  { %v934_v36 = vadd.f32 %v919_v35, %v918_v34  ;;  %v926_v47 = vmul.f32 %v1864_v21, %v1864_v21  ;;  %v927_v48 = vmul.f32 %v1866_v22, %v1866_v22  ;;  %v928_v49 = vmul.f32 %v1868_v23, %v1868_v23 }
 0x16f   :  { %v929_v51 = vmul.f32 %v1870_v25, %v1870_v25  ;;  %v930_v50 = vmul.f32 %v1872_v24, %v1872_v24  ;;  %v931_v53 = vmul.f32 %v1874_v26, %v1874_v26  ;;  %v932_v32 = vmul.f32 %v1876_v31, %v1876_v31 }
 0x170   :  { %v935_v38 = vadd.f32 %v934_v36, %v920_v28  ;;  %v933_v56 = vmul.f32 %v1878_v33, %v1878_v33 }
 0x172   :  { %v936_v13 = vadd.f32 %v935_v38, %v921_v37 }
 0x174   :  { %v937_v41 = vadd.f32 %v936_v13, %v922_v39  ;;  %v1188_v39 = vld [vmem:[%s1962_s4] ss:$0 sm:$0xff] }
 0x176   :  { %v938_v43 = vadd.f32 %v937_v41, %v923_v40 }
 0x178   :  { %v939_v46 = vadd.f32 %v938_v43, %v924_v42 }
 0x17a   :  { %v940_v27 = vadd.f32 %v939_v46, %v925_v44 }
 0x17c   :  { %v941_v30 = vadd.f32 %v940_v27, %v926_v47 }
 0x17e   :  { %v942_v45 = vadd.f32 %v941_v30, %v927_v48 }
 0x180   :  { %v943_v52 = vadd.f32 %v942_v45, %v928_v49 }
 0x182   :  { %v944_v29 = vadd.f32 %v943_v52, %v929_v51 }
 0x184   :  { %v945_v54 = vadd.f32 %v944_v29, %v930_v50 }
 0x186   :  { %v946_v55 = vadd.f32 %v945_v54, %v931_v53 }
 0x188   :  { %v947_v57 = vadd.f32 %v946_v55, %v932_v32 }
 0x18a   :  { %v948_v11 = vadd.f32 %v947_v57, %v933_v56 }
 0x18c   :  { %v949_v58 = vrot.slane %v948_v11, 4 }
 0x18e   :  { %v950_v60 = vadd.f32 %v949_v58, %v948_v11 }
 0x190   :  { %v951_v62 = vrot.slane %v950_v60, 2 }
 0x192   :  { %v952_v63 = vadd.f32 %v951_v62, %v950_v60 }
 0x194   :  { %v953_v59 = vrot.slane %v952_v63, 1 }
 0x196   :  { %v954_v0 = vadd.f32 %v953_v59, %v952_v63 }
 0x198   :  { %v955_v1 = vmul.f32 0.0078125, %v954_v0 }
 0x19a   :  { %v956_v3 = vadd.f32 1e-05, %v955_v1 }
 0x19c   :  { %1532 = vrsqrt.f32 %v956_v3 }
 0x1a6   :  { %v1533_v7 = vpop.eup %1532 }
 0x1a7   :  { %v959_v8 = vmul.f32 %v1533_v7, %v958_v14 }
 0x1a9   :  { %v963_v9 = vrot.slane %v959_v8, %v962_v6 }
 0x1ab   :  { %v964_v10 = vmul.f32 %v963_v9, %v1848_v12  ;;  %v965_v61 = vmul.f32 %v963_v9, %v1850_v4  ;;  %v966_v34 = vmul.f32 %v963_v9, %v1852_v15  ;;  %v967_v35 = vmul.f32 %v963_v9, %v1854_v16 }
 0x1ac   :  { %v968_v28 = vmul.f32 %v963_v9, %v1856_v17  ;;  %v969_v36 = vmul.f32 %v963_v9, %v1858_v18  ;;  %v970_v37 = vmul.f32 %v963_v9, %v1860_v19  ;;  %v971_v38 = vmul.f32 %v963_v9, %v1862_v20 }
 0x1ad   :  { %v972_v12 = vmul.f32 %v963_v9, %v1864_v21  ;;  %v973_v4 = vmul.f32 %v963_v9, %v1866_v22  ;;  %v974_v15 = vmul.f32 %v963_v9, %v1868_v23  ;;  %v975_v16 = vmul.f32 %v963_v9, %v1870_v25 }
 0x1ae   :  { %v976_v17 = vmul.f32 %v963_v9, %v1872_v24  ;;  %v977_v18 = vmul.f32 %v963_v9, %v1874_v26  ;;  %v978_v19 = vmul.f32 %v963_v9, %v1876_v31  ;;  %v979_v20 = vmul.f32 %v963_v9, %v1878_v33 }
 0x1af   :  { %v987_v13 = vadd.f32 %v1188_v39, %v964_v10  ;;  %v988_v40 = vadd.f32 %v1188_v39, %v965_v61  ;;  %v989_v41 = vadd.f32 %v1188_v39, %v966_v34  ;;  %v990_v42 = vadd.f32 %v1188_v39, %v967_v35 }
 0x1b0   :  { %v991_v43 = vadd.f32 %v1188_v39, %v968_v28  ;;  %v992_v21 = vadd.f32 %v1188_v39, %v969_v36  ;;  %v993_v44 = vadd.f32 %v1188_v39, %v970_v37  ;;  %v994_v22 = vadd.f32 %v1188_v39, %v971_v38 }
 0x1b1   :  { %v995_v46 = vadd.f32 %v1188_v39, %v972_v12  ;;  %v996_v23 = vadd.f32 %v1188_v39, %v973_v4  ;;  %v997_v47 = vadd.f32 %v1188_v39, %v974_v15  ;;  %v998_v25 = vadd.f32 %v1188_v39, %v975_v16 }
 0x1b2   :  { %v999_v27 = vadd.f32 %v1188_v39, %v976_v17  ;;  %v1000_v24 = vadd.f32 %v1188_v39, %v977_v18  ;;  %v1001_v48 = vadd.f32 %v1188_v39, %v978_v19  ;;  %v1002_v26 = vadd.f32 %v1188_v39, %v979_v20 }
 0x1b3   :  { %v1003_v30 = vmax.f32 %v987_v13, 0.0  ;;  %v1004_v31 = vmax.f32 %v988_v40, 0.0  ;;  %v1005_v49 = vmax.f32 %v989_v41, 0.0  ;;  %v1006_v33 = vmax.f32 %v990_v42, 0.0 }
 0x1b4   :  { %v1007_v45 = vmax.f32 %v991_v43, 0.0  ;;  %v1008_v51 = vmax.f32 %v992_v21, 0.0  ;;  %v1009_v52 = vmax.f32 %v993_v44, 0.0  ;;  %v1010_v50 = vmax.f32 %v994_v22, 0.0 }
 0x1b5   :  { %v1011_v29 = vmax.f32 %v995_v46, 0.0  ;;  %v1012_v53 = vmax.f32 %v996_v23, 0.0  ;;  %v1013_v54 = vmax.f32 %v997_v47, 0.0  ;;  %v1014_v32 = vmax.f32 %v998_v25, 0.0 }
 0x1b6   :  { %v1015_v55 = vmax.f32 %v999_v27, 0.0  ;;  %v1016_v56 = vmax.f32 %v1000_v24, 0.0  ;;  %v1017_v57 = vmax.f32 %v1001_v48, 0.0  ;;  %v1018_v11 = vmax.f32 %v1002_v26, 0.0 }
 0x1b7   :  { %v1224_v58 = vpack.c.bf16 %v1004_v31, %v1003_v30  ;;  %v1229_v60 = vpack.c.bf16 %v1006_v33, %v1005_v49  ;;  %v1234_v62 = vpack.c.bf16 %v1008_v51, %v1007_v45  ;;  %v1239_v63 = vpack.c.bf16 %v1010_v50, %v1009_v52 }
 0x1b8   :  { %v1244_v59 = vpack.c.bf16 %v1012_v53, %v1011_v29  ;;  %v1249_v0 = vpack.c.bf16 %v1014_v32, %v1013_v54  ;;  %v1254_v1 = vpack.c.bf16 %v1016_v56, %v1015_v55  ;;  %v1259_v3 = vpack.c.bf16 %v1018_v11, %v1017_v57 }
 0x1b9   :  { %1225 = vst [vmem:[%s1963_s5] sm:$0xff] %v1224_v58   ;;  %1261 = vst [vmem:[%s1963_s5 + $0x8] sm:$0xff] %v1229_v60  }
 0x1ba   :  { %1262 = vst [vmem:[%s1963_s5 + $0x10] sm:$0xff] %v1234_v62   ;;  %1263 = vst [vmem:[%s1963_s5 + $0x18] sm:$0xff] %v1239_v63  }
 0x1bb   :  { %1264 = vst [vmem:[%s1963_s5 + $0x20] sm:$0xff] %v1244_v59   ;;  %1265 = vst [vmem:[%s1963_s5 + $0x28] sm:$0xff] %v1249_v0  }
 0x1bc   :  { %1266 = vst [vmem:[%s1963_s5 + $0x30] sm:$0xff] %v1254_v1   ;;  %1267 = vst [vmem:[%s1963_s5 + $0x38] sm:$0xff] %v1259_v3  }

// kernel: encoder_forward.7
= control target key start
LH: loop header
LB: loop body
LE: loop exit
PB: predicated region body
PF: predicated region fallthrough
CT: control target
= control target key end

     0   :  { %s2431_s1 = inlined_call_operand.vmem [shape: bf16[1152,256], index: 1, kind: input, shape index: {}]   ;;  %s2432_s0 = inlined_call_operand.vmem [shape: bf16[32,1152], index: 0, kind: input, shape index: {}]   ;;  %s2433_s2 = inlined_call_operand.vmem [shape: f32[1,256], index: 2, kind: input, shape index: {}]   ;;  %s2434_s3 = inlined_call_operand.vmem [shape: f32[1,256], index: 3, kind: input, shape index: {}]   ;;  %s2435_s4 = inlined_call_operand.vmem [shape: f32[1,256], index: 4, kind: input, shape index: {}]   ;;  %s2436_s5 = inlined_call_operand.vmem [shape: f32[32,256], index: 5, kind: output, shape index: {}]  }
   0x1   :  { %v1623_v0 = vld [vmem:[%s2431_s1 + $0x4] ss:$8 sps:$4 sm:$0xff]   ;;  %v1627_v2 = vld [vmem:[%s2431_s1] ss:$8 sps:$4 sm:$0xff]   ;;  %v1629_v4 = vld [vmem:[%s2431_s1 + $0x14] ss:$8 sps:$4 sm:$0xff]  }
   0x2   :  { %v1625_v1 = vld [vmem:[%s2431_s1 + $0x204] ss:$8 sps:$4 sm:$0xff]   ;;  %1009 = vmatprep.subr.bf16.mxu1 %v1623_v0  ;;  %v1628_v3 = vld [vmem:[%s2431_s1 + $0x200] ss:$8 sps:$4 sm:$0xff]   ;;  %v1631_v5 = vld [vmem:[%s2431_s1 + $0x214] ss:$8 sps:$4 sm:$0xff]  }
   0x3   :  { %1115 = vmatprep.subr.bf16.mxu0 %v1625_v1  ;;  %1010 = vmatpush1.bf16.msra.mxu1 %v1627_v2  ;;  %v1633_v6 = vld [vmem:[%s2431_s1 + $0x10] ss:$8 sps:$4 sm:$0xff]   ;;  %v1635_v8 = vld [vmem:[%s2431_s1 + $0x24] ss:$8 sps:$4 sm:$0xff]   ;;  %v1639_v10 = vld [vmem:[%s2431_s1 + $0x20] ss:$8 sps:$4 sm:$0xff]  }
   0x4   :  { %1116 = vmatpush1.bf16.msra.mxu0 %v1628_v3  ;;  %1011 = vmatprep.subr.bf16.mxu1 %v1629_v4  ;;  %v1634_v7 = vld [vmem:[%s2431_s1 + $0x210] ss:$8 sps:$4 sm:$0xff]   ;;  %v1637_v9 = vld [vmem:[%s2431_s1 + $0x224] ss:$8 sps:$4 sm:$0xff]   ;;  %v1640_v11 = vld [vmem:[%s2431_s1 + $0x220] ss:$8 sps:$4 sm:$0xff]  }
   0x5   :  { %1117 = vmatprep.subr.bf16.mxu0 %v1631_v5  ;;  %v1641_v12 = vld [vmem:[%s2431_s1 + $0x34] ss:$8 sps:$4 sm:$0xff]   ;;  %v1645_v14 = vld [vmem:[%s2431_s1 + $0x30] ss:$8 sps:$4 sm:$0xff]   ;;  %v1647_v16 = vld [vmem:[%s2431_s1 + $0x44] ss:$8 sps:$4 sm:$0xff]  }
   0x6   :  { %v1643_v13 = vld [vmem:[%s2431_s1 + $0x234] ss:$8 sps:$4 sm:$0xff]   ;;  %v1646_v15 = vld [vmem:[%s2431_s1 + $0x230] ss:$8 sps:$4 sm:$0xff]   ;;  %v1649_v17 = vld [vmem:[%s2431_s1 + $0x244] ss:$8 sps:$4 sm:$0xff]  }
   0x7   :  { %1012 = vmatpush1.bf16.msra.mxu1 %v1633_v6  ;;  %v1651_v18 = vld [vmem:[%s2431_s1 + $0x40] ss:$8 sps:$4 sm:$0xff]   ;;  %v1653_v20 = vld [vmem:[%s2431_s1 + $0x54] ss:$8 sps:$4 sm:$0xff]   ;;  %v1657_v22 = vld [vmem:[%s2431_s1 + $0x50] ss:$8 sps:$4 sm:$0xff]  }
   0x8   :  { %1118 = vmatpush1.bf16.msra.mxu0 %v1634_v7  ;;  %1013 = vmatprep.subr.bf16.mxu1 %v1635_v8  ;;  %v1652_v19 = vld [vmem:[%s2431_s1 + $0x240] ss:$8 sps:$4 sm:$0xff]   ;;  %v1655_v21 = vld [vmem:[%s2431_s1 + $0x254] ss:$8 sps:$4 sm:$0xff]   ;;  %v1658_v23 = vld [vmem:[%s2431_s1 + $0x250] ss:$8 sps:$4 sm:$0xff]  }
   0x9   :  { %1119 = vmatprep.subr.bf16.mxu0 %v1637_v9  ;;  %v1659_v24 = vld [vmem:[%s2431_s1 + $0x64] ss:$8 sps:$4 sm:$0xff]   ;;  %v1663_v26 = vld [vmem:[%s2431_s1 + $0x60] ss:$8 sps:$4 sm:$0xff]   ;;  %v1665_v28 = vld [vmem:[%s2431_s1 + $0x74] ss:$8 sps:$4 sm:$0xff]  }
   0xa   :  { %v1661_v25 = vld [vmem:[%s2431_s1 + $0x264] ss:$8 sps:$4 sm:$0xff]   ;;  %v1664_v27 = vld [vmem:[%s2431_s1 + $0x260] ss:$8 sps:$4 sm:$0xff]   ;;  %v1667_v29 = vld [vmem:[%s2431_s1 + $0x274] ss:$8 sps:$4 sm:$0xff]  }
   0xb   :  { %1014 = vmatpush1.bf16.msra.mxu1 %v1639_v10  ;;  %v1669_v30 = vld [vmem:[%s2431_s1 + $0x70] ss:$8 sps:$4 sm:$0xff]   ;;  %v1671_v32 = vld [vmem:[%s2431_s1 + $0x84] ss:$8 sps:$4 sm:$0xff]   ;;  %v1675_v34 = vld [vmem:[%s2431_s1 + $0x80] ss:$8 sps:$4 sm:$0xff]  }
   0xc   :  { %1120 = vmatpush1.bf16.msra.mxu0 %v1640_v11  ;;  %1015 = vmatprep.subr.bf16.mxu1 %v1641_v12  ;;  %v1670_v31 = vld [vmem:[%s2431_s1 + $0x270] ss:$8 sps:$4 sm:$0xff]   ;;  %v1673_v33 = vld [vmem:[%s2431_s1 + $0x284] ss:$8 sps:$4 sm:$0xff]   ;;  %v1676_v35 = vld [vmem:[%s2431_s1 + $0x280] ss:$8 sps:$4 sm:$0xff]  }
   0xd   :  { %1121 = vmatprep.subr.bf16.mxu0 %v1643_v13  ;;  %v1677_v36 = vld [vmem:[%s2431_s1 + $0x94] ss:$8 sps:$4 sm:$0xff]   ;;  %v1681_v38 = vld [vmem:[%s2431_s1 + $0x90] ss:$8 sps:$4 sm:$0xff]   ;;  %v1683_v40 = vld [vmem:[%s2431_s1 + $0xa4] ss:$8 sps:$4 sm:$0xff]  }
   0xe   :  { %v1679_v37 = vld [vmem:[%s2431_s1 + $0x294] ss:$8 sps:$4 sm:$0xff]   ;;  %v1682_v39 = vld [vmem:[%s2431_s1 + $0x290] ss:$8 sps:$4 sm:$0xff]   ;;  %v1685_v41 = vld [vmem:[%s2431_s1 + $0x2a4] ss:$8 sps:$4 sm:$0xff]  }
   0xf   :  { %1016 = vmatpush1.bf16.msra.mxu1 %v1645_v14  ;;  %v1687_v42 = vld [vmem:[%s2431_s1 + $0xa0] ss:$8 sps:$4 sm:$0xff]   ;;  %v1689_v44 = vld [vmem:[%s2431_s1 + $0xb4] ss:$8 sps:$4 sm:$0xff]   ;;  %v1693_v46 = vld [vmem:[%s2431_s1 + $0xb0] ss:$8 sps:$4 sm:$0xff]  }
  0x10   :  { %1122 = vmatpush1.bf16.msra.mxu0 %v1646_v15  ;;  %1017 = vmatprep.subr.bf16.mxu1 %v1647_v16  ;;  %v1688_v43 = vld [vmem:[%s2431_s1 + $0x2a0] ss:$8 sps:$4 sm:$0xff]   ;;  %v1691_v45 = vld [vmem:[%s2431_s1 + $0x2b4] ss:$8 sps:$4 sm:$0xff]   ;;  %v1694_v47 = vld [vmem:[%s2431_s1 + $0x2b0] ss:$8 sps:$4 sm:$0xff]  }
  0x11   :  { %1123 = vmatprep.subr.bf16.mxu0 %v1649_v17  ;;  %v1721_v48 = vld [vmem:[%s2432_s0 + $0x4] ss:$36 sps:$4 sm:$0xff]   ;;  %v1727_v51 = vld [vmem:[%s2432_s0 + $0x14] ss:$36 sps:$4 sm:$0xff]  }
  0x12   :  { %v1695_v49 = vld [vmem:[%s2431_s1 + $0xc4] ss:$8 sps:$4 sm:$0xff]   ;;  %1041 = vmatprep.mubr.bf16.mxu1 %v1721_v48  ;;  %v1699_v52 = vld [vmem:[%s2431_s1 + $0xc0] ss:$8 sps:$4 sm:$0xff]   ;;  %v1701_v54 = vld [vmem:[%s2431_s1 + $0xd4] ss:$8 sps:$4 sm:$0xff]   ;;  %1147 = vmatprep.mubr.bf16.mxu0 %v1727_v51 }
  0x13   :  { %1018 = vmatpush1.bf16.msra.mxu1 %v1651_v18  ;;  %v1697_v50 = vld [vmem:[%s2431_s1 + $0x2c4] ss:$8 sps:$4 sm:$0xff]   ;;  %v1700_v53 = vld [vmem:[%s2431_s1 + $0x2c0] ss:$8 sps:$4 sm:$0xff]   ;;  %v1703_v55 = vld [vmem:[%s2431_s1 + $0x2d4] ss:$8 sps:$4 sm:$0xff]  }
  0x14   :  { %1124 = vmatpush1.bf16.msra.mxu0 %v1652_v19  ;;  %1019 = vmatprep.subr.bf16.mxu1 %v1653_v20  ;;  %v1705_v56 = vld [vmem:[%s2431_s1 + $0xd0] ss:$8 sps:$4 sm:$0xff]   ;;  %v1707_v58 = vld [vmem:[%s2431_s1 + $0xe4] ss:$8 sps:$4 sm:$0xff]   ;;  %v1711_v60 = vld [vmem:[%s2431_s1 + $0xe0] ss:$8 sps:$4 sm:$0xff]  }
  0x15   :  { %1125 = vmatprep.subr.bf16.mxu0 %v1655_v21  ;;  %v1706_v57 = vld [vmem:[%s2431_s1 + $0x2d0] ss:$8 sps:$4 sm:$0xff]   ;;  %v1709_v59 = vld [vmem:[%s2431_s1 + $0x2e4] ss:$8 sps:$4 sm:$0xff]   ;;  %v1712_v61 = vld [vmem:[%s2431_s1 + $0x2e0] ss:$8 sps:$4 sm:$0xff]  }
  0x16   :  { %v1713_v62 = vld [vmem:[%s2431_s1 + $0xf4] ss:$8 sps:$4 sm:$0xff]   ;;  %v1717_v0 = vld [vmem:[%s2431_s1 + $0xf0] ss:$8 sps:$4 sm:$0xff]   ;;  %v1724_v2 = vld [vmem:[%s2431_s1 + $0x104] ss:$8 sps:$4 sm:$0xff]  }
  0x17   :  { %1020 = vmatpush1.bf16.msra.mxu1 %v1657_v22  ;;  %v1715_v63 = vld [vmem:[%s2431_s1 + $0x2f4] ss:$8 sps:$4 sm:$0xff]   ;;  %v1718_v1 = vld [vmem:[%s2431_s1 + $0x2f0] ss:$8 sps:$4 sm:$0xff]   ;;  %v1730_v3 = vld [vmem:[%s2431_s1 + $0x304] ss:$8 sps:$4 sm:$0xff]  }
  0x18   :  { %1126 = vmatpush1.bf16.msra.mxu0 %v1658_v23  ;;  %1021 = vmatprep.subr.bf16.mxu1 %v1659_v24  ;;  %v1719_v4 = vld [vmem:[%s2432_s0] ss:$36 sps:$4 sm:$0xff]   ;;  %v1725_v6 = vld [vmem:[%s2432_s0 + $0x10] ss:$36 sps:$4 sm:$0xff]  }
  0x19   :  { %1127 = vmatprep.subr.bf16.mxu0 %v1661_v25  ;;  %v1722_v5 = vld [vmem:[%s2431_s1 + $0x100] ss:$8 sps:$4 sm:$0xff]   ;;  %v1733_v8 = vld [vmem:[%s2431_s1 + $0x114] ss:$8 sps:$4 sm:$0xff]   ;;  %v1731_v10 = vld [vmem:[%s2431_s1 + $0x110] ss:$8 sps:$4 sm:$0xff]  }
  0x1a   :  { %v1728_v7 = vld [vmem:[%s2431_s1 + $0x300] ss:$8 sps:$4 sm:$0xff]   ;;  %v1736_v9 = vld [vmem:[%s2431_s1 + $0x314] ss:$8 sps:$4 sm:$0xff]   ;;  %v1734_v11 = vld [vmem:[%s2431_s1 + $0x310] ss:$8 sps:$4 sm:$0xff]  }
  0x1b   :  { %1022 = vmatpush1.bf16.msra.mxu1 %v1663_v26  ;;  %v1739_v12 = vld [vmem:[%s2431_s1 + $0x124] ss:$8 sps:$4 sm:$0xff]   ;;  %v1737_v14 = vld [vmem:[%s2431_s1 + $0x120] ss:$8 sps:$4 sm:$0xff]   ;;  %v1745_v16 = vld [vmem:[%s2431_s1 + $0x134] ss:$8 sps:$4 sm:$0xff]  }
  0x1c   :  { %1128 = vmatpush1.bf16.msra.mxu0 %v1664_v27  ;;  %1023 = vmatprep.subr.bf16.mxu1 %v1665_v28  ;;  %v1742_v13 = vld [vmem:[%s2431_s1 + $0x324] ss:$8 sps:$4 sm:$0xff]   ;;  %v1740_v15 = vld [vmem:[%s2431_s1 + $0x320] ss:$8 sps:$4 sm:$0xff]   ;;  %v1748_v17 = vld [vmem:[%s2431_s1 + $0x334] ss:$8 sps:$4 sm:$0xff]  }
  0x1d   :  { %1129 = vmatprep.subr.bf16.mxu0 %v1667_v29  ;;  %v1743_v18 = vld [vmem:[%s2431_s1 + $0x130] ss:$8 sps:$4 sm:$0xff]   ;;  %v1751_v20 = vld [vmem:[%s2431_s1 + $0x144] ss:$8 sps:$4 sm:$0xff]   ;;  %v1749_v22 = vld [vmem:[%s2431_s1 + $0x140] ss:$8 sps:$4 sm:$0xff]  }
  0x1e   :  { %v1746_v19 = vld [vmem:[%s2431_s1 + $0x330] ss:$8 sps:$4 sm:$0xff]   ;;  %v1754_v21 = vld [vmem:[%s2431_s1 + $0x344] ss:$8 sps:$4 sm:$0xff]   ;;  %v1752_v23 = vld [vmem:[%s2431_s1 + $0x340] ss:$8 sps:$4 sm:$0xff]  }
  0x1f   :  { %1024 = vmatpush1.bf16.msra.mxu1 %v1669_v30  ;;  %v1757_v24 = vld [vmem:[%s2431_s1 + $0x154] ss:$8 sps:$4 sm:$0xff]   ;;  %v1755_v26 = vld [vmem:[%s2431_s1 + $0x150] ss:$8 sps:$4 sm:$0xff]   ;;  %v1763_v28 = vld [vmem:[%s2431_s1 + $0x164] ss:$8 sps:$4 sm:$0xff]  }
  0x20   :  { %1130 = vmatpush1.bf16.msra.mxu0 %v1670_v31  ;;  %1025 = vmatprep.subr.bf16.mxu1 %v1671_v32  ;;  %v1760_v25 = vld [vmem:[%s2431_s1 + $0x354] ss:$8 sps:$4 sm:$0xff]   ;;  %v1758_v27 = vld [vmem:[%s2431_s1 + $0x350] ss:$8 sps:$4 sm:$0xff]   ;;  %v1813_v31 = vld [vmem:[%s2432_s0 + $0x48] ss:$36 sps:$4 sm:$0xff]  }
  0x21   :  { %1131 = vmatprep.subr.bf16.mxu0 %v1673_v33  ;;  %v1809_v29 = vld [vmem:[%s2432_s0 + $0x4c] ss:$36 sps:$4 sm:$0xff]   ;;  %v1811_v30 = vld [vmem:[%s2432_s0 + $0x5c] ss:$36 sps:$4 sm:$0xff]  }
  0x22   :  { %v1766_v32 = vld [vmem:[%s2431_s1 + $0x364] ss:$8 sps:$4 sm:$0xff]   ;;  %v1817_v33 = vld [vmem:[%s2432_s0 + $0x58] ss:$36 sps:$4 sm:$0xff]  }
  0x23   :  { %1026 = vmatpush1.bf16.msra.mxu1 %v1675_v34  ;;  %v1761_v34 = vld [vmem:[%s2431_s1 + $0x160] ss:$8 sps:$4 sm:$0xff]   ;;  %v1779_v48 = vld [vmem:[%s2431_s1 + $0x190] ss:$8 sps:$4 sm:$0xff]   ;;  %v1790_v51 = vld [vmem:[%s2431_s1 + $0x3a4] ss:$8 sps:$4 sm:$0xff]  }
  0x24   :  { %1132 = vmatpush1.bf16.msra.mxu0 %v1676_v35  ;;  %1027 = vmatprep.subr.bf16.mxu1 %v1677_v36  ;;  %v1764_v35 = vld [vmem:[%s2431_s1 + $0x360] ss:$8 sps:$4 sm:$0xff]   ;;  %v1769_v36 = vld [vmem:[%s2431_s1 + $0x174] ss:$8 sps:$4 sm:$0xff]  }
  0x25   :  { %1133 = vmatprep.subr.bf16.mxu0 %v1679_v37  ;;  %v1772_v37 = vld [vmem:[%s2431_s1 + $0x374] ss:$8 sps:$4 sm:$0xff]  }
  0x27   :  { %1028 = vmatpush1.bf16.msra.mxu1 %v1681_v38  ;;  %v1767_v38 = vld [vmem:[%s2431_s1 + $0x170] ss:$8 sps:$4 sm:$0xff]  }
  0x28   :  { %1134 = vmatpush1.bf16.msra.mxu0 %v1682_v39  ;;  %1029 = vmatprep.subr.bf16.mxu1 %v1683_v40  ;;  %v1770_v39 = vld [vmem:[%s2431_s1 + $0x370] ss:$8 sps:$4 sm:$0xff]   ;;  %v1775_v40 = vld [vmem:[%s2431_s1 + $0x184] ss:$8 sps:$4 sm:$0xff]  }
  0x29   :  { %1135 = vmatprep.subr.bf16.mxu0 %v1685_v41  ;;  %v1829_v41 = vld [vmem:[%s2432_s0 + $0xc] ss:$36 sps:$4 sm:$0xff]  }
  0x2b   :  { %1030 = vmatpush1.bf16.msra.mxu1 %v1687_v42  ;;  %v1778_v42 = vld [vmem:[%s2431_s1 + $0x384] ss:$8 sps:$4 sm:$0xff]  }
  0x2c   :  { %1136 = vmatpush1.bf16.msra.mxu0 %v1688_v43  ;;  %1031 = vmatprep.subr.bf16.mxu1 %v1689_v44  ;;  %v1832_v43 = vld [vmem:[%s2432_s0 + $0x1c] ss:$36 sps:$4 sm:$0xff]  }
  0x2d   :  { %1137 = vmatprep.subr.bf16.mxu0 %v1691_v45  ;;  %v1773_v44 = vld [vmem:[%s2431_s1 + $0x180] ss:$8 sps:$4 sm:$0xff]  }
  0x2e   :  { %v1776_v45 = vld [vmem:[%s2431_s1 + $0x380] ss:$8 sps:$4 sm:$0xff]  }
  0x2f   :  { %1032 = vmatpush1.bf16.msra.mxu1 %v1693_v46  ;;  %v1781_v46 = vld [vmem:[%s2431_s1 + $0x194] ss:$8 sps:$4 sm:$0xff]  }
  0x30   :  { %1138 = vmatpush1.bf16.msra.mxu0 %v1694_v47  ;;  %1033 = vmatprep.subr.bf16.mxu1 %v1695_v49  ;;  %v1784_v47 = vld [vmem:[%s2431_s1 + $0x394] ss:$8 sps:$4 sm:$0xff]   ;;  %v1782_v49 = vld [vmem:[%s2431_s1 + $0x390] ss:$8 sps:$4 sm:$0xff]  }
  0x31   :  { %1139 = vmatprep.subr.bf16.mxu0 %v1697_v50  ;;  %v1787_v50 = vld [vmem:[%s2431_s1 + $0x1a4] ss:$8 sps:$4 sm:$0xff]  }
  0x33   :  { %1034 = vmatpush1.bf16.msra.mxu1 %v1699_v52  ;;  %v1785_v52 = vld [vmem:[%s2431_s1 + $0x1a0] ss:$8 sps:$4 sm:$0xff]  }
  0x34   :  { %1140 = vmatpush1.bf16.msra.mxu0 %v1700_v53  ;;  %1035 = vmatprep.subr.bf16.mxu1 %v1701_v54  ;;  %v1788_v53 = vld [vmem:[%s2431_s1 + $0x3a0] ss:$8 sps:$4 sm:$0xff]   ;;  %v1793_v54 = vld [vmem:[%s2431_s1 + $0x1b4] ss:$8 sps:$4 sm:$0xff]  }
  0x35   :  { %1141 = vmatprep.subr.bf16.mxu0 %v1703_v55  ;;  %v1796_v55 = vld [vmem:[%s2431_s1 + $0x3b4] ss:$8 sps:$4 sm:$0xff]  }
  0x37   :  { %1036 = vmatpush1.bf16.msra.mxu1 %v1705_v56  ;;  %v1791_v56 = vld [vmem:[%s2431_s1 + $0x1b0] ss:$8 sps:$4 sm:$0xff]  }
  0x38   :  { %1142 = vmatpush1.bf16.msra.mxu0 %v1706_v57  ;;  %1037 = vmatprep.subr.bf16.mxu1 %v1707_v58  ;;  %v1794_v57 = vld [vmem:[%s2431_s1 + $0x3b0] ss:$8 sps:$4 sm:$0xff]   ;;  %v1799_v58 = vld [vmem:[%s2431_s1 + $0x1c4] ss:$8 sps:$4 sm:$0xff]  }
  0x39   :  { %1143 = vmatprep.subr.bf16.mxu0 %v1709_v59  ;;  %v1802_v59 = vld [vmem:[%s2431_s1 + $0x3c4] ss:$8 sps:$4 sm:$0xff]  }
  0x3b   :  { %1038 = vmatpush1.bf16.msra.mxu1 %v1711_v60  ;;  %v1797_v60 = vld [vmem:[%s2431_s1 + $0x1c0] ss:$8 sps:$4 sm:$0xff]  }
  0x3c   :  { %1144 = vmatpush1.bf16.msra.mxu0 %v1712_v61  ;;  %1039 = vmatprep.subr.bf16.mxu1 %v1713_v62  ;;  %v1800_v61 = vld [vmem:[%s2431_s1 + $0x3c0] ss:$8 sps:$4 sm:$0xff]   ;;  %v1805_v62 = vld [vmem:[%s2431_s1 + $0x1d4] ss:$8 sps:$4 sm:$0xff]  }
  0x3d   :  { %1145 = vmatprep.subr.bf16.mxu0 %v1715_v63  ;;  %v1808_v63 = vld [vmem:[%s2431_s1 + $0x3d4] ss:$8 sps:$4 sm:$0xff]  }
  0x3f   :  { %1040 = vmatpush1.bf16.msra.mxu1 %v1717_v0  ;;  %v1803_v0 = vld [vmem:[%s2431_s1 + $0x1d0] ss:$8 sps:$4 sm:$0xff]  }
  0x40   :  { %1146 = vmatpush1.bf16.msra.mxu0 %v1718_v1  ;;  %1062 = vmatprep.subr.bf16.mxu1 %v1724_v2  ;;  %v1806_v1 = vld [vmem:[%s2431_s1 + $0x3d0] ss:$8 sps:$4 sm:$0xff]   ;;  %v1816_v2 = vld [vmem:[%s2431_s1 + $0x1e4] ss:$8 sps:$4 sm:$0xff]  }
  0x41   :  { %1168 = vmatprep.subr.bf16.mxu0 %v1730_v3  ;;  %v1820_v3 = vld [vmem:[%s2431_s1 + $0x3e4] ss:$8 sps:$4 sm:$0xff]  }
  0x42   :  { %1042 = vmatmul.mubr.bf16.vlgmr.msra.gmra.mrb[0].mxu1 %v1719_v4  ;;  %v1814_v4 = vld [vmem:[%s2431_s1 + $0x1e0] ss:$8 sps:$4 sm:$0xff]  }
  0x43   :  { %1148 = vmatmul.mubr.bf16.vlgmr.msra.gmra.mrb[0].mxu0 %v1725_v6  ;;  %1063 = vmatpush1.bf16.msra.mxu1 %v1722_v5  ;;  %v1818_v5 = vld [vmem:[%s2431_s1 + $0x3e0] ss:$8 sps:$4 sm:$0xff]   ;;  %v1823_v6 = vld [vmem:[%s2431_s1 + $0x1f4] ss:$8 sps:$4 sm:$0xff]  }
  0x44   :  { %1169 = vmatpush1.bf16.msra.mxu0 %v1728_v7  ;;  %1064 = vmatprep.subr.bf16.mxu1 %v1733_v8  ;;  %v1826_v7 = vld [vmem:[%s2431_s1 + $0x3f4] ss:$8 sps:$4 sm:$0xff]   ;;  %v1821_v8 = vld [vmem:[%s2431_s1 + $0x1f0] ss:$8 sps:$4 sm:$0xff]  }
  0x45   :  { %1170 = vmatprep.subr.bf16.mxu0 %v1736_v9  ;;  %1051 = vmatprep.mubr.bf16.mxu1 %v1809_v29  ;;  %v1824_v9 = vld [vmem:[%s2431_s1 + $0x3f0] ss:$8 sps:$4 sm:$0xff]   ;;  %v1859_v29 = vld [vmem:[%s2431_s1 + $0x464] ss:$8 sps:$4 sm:$0xff]  }
  0x46   :  { %1157 = vmatprep.mubr.bf16.mxu0 %v1811_v30  ;;  %v1857_v30 = vld [vmem:[%s2431_s1 + $0x460] ss:$8 sps:$4 sm:$0xff]  }
  0x47   :  { %1065 = vmatpush1.bf16.msra.mxu1 %v1731_v10  ;;  %v1835_v10 = vld [vmem:[%s2431_s1 + $0x404] ss:$8 sps:$4 sm:$0xff]  }
  0x48   :  { %1171 = vmatpush1.bf16.msra.mxu0 %v1734_v11  ;;  %1066 = vmatprep.subr.bf16.mxu1 %v1739_v12  ;;  %v1827_v11 = vld [vmem:[%s2432_s0 + $0x8] ss:$36 sps:$4 sm:$0xff]   ;;  %v1830_v12 = vld [vmem:[%s2432_s0 + $0x18] ss:$36 sps:$4 sm:$0xff]  }
  0x49   :  { %1172 = vmatprep.subr.bf16.mxu0 %v1742_v13  ;;  %v1833_v13 = vld [vmem:[%s2431_s1 + $0x400] ss:$8 sps:$4 sm:$0xff]  }
  0x4a   :  { %1052 = vmatmul.mubr.bf16.gmra.mrb[4].mxu1 %v1813_v31  ;;  %v1862_v31 = vld [vmem:[%s2431_s1 + $0x474] ss:$8 sps:$4 sm:$0xff]  }
  0x4b   :  { %1067 = vmatpush1.bf16.msra.mxu1 %v1737_v14  ;;  %1158 = vmatmul.mubr.bf16.gmra.mrb[4].mxu0 %v1817_v33  ;;  %v1838_v14 = vld [vmem:[%s2431_s1 + $0x414] ss:$8 sps:$4 sm:$0xff]   ;;  %v1863_v33 = vld [vmem:[%s2432_s0 + $0x20] ss:$36 sps:$4 sm:$0xff]  }
  0x4c   :  { %1173 = vmatpush1.bf16.msra.mxu0 %v1740_v15  ;;  %1068 = vmatprep.subr.bf16.mxu1 %v1745_v16  ;;  %v1839_v15 = vld [vmem:[%s2432_s0 + $0x54] ss:$36 sps:$4 sm:$0xff]   ;;  %v1841_v16 = vld [vmem:[%s2432_s0 + $0x64] ss:$36 sps:$4 sm:$0xff]  }
  0x4d   :  { %1174 = vmatprep.subr.bf16.mxu0 %v1748_v17  ;;  %1094 = vmatprep.mubr.bf16.mxu1 %v1829_v41  ;;  %v1836_v17 = vld [vmem:[%s2431_s1 + $0x410] ss:$8 sps:$4 sm:$0xff]  }
  0x4e   :  { %1200 = vmatprep.mubr.bf16.mxu0 %v1832_v43 }
  0x4f   :  { %1069 = vmatpush1.bf16.msra.mxu1 %v1743_v18  ;;  %v1847_v18 = vld [vmem:[%s2431_s1 + $0x424] ss:$8 sps:$4 sm:$0xff]  }
  0x50   :  { %1175 = vmatpush1.bf16.msra.mxu0 %v1746_v19  ;;  %1070 = vmatprep.subr.bf16.mxu1 %v1751_v20  ;;  %v1843_v19 = vld [vmem:[%s2432_s0 + $0x50] ss:$36 sps:$4 sm:$0xff]   ;;  %v1844_v20 = vld [vmem:[%s2432_s0 + $0x60] ss:$36 sps:$4 sm:$0xff]  }
  0x51   :  { %1176 = vmatprep.subr.bf16.mxu0 %v1754_v21  ;;  %v1845_v21 = vld [vmem:[%s2431_s1 + $0x420] ss:$8 sps:$4 sm:$0xff]  }
  0x53   :  { %1071 = vmatpush1.bf16.msra.mxu1 %v1749_v22  ;;  %v1850_v22 = vld [vmem:[%s2431_s1 + $0x434] ss:$8 sps:$4 sm:$0xff]  }
  0x54   :  { %1177 = vmatpush1.bf16.msra.mxu0 %v1752_v23  ;;  %1072 = vmatprep.subr.bf16.mxu1 %v1757_v24  ;;  %v1848_v23 = vld [vmem:[%s2431_s1 + $0x430] ss:$8 sps:$4 sm:$0xff]   ;;  %v1853_v24 = vld [vmem:[%s2431_s1 + $0x444] ss:$8 sps:$4 sm:$0xff]  }
  0x55   :  { %1178 = vmatprep.subr.bf16.mxu0 %v1760_v25  ;;  %v1869_v25 = vmov 0  }
  0x57   :  { %1073 = vmatpush1.bf16.msra.mxu1 %v1755_v26  ;;  %v1851_v26 = vld [vmem:[%s2431_s1 + $0x440] ss:$8 sps:$4 sm:$0xff]  }
  0x58   :  { %1179 = vmatpush1.bf16.msra.mxu0 %v1758_v27  ;;  %1074 = vmatprep.subr.bf16.mxu1 %v1763_v28  ;;  %v1856_v27 = vld [vmem:[%s2431_s1 + $0x454] ss:$8 sps:$4 sm:$0xff]   ;;  %v1854_v28 = vld [vmem:[%s2431_s1 + $0x450] ss:$8 sps:$4 sm:$0xff]  }
  0x59   :  { %1180 = vmatprep.subr.bf16.mxu0 %v1766_v32  ;;  %v1860_v32 = vld [vmem:[%s2431_s1 + $0x470] ss:$8 sps:$4 sm:$0xff]  }
  0x5b   :  { %1075 = vmatpush1.bf16.msra.mxu1 %v1761_v34  ;;  %v1864_v34 = vld [vmem:[%s2432_s0 + $0x68] ss:$36 sps:$4 sm:$0xff]  }
  0x5c   :  { %1181 = vmatpush1.bf16.msra.mxu0 %v1764_v35  ;;  %1076 = vmatprep.subr.bf16.mxu1 %v1769_v36  ;;  %v187_v35 = vlaneseq }
  0x5d   :  { %1182 = vmatprep.subr.bf16.mxu0 %v1772_v37 }
  0x5e   :  { %v188_v36 = vshrl.u32 %v187_v35, 7 }
  0x5f   :  { %1077 = vmatpush1.bf16.msra.mxu1 %v1767_v38 }
  0x60   :  { %1183 = vmatpush1.bf16.msra.mxu0 %v1770_v39  ;;  %1078 = vmatprep.subr.bf16.mxu1 %v1775_v40  ;;  %v2386_v40 = vsub.s32 0, %v188_v36  ;;  %v2391_v43 = vsub.s32 1, %v188_v36 }
  0x61   :  { %1184 = vmatprep.subr.bf16.mxu0 %v1778_v42  ;;  %v185_v42 = vld [vmem:[%s2433_s2] sm:$0x3] }
  0x63   :  { %1079 = vmatpush1.bf16.msra.mxu1 %v1773_v44  ;;  %v190_v44 = vrot.slane %v185_v42, %v2386_v40 }
  0x64   :  { %1185 = vmatpush1.bf16.msra.mxu0 %v1776_v45  ;;  %1080 = vmatprep.subr.bf16.mxu1 %v1781_v46  ;;  %v194_v45 = vrot.slane %v185_v42, %v2391_v43 }
  0x65   :  { %1186 = vmatprep.subr.bf16.mxu0 %v1784_v47 }
  0x67   :  { %1081 = vmatpush1.bf16.msra.mxu1 %v1779_v48 }
  0x68   :  { %1187 = vmatpush1.bf16.msra.mxu0 %v1782_v49  ;;  %1082 = vmatprep.subr.bf16.mxu1 %v1787_v50 }
  0x69   :  { %1188 = vmatprep.subr.bf16.mxu0 %v1790_v51 }
  0x6b   :  { %1083 = vmatpush1.bf16.msra.mxu1 %v1785_v52 }
  0x6c   :  { %1189 = vmatpush1.bf16.msra.mxu0 %v1788_v53  ;;  %1084 = vmatprep.subr.bf16.mxu1 %v1793_v54 }
  0x6d   :  { %1190 = vmatprep.subr.bf16.mxu0 %v1796_v55 }
  0x6f   :  { %1085 = vmatpush1.bf16.msra.mxu1 %v1791_v56 }
  0x70   :  { %1191 = vmatpush1.bf16.msra.mxu0 %v1794_v57  ;;  %1086 = vmatprep.subr.bf16.mxu1 %v1799_v58 }
  0x71   :  { %1192 = vmatprep.subr.bf16.mxu0 %v1802_v59 }
  0x73   :  { %1087 = vmatpush1.bf16.msra.mxu1 %v1797_v60 }
  0x74   :  { %1193 = vmatpush1.bf16.msra.mxu0 %v1800_v61  ;;  %1088 = vmatprep.subr.bf16.mxu1 %v1805_v62 }
  0x75   :  { %1194 = vmatprep.subr.bf16.mxu0 %v1808_v63 }
  0x77   :  { %1089 = vmatpush1.bf16.msra.mxu1 %v1803_v0 }
  0x78   :  { %1195 = vmatpush1.bf16.msra.mxu0 %v1806_v1  ;;  %1090 = vmatprep.subr.bf16.mxu1 %v1816_v2 }
  0x79   :  { %1196 = vmatprep.subr.bf16.mxu0 %v1820_v3 }
  0x7b   :  { %1091 = vmatpush1.bf16.msra.mxu1 %v1814_v4 }
  0x7c   :  { %1197 = vmatpush1.bf16.msra.mxu0 %v1818_v5  ;;  %1092 = vmatprep.subr.bf16.mxu1 %v1823_v6 }
  0x7d   :  { %1198 = vmatprep.subr.bf16.mxu0 %v1826_v7 }
  0x7f   :  { %1093 = vmatpush1.bf16.msra.mxu1 %v1821_v8 }
  0x80   :  { %1199 = vmatpush1.bf16.msra.mxu0 %v1824_v9  ;;  %1566 = vmatprep.subr.bf16.mxu1 %v1835_v10 }
  0x81   :  { %1221 = vmatprep.subr.bf16.mxu0 %v1835_v10 }
  0x82   :  { %1095 = vmatmul.mubr.bf16.vlgmr.msra.gmra.mrb[0].mxu1 %v1827_v11 }
  0x83   :  { %1201 = vmatmul.mubr.bf16.vlgmr.msra.gmra.mrb[0].mxu0 %v1830_v12  ;;  %1574 = vmatpush1.bf16.msra.mxu1 %v1833_v13 }
  0x84   :  { %1222 = vmatpush1.bf16.msra.mxu0 %v1833_v13  ;;  %1567 = vmatprep.subr.bf16.mxu1 %v1838_v14 }
  0x85   :  { %1223 = vmatprep.subr.bf16.mxu0 %v1838_v14  ;;  %1104 = vmatprep.mubr.bf16.mxu1 %v1839_v15 }
  0x86   :  { %1210 = vmatprep.mubr.bf16.mxu0 %v1841_v16 }
  0x87   :  { %1575 = vmatpush1.bf16.msra.mxu1 %v1836_v17 }
  0x88   :  { %1224 = vmatpush1.bf16.msra.mxu0 %v1836_v17  ;;  %1568 = vmatprep.subr.bf16.mxu1 %v1847_v18 }
  0x89   :  { %1225 = vmatprep.subr.bf16.mxu0 %v1847_v18 }
  0x8a   :  { %1105 = vmatmul.mubr.bf16.gmra.mrb[4].mxu1 %v1843_v19 }
  0x8b   :  { %1211 = vmatmul.mubr.bf16.gmra.mrb[4].mxu0 %v1844_v20  ;;  %1576 = vmatpush1.bf16.msra.mxu1 %v1845_v21 }
  0x8c   :  { %1226 = vmatpush1.bf16.msra.mxu0 %v1845_v21  ;;  %1569 = vmatprep.subr.bf16.mxu1 %v1850_v22 }
  0x8d   :  { %1227 = vmatprep.subr.bf16.mxu0 %v1850_v22  ;;  %1253 = vmatprep.mubr.bf16.mxu0 %v1869_v25 }
  0x8e   :  { %1263 = vmatprep.mubr.bf16.mxu1 %v1869_v25 }
  0x8f   :  { %1577 = vmatpush1.bf16.msra.mxu1 %v1848_v23 }
  0x90   :  { %1228 = vmatpush1.bf16.msra.mxu0 %v1848_v23  ;;  %1570 = vmatprep.subr.bf16.mxu1 %v1853_v24 }
  0x91   :  { %1229 = vmatprep.subr.bf16.mxu0 %v1853_v24 }
  0x93   :  { %1578 = vmatpush1.bf16.msra.mxu1 %v1851_v26 }
  0x94   :  { %1230 = vmatpush1.bf16.msra.mxu0 %v1851_v26  ;;  %1571 = vmatprep.subr.bf16.mxu1 %v1856_v27 }
  0x95   :  { %1231 = vmatprep.subr.bf16.mxu0 %v1856_v27 }
  0x97   :  { %1579 = vmatpush1.bf16.msra.mxu1 %v1854_v28 }
  0x98   :  { %1232 = vmatpush1.bf16.msra.mxu0 %v1854_v28  ;;  %1572 = vmatprep.subr.bf16.mxu1 %v1859_v29 }
  0x99   :  { %1233 = vmatprep.subr.bf16.mxu0 %v1859_v29 }
  0x9b   :  { %1580 = vmatpush1.bf16.msra.mxu1 %v1857_v30 }
  0x9c   :  { %1234 = vmatpush1.bf16.msra.mxu0 %v1857_v30  ;;  %1573 = vmatprep.subr.bf16.mxu1 %v1862_v31 }
  0x9d   :  { %1235 = vmatprep.subr.bf16.mxu0 %v1862_v31 }
  0x9f   :  { %1581 = vmatpush1.bf16.msra.mxu1 %v1860_v32 }
  0xa0   :  { %1236 = vmatpush1.bf16.msra.mxu0 %v1860_v32 }
  0xa2   :  { %1264 = vmatmul.mubr.bf16.vlgmr.msra.gmra.mrb[8].mxu1 %v1864_v34 }
  0xa3   :  { %1254 = vmatmul.mubr.bf16.vlgmr.msra.gmra.mrb[0].mxu0 %v1863_v33 }
 0x155   :  { %v1096_v37 = vpop.f32.mrb[0].mxu1 }
 0x156   :  { %v1098_v38 = vpop.f32.mrb[1].mxu1  ;;  %v1582_v62 = vadd.f32 %v1096_v37, %v190_v44 }
 0x157   :  { %v1100_v39 = vpop.f32.mrb[2].mxu1  ;;  %v1584_v63 = vadd.f32 %v1098_v38, %v194_v45 }
 0x158   :  { %v1102_v41 = vpop.f32.mrb[3].mxu1  ;;  %v1586_v2 = vadd.f32 %v1100_v39, %v190_v44 }
 0x159   :  { %v1588_v7 = vadd.f32 %v1102_v41, %v194_v45 }
 0x15d   :  { %v1106_v46 = vpop.f32.mrb[4].mxu1 }
 0x15e   :  { %v1212_v47 = vpop.f32.mrb[4].mxu0  ;;  %v1590_v48 = vadd.f32 %v1106_v46, %v190_v44  ;;  %v1108_v49 = vpop.f32.mrb[5].mxu1 }
 0x15f   :  { %v1214_v50 = vpop.f32.mrb[5].mxu0  ;;  %v1593_v51 = vadd.f32 %v1108_v49, %v194_v45  ;;  %v1110_v52 = vpop.f32.mrb[6].mxu1 }
 0x160   :  { %v1216_v53 = vpop.f32.mrb[6].mxu0  ;;  %v1591_v54 = vadd.f32 %v1590_v48, %v1212_v47  ;;  %v1596_v55 = vadd.f32 %v1110_v52, %v190_v44  ;;  %v1112_v56 = vpop.f32.mrb[7].mxu1 }
 0x161   :  { %v1218_v57 = vpop.f32.mrb[7].mxu0  ;;  %v1594_v58 = vadd.f32 %v1593_v51, %v1214_v50  ;;  %v1599_v59 = vadd.f32 %v1112_v56, %v194_v45 }
 0x162   :  { %v1597_v60 = vadd.f32 %v1596_v55, %v1216_v53 }
 0x163   :  { %v1600_v61 = vadd.f32 %v1599_v59, %v1218_v57 }
 0x175   :  { %v1265_v1 = vpop.f32.mrb[8].mxu1 }
 0x176   :  { %v1255_v0 = vpop.f32.mrb[0].mxu0  ;;  %v1592_v4 = vadd.f32 %v1591_v54, %v1265_v1  ;;  %v1267_v6 = vpop.f32.mrb[9].mxu1 }
 0x177   :  { %v1583_v3 = vadd.f32 %v1582_v62, %v1255_v0  ;;  %v1257_v5 = vpop.f32.mrb[1].mxu0  ;;  %v1595_v9 = vadd.f32 %v1594_v58, %v1267_v6  ;;  %v1269_v11 = vpop.f32.mrb[10].mxu1 }
 0x178   :  { %v1585_v8 = vadd.f32 %v1584_v63, %v1257_v5  ;;  %v1259_v10 = vpop.f32.mrb[2].mxu0  ;;  %v1598_v13 = vadd.f32 %v1597_v60, %v1269_v11  ;;  %v1271_v15 = vpop.f32.mrb[11].mxu1 }
 0x179   :  { %v1587_v12 = vadd.f32 %v1586_v2, %v1259_v10  ;;  %v1261_v14 = vpop.f32.mrb[3].mxu0  ;;  %v1601_v17 = vadd.f32 %v1600_v61, %v1271_v15 }
 0x17a   :  { %v1589_v16 = vadd.f32 %v1588_v7, %v1261_v14  ;;  %v1334_v14 = vld [vmem:[%s2434_s3] sm:$0x3] }
 0x17b   :  { %v1274_v18 = vadd.f32 %v1587_v12, %v1583_v3  ;;  %v1339_v15 = vrot.slane %v1334_v14, %v2386_v40 }
 0x17c   :  { %v1283_v19 = vadd.f32 %v1589_v16, %v1585_v8 }
 0x17d   :  { %v1275_v20 = vadd.f32 %v1592_v4, %v1274_v18  ;;  %v1364_v18 = vld [vmem:[%s2435_s4] sm:$0x3] }
 0x17e   :  { %v1284_v21 = vadd.f32 %v1595_v9, %v1283_v19 }
 0x17f   :  { %v1276_v22 = vadd.f32 %v1598_v13, %v1275_v20 }
 0x180   :  { %v1285_v23 = vadd.f32 %v1601_v17, %v1284_v21 }
 0x181   :  { %v1277_v24 = vrot.slane %v1276_v22, 4 }
 0x182   :  { %v1286_v25 = vrot.slane %v1285_v23, 4 }
 0x183   :  { %v1278_v26 = vadd.f32 %v1277_v24, %v1276_v22 }
 0x184   :  { %v1287_v27 = vadd.f32 %v1286_v25, %v1285_v23  ;;  %v1369_v23 = vrot.slane %v1364_v18, %v2386_v40  ;;  %v1373_v25 = vrot.slane %v1364_v18, %v2391_v43 }
 0x185   :  { %v1279_v28 = vrot.slane %v1278_v26, 2 }
 0x186   :  { %v1288_v29 = vrot.slane %v1287_v27, 2 }
 0x187   :  { %v1280_v30 = vadd.f32 %v1279_v28, %v1278_v26 }
 0x188   :  { %v1289_v31 = vadd.f32 %v1288_v29, %v1287_v27 }
 0x189   :  { %v1281_v32 = vrot.slane %v1280_v30, 1 }
 0x18a   :  { %v1290_v33 = vrot.slane %v1289_v31, 1 }
 0x18b   :  { %v1282_v34 = vadd.f32 %v1281_v32, %v1280_v30 }
 0x18c   :  { %v1291_v35 = vadd.f32 %v1290_v33, %v1289_v31 }
 0x18d   :  { %v1292_v36 = vmul.f32 0.03125, %v1282_v34 }
 0x18e   :  { %v1293_v37 = vmul.f32 0.03125, %v1291_v35 }
 0x18f   :  { %v1294_v38 = vsub.f32 %v1583_v3, %v1292_v36  ;;  %v1296_v39 = vsub.f32 %v1587_v12, %v1292_v36  ;;  %v1298_v41 = vsub.f32 %v1592_v4, %v1292_v36  ;;  %v1300_v42 = vsub.f32 %v1598_v13, %v1292_v36 }
 0x190   :  { %v1295_v44 = vsub.f32 %v1585_v8, %v1293_v37  ;;  %v1297_v45 = vsub.f32 %v1589_v16, %v1293_v37  ;;  %v1299_v46 = vsub.f32 %v1595_v9, %v1293_v37  ;;  %v1301_v47 = vsub.f32 %v1601_v17, %v1293_v37 }
 0x191   :  { %v1302_v48 = vmul.f32 %v1294_v38, %v1294_v38  ;;  %v1304_v49 = vmul.f32 %v1296_v39, %v1296_v39  ;;  %v1306_v52 = vmul.f32 %v1298_v41, %v1298_v41  ;;  %v1308_v56 = vmul.f32 %v1300_v42, %v1300_v42 }
 0x192   :  { %v1303_v50 = vmul.f32 %v1295_v44, %v1295_v44  ;;  %v1305_v51 = vmul.f32 %v1297_v45, %v1297_v45  ;;  %v1307_v54 = vmul.f32 %v1299_v46, %v1299_v46  ;;  %v1309_v58 = vmul.f32 %v1301_v47, %v1301_v47 }
 0x193   :  { %v1310_v53 = vadd.f32 %v1304_v49, %v1302_v48  ;;  %v1343_v16 = vrot.slane %v1334_v14, %v2391_v43 }
 0x194   :  { %v1319_v55 = vadd.f32 %v1305_v51, %v1303_v50 }
 0x195   :  { %v1311_v57 = vadd.f32 %v1310_v53, %v1306_v52 }
 0x196   :  { %v1320_v59 = vadd.f32 %v1319_v55, %v1307_v54 }
 0x197   :  { %v1312_v60 = vadd.f32 %v1311_v57, %v1308_v56 }
 0x198   :  { %v1321_v61 = vadd.f32 %v1320_v59, %v1309_v58 }
 0x199   :  { %v1313_v62 = vrot.slane %v1312_v60, 4 }
 0x19a   :  { %v1322_v63 = vrot.slane %v1321_v61, 4 }
 0x19b   :  { %v1314_v0 = vadd.f32 %v1313_v62, %v1312_v60 }
 0x19c   :  { %v1323_v1 = vadd.f32 %v1322_v63, %v1321_v61 }
 0x19d   :  { %v1315_v2 = vrot.slane %v1314_v0, 2 }
 0x19e   :  { %v1324_v3 = vrot.slane %v1323_v1, 2 }
 0x19f   :  { %v1316_v4 = vadd.f32 %v1315_v2, %v1314_v0 }
 0x1a0   :  { %v1325_v5 = vadd.f32 %v1324_v3, %v1323_v1 }
 0x1a1   :  { %v1317_v6 = vrot.slane %v1316_v4, 1 }
 0x1a2   :  { %v1326_v7 = vrot.slane %v1325_v5, 1 }
 0x1a3   :  { %v1318_v8 = vadd.f32 %v1317_v6, %v1316_v4 }
 0x1a4   :  { %v1327_v9 = vadd.f32 %v1326_v7, %v1325_v5 }
 0x1a5   :  { %v1328_v10 = vmul.f32 0.03125, %v1318_v8 }
 0x1a6   :  { %v1329_v11 = vmul.f32 0.03125, %v1327_v9 }
 0x1a7   :  { %v1330_v12 = vadd.f32 1e-05, %v1328_v10 }
 0x1a8   :  { %v1331_v13 = vadd.f32 1e-05, %v1329_v11 }
 0x1a9   :  { %1865 = vrsqrt.f32 %v1330_v12 }
 0x1aa   :  { %1867 = vrsqrt.f32 %v1331_v13 }
 0x1b3   :  { %v1866_v17 = vpop.eup %1865 }
 0x1b4   :  { %v1868_v19 = vpop.eup %1867  ;;  %v1346_v20 = vmul.f32 %v1866_v17, %v1339_v15 }
 0x1b5   :  { %v1347_v21 = vmul.f32 %v1868_v19, %v1343_v16 }
 0x1b6   :  { %v1351_v22 = vrot.slane %v1346_v20, %v2386_v40 }
 0x1b7   :  { %v1355_v24 = vrot.slane %v1347_v21, %v2386_v40 }
 0x1b8   :  { %v1356_v26 = vmul.f32 %v1351_v22, %v1294_v38  ;;  %v1358_v27 = vmul.f32 %v1351_v22, %v1296_v39  ;;  %v1360_v28 = vmul.f32 %v1351_v22, %v1298_v41  ;;  %v1362_v29 = vmul.f32 %v1351_v22, %v1300_v42 }
 0x1b9   :  { %v1357_v30 = vmul.f32 %v1355_v24, %v1295_v44  ;;  %v1359_v31 = vmul.f32 %v1355_v24, %v1297_v45  ;;  %v1361_v32 = vmul.f32 %v1355_v24, %v1299_v46  ;;  %v1363_v33 = vmul.f32 %v1355_v24, %v1301_v47 }
 0x1ba   :  { %v1376_v34 = vadd.f32 %v1369_v23, %v1356_v26  ;;  %v1378_v35 = vadd.f32 %v1369_v23, %v1358_v27  ;;  %v1380_v36 = vadd.f32 %v1369_v23, %v1360_v28  ;;  %v1382_v37 = vadd.f32 %v1369_v23, %v1362_v29 }
 0x1bb   :  { %v1377_v48 = vadd.f32 %v1373_v25, %v1357_v30  ;;  %v1379_v49 = vadd.f32 %v1373_v25, %v1359_v31  ;;  %v1381_v50 = vadd.f32 %v1373_v25, %v1361_v32  ;;  %v1383_v51 = vadd.f32 %v1373_v25, %v1363_v33 }
 0x1bc   :  { %v1384_v52 = vmax.f32 %v1376_v34, 0.0  ;;  %v1386_v40 = vmax.f32 %v1378_v35, 0.0  ;;  %v1388_v53 = vmax.f32 %v1380_v36, 0.0  ;;  %v1390_v43 = vmax.f32 %v1382_v37, 0.0 }
 0x1bd   :  { %v1385_v38 = vmax.f32 %v1377_v48, 0.0  ;;  %v1387_v39 = vmax.f32 %v1379_v49, 0.0  ;;  %v1389_v41 = vmax.f32 %v1381_v50, 0.0  ;;  %v1391_v42 = vmax.f32 %v1383_v51, 0.0 }
 0x1be   :  { %1392 = vst [vmem:[%s2436_s5] sm:$0xff] %v1384_v52  ;;  %1394 = vst [vmem:[%s2436_s5 + $0x10] sm:$0xff] %v1386_v40 }
 0x1bf   :  { %1396 = vst [vmem:[%s2436_s5 + $0x20] sm:$0xff] %v1388_v53  ;;  %1398 = vst [vmem:[%s2436_s5 + $0x30] sm:$0xff] %v1390_v43 }
 0x1c0   :  { %1393 = vst [vmem:[%s2436_s5 + $0x8] sm:$0xff] %v1385_v38  ;;  %1395 = vst [vmem:[%s2436_s5 + $0x18] sm:$0xff] %v1387_v39 }
 0x1c1   :  { %1397 = vst [vmem:[%s2436_s5 + $0x28] sm:$0xff] %v1389_v41  ;;  %1399 = vst [vmem:[%s2436_s5 + $0x38] sm:$0xff] %v1391_v42 }

</bundles_post_ra>
